<compile_context>
chip_gen: v7x
topology: tpu7x:2x2x1
jax: 0.10.0
libtpu: 0.0.40
codegen_flags: <defaults>
</compile_context>

<pallas_src>
import functools

import jax
import jax.numpy as jnp
from jax import lax
from jax.experimental import pallas as pl
from jax.experimental.pallas import tpu as pltpu


# ---------------------------------------------------------------------------
# Tile picking
# ---------------------------------------------------------------------------
def _pick_tile(n, want, *, cap, multiple, prefer_grid_ge_2):
    """Largest multiple of `multiple` that divides n, <= cap; else full n."""
    if want is not None:
        assert n % want == 0, (n, want)
        return want
    cands = [t for t in range(multiple, min(cap, n) + 1, multiple) if n % t == 0]
    if prefer_grid_ge_2:
        two = [t for t in cands if n // t >= 2]
        if two:
            return max(two)
    if cands:
        return max(cands)
    return n  # full-extent block is always legal


# ---------------------------------------------------------------------------
# Path A: small/medium N — one fused kernel, single-pass softmax.
# ---------------------------------------------------------------------------
def _gat_fused_kernel(hq_ref, hall_ref, w_ref, o_ref, *, num_heads, out_dim, d_pad):
    # hq_ref  : (tq, in_dim)  bf16  destination-node features (this q tile)
    # hall_ref: (N,  in_dim)  bf16  all source-node features
    # w_ref   : (in_dim, H*d_pad) bf16, head h lives in lanes [h*d_pad, h*d_pad+D)
    # o_ref   : (tq, H*out_dim) f32 final concatenated head outputs
    hq = hq_ref[...]
    hall = hall_ref[...]
    w = w_ref[...]

    # Fused projection (in_dim is tiny; recompute of zk per q tile is trivial
    # and saves a kernel launch + an HBM round trip of Z).
    zq = jnp.dot(hq, w, preferred_element_type=jnp.float32).astype(jnp.bfloat16)
    zk = jnp.dot(hall, w, preferred_element_type=jnp.float32).astype(jnp.bfloat16)

    # Ones column at lane h*d_pad + out_dim of each head tile.  Those lanes of
    # zk are exactly zero (zero-padded W), so a plain add suffices.  zq keeps
    # zeros there, so scores are exact; the PV matmul's column `out_dim` then
    # yields the softmax denominator for free (row-sum on the MXU, not XLU).
    lane = lax.broadcasted_iota(jnp.int32, zk.shape, dimension=1)
    ones_mask = ((lane % d_pad) == out_dim).astype(jnp.bfloat16)
    zk_aug = zk + ones_mask

    outs = []
    for hh in range(num_heads):                     # small static unroll
        lo = hh * d_pad                             # lane-tile-aligned slice
        zq_h = zq[:, lo:lo + d_pad]                 # (tq, d_pad) bf16
        zk_h = zk_aug[:, lo:lo + d_pad]             # (N,  d_pad) bf16
        # scores s[dst, src] = z_dst . z_src ; contract last dims (no .T)
        s = lax.dot_general(zq_h, zk_h, (((1,), (1,)), ((), ())),
                            preferred_element_type=jnp.float32)   # (tq, N) f32
        # Single-pass softmax over the full source axis: no m/l rescale work.
        m = jnp.max(s, axis=-1, keepdims=True)
        p = jnp.exp(s - m)                                        # f32 exp (safe on all gens)
        acc = jnp.dot(p.astype(jnp.bfloat16), zk_h,
                      preferred_element_type=jnp.float32)         # (tq, d_pad) f32
        inv_l = pl.reciprocal(acc[:, out_dim:out_dim + 1], approx=True)  # EUP slot
        outs.append(acc[:, :out_dim] * inv_l)
    # One store of the full concat block (coalesced; single vst path on v5e).
    o_ref[...] = jnp.concatenate(outs, axis=1).astype(o_ref.dtype)


def _gat_small_n(h, w_stack, block_q):
    n, in_dim = h.shape
    num_heads, out_dim, _ = w_stack.shape
    hdim = num_heads * out_dim
    d_pad = 128  # one full lane tile per head -> aligned per-head slices

    tq = _pick_tile(n, block_q, cap=128, multiple=8, prefer_grid_ge_2=True)

    # Wrapper-side layout plumbing (free): W_pad[:, h*128 : h*128+D] = W_h^T.
    w_t = jnp.transpose(w_stack, (2, 0, 1))                       # (in_dim, H, D)
    w_pad = jnp.zeros((in_dim, num_heads, d_pad), jnp.float32)
    w_pad = w_pad.at[:, :, :out_dim].set(w_t)
    w_pad = w_pad.reshape(in_dim, num_heads * d_pad).astype(jnp.bfloat16)
    h_bf = h.astype(jnp.bfloat16)

    kernel = functools.partial(_gat_fused_kernel, num_heads=num_heads,
                               out_dim=out_dim, d_pad=d_pad)
    return pl.pallas_call(
        kernel,
        out_shape=jax.ShapeDtypeStruct((n, hdim), jnp.float32),
        grid_spec=pltpu.PrefetchScalarGridSpec(
            num_scalar_prefetch=0,
            grid=(n // tq,),
            in_specs=[
                pl.BlockSpec((tq, in_dim), lambda i: (i, 0)),                  # dst rows
                pl.BlockSpec((n, in_dim), lambda i: (0, 0)),                   # all src rows
                pl.BlockSpec((in_dim, num_heads * d_pad), lambda i: (0, 0)),   # padded W
            ],
            out_specs=pl.BlockSpec((tq, hdim), lambda i: (i, 0)),
        ),
        compiler_params=pltpu.CompilerParams(
            dimension_semantics=("parallel",),
            vmem_limit_bytes=32 * 1024 * 1024,   # <= 32 MiB: safe on v7x (64 MiB/TC)
        ),
    )(h_bf, h_bf, w_pad)


# ---------------------------------------------------------------------------
# Path B: large N — head-major projection + flash-style online softmax.
# ---------------------------------------------------------------------------
def _project_headmajor_kernel(h_ref, w_ref, z_ref, *, num_heads):
    # h_ref: (tz, in_dim) bf16; w_ref: (H, in_dim, D) bf16; z_ref: (H, tz, D+1) bf16
    hb = h_ref[...]
    for hh in range(num_heads):
        z = jnp.dot(hb, w_ref[hh], preferred_element_type=jnp.float32)  # (tz, D)
        ones = jnp.ones((z.shape[0], 1), jnp.float32)
        # Append the "+1" column: adds a uniform +1 to every attention score
        # (softmax is shift-invariant) and lets the PV matmul produce the
        # softmax denominator in its last column (row-sum folded onto the MXU).
        z_ref[hh] = jnp.concatenate([z, ones], axis=1).astype(z_ref.dtype)


def _gat_online_kernel(zq_ref, zk_ref, o_ref, m_scr, acc_scr, *, out_dim):
    # zq_ref: (1, tq, D+1) bf16   zk_ref: (1, tk, D+1) bf16
    # o_ref : (1, tq, D)   f32
    # m_scr : (tq, 1) f32 running max; acc_scr: (tq, D+1) f32 running [acc | denom]
    k = pl.program_id(2)

    @pl.when(k == 0)
    def _():
        m_scr[...] = jnp.full_like(m_scr, -jnp.inf)
        acc_scr[...] = jnp.zeros_like(acc_scr)

    zq = zq_ref[0]
    zk = zk_ref[0]
    s = lax.dot_general(zq, zk, (((1,), (1,)), ((), ())),
                        preferred_element_type=jnp.float32)      # (tq, tk) f32 (+1 shift)
    m_prev = m_scr[...]
    m_new = jnp.maximum(m_prev, jnp.max(s, axis=-1, keepdims=True))
    a = jnp.exp(m_prev - m_new)                                  # (tq, 1) f32
    # NOTE(perf, v6e/v7x): casting (s - m_new) to bf16 before exp roughly
    # doubles EUP throughput there; kept f32 (exact path, required on v5e).
    p = jnp.exp(s - m_new)                                       # (tq, tk) f32
    # Single coalesced accumulator update: numerator cols 0..D-1, denom col D.
    acc_scr[...] = a * acc_scr[...] + jnp.dot(
        p.astype(zk.dtype), zk, preferred_element_type=jnp.float32)
    m_scr[...] = m_new

    @pl.when(k == pl.num_programs(2) - 1)
    def _():
        acc = acc_scr[...]
        inv_l = pl.reciprocal(acc[:, out_dim:out_dim + 1], approx=True)   # EUP slot
        o_ref[0] = (acc[:, :out_dim] * inv_l).astype(o_ref.dtype)


def _gat_large_n(h, w_stack, block_q, block_k):
    n, in_dim = h.shape
    num_heads, out_dim, _ = w_stack.shape
    d_aug = out_dim + 1

    # tk capped (grow tq instead): avoids large live (tq, tk) f32 intermediates.
    tq = _pick_tile(n, block_q, cap=512, multiple=16, prefer_grid_ge_2=True)
    tk = _pick_tile(n, block_k, cap=256, multiple=16, prefer_grid_ge_2=False)
    tz = _pick_tile(n, None, cap=512, multiple=16, prefer_grid_ge_2=True)

    w_t = jnp.transpose(w_stack, (0, 2, 1)).astype(jnp.bfloat16)   # (H, in_dim, D)
    h_bf = h.astype(jnp.bfloat16)

    # 1) head-major projection Z_aug[h, i] = [h_i @ W_h^T, 1]  -> (H, N, D+1) bf16
    z_aug = pl.pallas_call(
        functools.partial(_project_headmajor_kernel, num_heads=num_heads),
        out_shape=jax.ShapeDtypeStruct((num_heads, n, d_aug), jnp.bfloat16),
        grid_spec=pltpu.PrefetchScalarGridSpec(
            num_scalar_prefetch=0,
            grid=(n // tz,),
            in_specs=[
                pl.BlockSpec((tz, in_dim), lambda i: (i, 0)),
                pl.BlockSpec((num_heads, in_dim, out_dim), lambda i: (0, 0, 0)),
            ],
            out_specs=pl.BlockSpec((num_heads, tz, d_aug), lambda i: (0, i, 0)),
        ),
        compiler_params=pltpu.CompilerParams(
            dimension_semantics=("parallel",),
            vmem_limit_bytes=32 * 1024 * 1024,
        ),
    )(h_bf, w_t)

    # 2) flash-style online softmax; head as a grid axis (contiguous per-head
    #    blocks, no sub-lane head slicing inside the k loop).
    #    NOTE(perf): if profiling a very large N shows exposed DMA, add
    #    pipeline_mode=pl.Buffered(3) on the zk BlockSpec.
    out_hnd = pl.pallas_call(
        functools.partial(_gat_online_kernel, out_dim=out_dim),
        out_shape=jax.ShapeDtypeStruct((num_heads, n, out_dim), jnp.float32),
        grid_spec=pltpu.PrefetchScalarGridSpec(
            num_scalar_prefetch=0,
            grid=(num_heads, n // tq, n // tk),
            in_specs=[
                pl.BlockSpec((1, tq, d_aug), lambda hh, q, k: (hh, q, 0)),   # destinations
                pl.BlockSpec((1, tk, d_aug), lambda hh, q, k: (hh, k, 0)),   # sources
            ],
            out_specs=pl.BlockSpec((1, tq, out_dim), lambda hh, q, k: (hh, q, 0)),
            scratch_shapes=[
                pltpu.VMEM((tq, 1), jnp.float32),       # running max
                pltpu.VMEM((tq, d_aug), jnp.float32),   # running [acc | denom]
            ],
        ),
        compiler_params=pltpu.CompilerParams(
            dimension_semantics=("parallel", "parallel", "arbitrary"),
            vmem_limit_bytes=32 * 1024 * 1024,
        ),
    )(z_aug, z_aug)

    # (H, N, D) -> (N, H*D) concat layout; O(N*H*D) plumbing, negligible vs O(N^2).
    return jnp.transpose(out_hnd, (1, 0, 2)).reshape(n, num_heads * out_dim)


# ---------------------------------------------------------------------------
# Public wrapper
# ---------------------------------------------------------------------------
def multi_head_gat_layer(h, w_stack, merge="cat", *, block_q=None, block_k=None,
                         single_pass_max_n=1024):
    """h: (N, in_dim) f32; w_stack: (num_heads, out_dim, in_dim) f32."""
    n, _ = h.shape
    num_heads, out_dim, _ = w_stack.shape

    if n <= single_pass_max_n:
        out = _gat_small_n(h, w_stack, block_q)          # fused, single-pass softmax
    else:
        out = _gat_large_n(h, w_stack, block_q, block_k)  # online-softmax flash path

    if merge == "cat":
        # torch.cat(head_outs, dim=1) layout: (N, num_heads*out_dim).
        return out
    # torch.mean(torch.stack(head_outs)) -> scalar (same element set as concat).
    return jnp.mean(out)


# ---------------------------------------------------------------------------
# Pure-JAX reference
# ---------------------------------------------------------------------------
def _reference(h, w_stack, merge="cat"):
    outs = []
    for hd in range(w_stack.shape[0]):
        z = h @ w_stack[hd].T
        s = z @ z.T
        alpha = jax.nn.softmax(s, axis=-1)
        outs.append(alpha @ z)
    if merge == "cat":
        return jnp.concatenate(outs, axis=1)
    return jnp.mean(jnp.stack(outs))


if __name__ == "__main__":
    # Small deterministic setup (exercises both the single-pass fused path and
    # the online-softmax large-N path with 128x128 tiles).
    num_heads = 3
    N, in_dim, out_dim = 256, 32, 16

    key = jax.random.PRNGKey(0)
    k_h, k_w, k_a = jax.random.split(key, 3)

    h = jax.random.normal(k_h, (N, in_dim), dtype=jnp.float32)
    # nn.Linear(in_dim, out_dim, bias=False) weight: (out_dim, in_dim), per head.
    bound = 1.0 / (in_dim ** 0.5)
    w_stack = jax.random.uniform(
        k_w, (num_heads, out_dim, in_dim), dtype=jnp.float32,
        minval=-bound, maxval=bound)
    # attn_fc weights exist in the module but are unused by its forward pass.
    _attn_fc_unused = jax.random.uniform(
        k_a, (num_heads, 1, 2 * out_dim), dtype=jnp.float32,
        minval=-1.0 / ((2 * out_dim) ** 0.5), maxval=1.0 / ((2 * out_dim) ** 0.5))

    ref = _reference(h, w_stack, merge="cat")

    # Path A: fused single-pass kernel (default for N <= 1024).
    out_a = jax.block_until_ready(multi_head_gat_layer(h, w_stack, merge="cat"))
    assert out_a.shape == (N, num_heads * out_dim), out_a.shape
    err_a = float(jnp.max(jnp.abs(out_a - ref)))
    assert jnp.allclose(out_a, ref, atol=5e-2, rtol=5e-2), f"path A mismatch, max_err={err_a}"

    # Path B: online-softmax large-N path, forced here on small shapes to verify it.
    out_b = jax.block_until_ready(
        multi_head_gat_layer(h, w_stack, merge="cat",
                             block_q=128, block_k=128, single_pass_max_n=0))
    err_b = float(jnp.max(jnp.abs(out_b - ref)))
    assert jnp.allclose(out_b, ref, atol=5e-2, rtol=5e-2), f"path B mismatch, max_err={err_b}"

    print("KERNEL_OK")
</pallas_src>

<mosaic_0001>
module attributes {stable_mosaic.version = 11 : i64} {
  func.func @_gat_fused_kernel(%arg0: i32, %arg1: memref<128x32xbf16, #tpu.memory_space<vmem>>, %arg2: memref<256x32xbf16, #tpu.memory_space<vmem>>, %arg3: memref<32x384xbf16, #tpu.memory_space<vmem>>, %arg4: memref<128x48xf32, #tpu.memory_space<vmem>>) attributes {dimension_semantics = [#tpu.dimension_semantics<parallel>], iteration_bounds = array<i64: 2>, scalar_prefetch = 0 : i64, scratch_operands = 0 : i64, tpu.core_type = #tpu.core_type<tc>, window_params = [{transform_indices = @transform_0, window_bounds = array<i64: 128, 32>}, {pipeline_mode = #tpu.pipeline_mode<synchronous>, transform_indices = @transform_1, window_bounds = array<i64: 256, 32>}, {pipeline_mode = #tpu.pipeline_mode<synchronous>, transform_indices = @transform_2, window_bounds = array<i64: 32, 384>}, {transform_indices = @transform_3, window_bounds = array<i64: 128, 48>}]} {
    %c0 = arith.constant 0 : index
    %c0_0 = arith.constant 0 : index
    %0 = vector.load %arg1[%c0, %c0_0] : memref<128x32xbf16, #tpu.memory_space<vmem>>, vector<128x32xbf16>
    %c0_1 = arith.constant 0 : index
    %c0_2 = arith.constant 0 : index
    %1 = vector.load %arg2[%c0_1, %c0_2] : memref<256x32xbf16, #tpu.memory_space<vmem>>, vector<256x32xbf16>
    %c0_3 = arith.constant 0 : index
    %c0_4 = arith.constant 0 : index
    %2 = vector.load %arg3[%c0_3, %c0_4] : memref<32x384xbf16, #tpu.memory_space<vmem>>, vector<32x384xbf16>
    %cst = arith.constant dense<0.000000e+00> : vector<128x384xf32>
    %3 = tpu.matmul %0, %2, %cst {dimension_numbers = #tpu.dot_dimension_numbers<[1], [0], [0], [1], [0, 0, 1, 1], [], []>} : vector<128x32xbf16>, vector<32x384xbf16>, vector<128x384xf32> -> vector<128x384xf32>
    %4 = arith.truncf %3 : vector<128x384xf32> to vector<128x384xbf16>
    %cst_5 = arith.constant dense<0.000000e+00> : vector<256x384xf32>
    %5 = tpu.matmul %1, %2, %cst_5 {dimension_numbers = #tpu.dot_dimension_numbers<[1], [0], [0], [1], [0, 0, 1, 1], [], []>} : vector<256x32xbf16>, vector<32x384xbf16>, vector<256x384xf32> -> vector<256x384xf32>
    %6 = arith.truncf %5 : vector<256x384xf32> to vector<256x384xbf16>
    %7 = tpu.iota {dimensions = array<i32: 1>} : vector<256x384xi32>
    %c128_i32 = arith.constant 128 : i32
    %c0_i32 = arith.constant 0 : i32
    %8 = arith.cmpi eq, %c128_i32, %c0_i32 : i32
    %c1_i32 = arith.constant 1 : i32
    %9 = arith.select %8, %c1_i32, %c128_i32 : i32
    %10 = vector.broadcast %9 : i32 to vector<256x384xi32>
    %11 = arith.remsi %7, %10 : vector<256x384xi32>
    %c0_i32_6 = arith.constant 0 : i32
    %12 = vector.broadcast %c0_i32_6 : i32 to vector<256x384xi32>
    %13 = arith.cmpi ne, %11, %12 : vector<256x384xi32>
    %c0_i32_7 = arith.constant 0 : i32
    %14 = vector.broadcast %c0_i32_7 : i32 to vector<256x384xi32>
    %15 = arith.cmpi slt, %11, %14 : vector<256x384xi32>
    %c0_i32_8 = arith.constant 0 : i32
    %16 = arith.cmpi slt, %9, %c0_i32_8 : i32
    %17 = vector.broadcast %16 : i1 to vector<256x384xi1>
    %18 = vector.broadcast %17 : vector<256x384xi1> to vector<256x384xi1>
    %19 = arith.xori %15, %18 : vector<256x384xi1>
    %20 = arith.andi %19, %13 : vector<256x384xi1>
    %21 = vector.broadcast %9 : i32 to vector<256x384xi32>
    %22 = arith.addi %11, %21 : vector<256x384xi32>
    %23 = arith.select %20, %22, %11 : vector<256x384xi1>, vector<256x384xi32>
    %c16_i32 = arith.constant 16 : i32
    %24 = vector.broadcast %c16_i32 : i32 to vector<256x384xi32>
    %25 = arith.cmpi eq, %23, %24 : vector<256x384xi32>
    %26 = arith.extui %25 : vector<256x384xi1> to vector<256x384xi32>
    %27 = arith.sitofp %26 : vector<256x384xi32> to vector<256x384xf32>
    %28 = arith.truncf %27 : vector<256x384xf32> to vector<256x384xbf16>
    %29 = arith.addf %6, %28 : vector<256x384xbf16>
    %30 = vector.extract_strided_slice %4 {offsets = [0, 0], sizes = [128, 128], strides = [1, 1]} : vector<128x384xbf16> to vector<128x128xbf16>
    %31 = vector.extract_strided_slice %29 {offsets = [0, 0], sizes = [256, 128], strides = [1, 1]} : vector<256x384xbf16> to vector<256x128xbf16>
    %cst_9 = arith.constant dense<0.000000e+00> : vector<128x256xf32>
    %32 = tpu.matmul %30, %31, %cst_9 {dimension_numbers = #tpu.dot_dimension_numbers<[1], [1], [0], [0], [0, 0, 1, 0], [], []>} : vector<128x128xbf16>, vector<256x128xbf16>, vector<128x256xf32> -> vector<128x256xf32>
    %cst_10 = arith.constant dense<0xFF800000> : vector<128xf32>
    %33 = vector.multi_reduction <maximumf>, %32, %cst_10 [1] : vector<128x256xf32> to vector<128xf32>
    %34 = vector.shape_cast %33 : vector<128xf32> to vector<128x1xf32>
    %35 = vector.broadcast %34 : vector<128x1xf32> to vector<128x256xf32>
    %36 = arith.subf %32, %35 : vector<128x256xf32>
    %37 = math.exp %36 : vector<128x256xf32>
    %38 = arith.truncf %37 : vector<128x256xf32> to vector<128x256xbf16>
    %cst_11 = arith.constant dense<0.000000e+00> : vector<128x128xf32>
    %39 = tpu.matmul %38, %31, %cst_11 {dimension_numbers = #tpu.dot_dimension_numbers<[1], [0], [0], [1], [0, 0, 1, 1], [], []>} : vector<128x256xbf16>, vector<256x128xbf16>, vector<128x128xf32> -> vector<128x128xf32>
    %40 = vector.extract_strided_slice %39 {offsets = [0, 16], sizes = [128, 1], strides = [1, 1]} : vector<128x128xf32> to vector<128x1xf32>
    %41 = tpu.reciprocal %40 {approx = true} : vector<128x1xf32> -> vector<128x1xf32>
    %42 = vector.extract_strided_slice %39 {offsets = [0, 0], sizes = [128, 16], strides = [1, 1]} : vector<128x128xf32> to vector<128x16xf32>
    %43 = vector.broadcast %41 : vector<128x1xf32> to vector<128x16xf32>
    %44 = arith.mulf %42, %43 : vector<128x16xf32>
    %45 = vector.extract_strided_slice %4 {offsets = [0, 128], sizes = [128, 128], strides = [1, 1]} : vector<128x384xbf16> to vector<128x128xbf16>
    %46 = vector.extract_strided_slice %29 {offsets = [0, 128], sizes = [256, 128], strides = [1, 1]} : vector<256x384xbf16> to vector<256x128xbf16>
    %cst_12 = arith.constant dense<0.000000e+00> : vector<128x256xf32>
    %47 = tpu.matmul %45, %46, %cst_12 {dimension_numbers = #tpu.dot_dimension_numbers<[1], [1], [0], [0], [0, 0, 1, 0], [], []>} : vector<128x128xbf16>, vector<256x128xbf16>, vector<128x256xf32> -> vector<128x256xf32>
    %cst_13 = arith.constant dense<0xFF800000> : vector<128xf32>
    %48 = vector.multi_reduction <maximumf>, %47, %cst_13 [1] : vector<128x256xf32> to vector<128xf32>
    %49 = vector.shape_cast %48 : vector<128xf32> to vector<128x1xf32>
    %50 = vector.broadcast %49 : vector<128x1xf32> to vector<128x256xf32>
    %51 = arith.subf %47, %50 : vector<128x256xf32>
    %52 = math.exp %51 : vector<128x256xf32>
    %53 = arith.truncf %52 : vector<128x256xf32> to vector<128x256xbf16>
    %cst_14 = arith.constant dense<0.000000e+00> : vector<128x128xf32>
    %54 = tpu.matmul %53, %46, %cst_14 {dimension_numbers = #tpu.dot_dimension_numbers<[1], [0], [0], [1], [0, 0, 1, 1], [], []>} : vector<128x256xbf16>, vector<256x128xbf16>, vector<128x128xf32> -> vector<128x128xf32>
    %55 = vector.extract_strided_slice %54 {offsets = [0, 16], sizes = [128, 1], strides = [1, 1]} : vector<128x128xf32> to vector<128x1xf32>
    %56 = tpu.reciprocal %55 {approx = true} : vector<128x1xf32> -> vector<128x1xf32>
    %57 = vector.extract_strided_slice %54 {offsets = [0, 0], sizes = [128, 16], strides = [1, 1]} : vector<128x128xf32> to vector<128x16xf32>
    %58 = vector.broadcast %56 : vector<128x1xf32> to vector<128x16xf32>
    %59 = arith.mulf %57, %58 : vector<128x16xf32>
    %60 = vector.extract_strided_slice %4 {offsets = [0, 256], sizes = [128, 128], strides = [1, 1]} : vector<128x384xbf16> to vector<128x128xbf16>
    %61 = vector.extract_strided_slice %29 {offsets = [0, 256], sizes = [256, 128], strides = [1, 1]} : vector<256x384xbf16> to vector<256x128xbf16>
    %cst_15 = arith.constant dense<0.000000e+00> : vector<128x256xf32>
    %62 = tpu.matmul %60, %61, %cst_15 {dimension_numbers = #tpu.dot_dimension_numbers<[1], [1], [0], [0], [0, 0, 1, 0], [], []>} : vector<128x128xbf16>, vector<256x128xbf16>, vector<128x256xf32> -> vector<128x256xf32>
    %cst_16 = arith.constant dense<0xFF800000> : vector<128xf32>
    %63 = vector.multi_reduction <maximumf>, %62, %cst_16 [1] : vector<128x256xf32> to vector<128xf32>
    %64 = vector.shape_cast %63 : vector<128xf32> to vector<128x1xf32>
    %65 = vector.broadcast %64 : vector<128x1xf32> to vector<128x256xf32>
    %66 = arith.subf %62, %65 : vector<128x256xf32>
    %67 = math.exp %66 : vector<128x256xf32>
    %68 = arith.truncf %67 : vector<128x256xf32> to vector<128x256xbf16>
    %cst_17 = arith.constant dense<0.000000e+00> : vector<128x128xf32>
    %69 = tpu.matmul %68, %61, %cst_17 {dimension_numbers = #tpu.dot_dimension_numbers<[1], [0], [0], [1], [0, 0, 1, 1], [], []>} : vector<128x256xbf16>, vector<256x128xbf16>, vector<128x128xf32> -> vector<128x128xf32>
    %70 = vector.extract_strided_slice %69 {offsets = [0, 16], sizes = [128, 1], strides = [1, 1]} : vector<128x128xf32> to vector<128x1xf32>
    %71 = tpu.reciprocal %70 {approx = true} : vector<128x1xf32> -> vector<128x1xf32>
    %72 = vector.extract_strided_slice %69 {offsets = [0, 0], sizes = [128, 16], strides = [1, 1]} : vector<128x128xf32> to vector<128x16xf32>
    %73 = vector.broadcast %71 : vector<128x1xf32> to vector<128x16xf32>
    %74 = arith.mulf %72, %73 : vector<128x16xf32>
    %75 = tpu.concatenate %44, %59, %74 in 1 : vector<128x16xf32>, vector<128x16xf32>, vector<128x16xf32> -> vector<128x48xf32>
    %c0_18 = arith.constant 0 : index
    %c0_19 = arith.constant 0 : index
    %76 = vector.load %arg4[%c0_18, %c0_19] : memref<128x48xf32, #tpu.memory_space<vmem>>, vector<128x48xf32>
    tpu.vector_store %arg4[%c0_18, %c0_19], %75 {strides = array<i32>} : memref<128x48xf32, #tpu.memory_space<vmem>>, vector<128x48xf32>,
    return
  }
  func.func @transform_0(%arg0: i32) -> (i32, i32) {
    %c0_i32 = arith.constant 0 : i32
    %c0_i32_0 = arith.constant 0 : i32
    return %arg0, %c0_i32 : i32, i32
  }
  func.func @transform_1(%arg0: i32) -> (i32, i32) {
    %c0_i32 = arith.constant 0 : i32
    %c0_i32_0 = arith.constant 0 : i32
    %c0_i32_1 = arith.constant 0 : i32
    return %c0_i32, %c0_i32_0 : i32, i32
  }
  func.func @transform_2(%arg0: i32) -> (i32, i32) {
    %c0_i32 = arith.constant 0 : i32
    %c0_i32_0 = arith.constant 0 : i32
    %c0_i32_1 = arith.constant 0 : i32
    return %c0_i32, %c0_i32_0 : i32, i32
  }
  func.func @transform_3(%arg0: i32) -> (i32, i32) {
    %c0_i32 = arith.constant 0 : i32
    %c0_i32_0 = arith.constant 0 : i32
    return %arg0, %c0_i32 : i32, i32
  }
}

</mosaic_0001>

<bundles_post_ra>
// kernel: tpu_custom_call.1
= control target key start
LH: loop header
LB: loop body
LE: loop exit
PB: predicated region body
PF: predicated region fallthrough
CT: control target
= control target key end

     0   :  { %s3708_s12 = smov 0   ;;  %s5251_s0 = inlined_call_operand.vmem [shape: bf16[256,32], index: 0, kind: input, shape index: {}]   ;;  %s5252_s1 = inlined_call_operand.vmem [shape: bf16[256,32], index: 1, kind: input, shape index: {}]   ;;  %s5253_s2 = inlined_call_operand.vmem [shape: bf16[32,384], index: 2, kind: input, shape index: {}]   ;;  %s5254_s3 = inlined_call_operand.vmem [shape: f32[256,48], index: 3, kind: output, shape index: {}]  }
   0x1 LB: > { %s2872_s13 = sadd.s32 4294967295, %s3681_s12   ;;  %p2876_p0 = scmp.ge.s32.totalorder %s3681_s12, 1  ;;  %s3681_s12 = sphi %s3708_s12, %s13_s12  }
   0x2   : > { %p138_p1 = scmp.lt.s32.totalorder %s3681_s12, 3 }
   0x4   : > { %p139_p2 = pnand %p2876_p0, %p138_p1 }
   0x6   : > { %142 = sbr.rel (%p139_p2) target bundleno = 1423 (0x58f), region = 32 }
   0xd   : > { %v3719_v0 = vld [vmem:[%s5253_s2 + $0x8] ss:$12 sps:$4 sm:$0xff]   ;;  %v3724_v1 = vld [vmem:[%s5253_s2 + $0x20] ss:$12 sps:$4 sm:$0xff]   ;;  %s2877_s18 = sshll.u32 %s2872_s13, 4  ;;  %v3683_v5 = vmov 0  }
   0xe   : > { %3336 = vmatprep.subr.bf16.mxu1 %v3719_v0  ;;  %p163_p3 = scmp.lt.s32.totalorder %s2877_s18, 31  ;;  %v3361_v2 = vld [vmem:[%s5253_s2 + $0x4] ss:$12 sps:$4 sm:$0xff]   ;;  %v3359_v3 = vld [vmem:[%s5253_s2] ss:$12 sps:$4 sm:$0xff]   ;;  %360 = vmatprep.mubr.bf16.mxu0 %v3683_v5  ;;  %vm303_vm0 = vcmask 261120  }
   0xf   : > { %3338 = vmatpush3.bf16.msra.mxu1 %v3719_v0  ;;  %v3366_v4 = vld [vmem:[%s5253_s2 + $0x1c] ss:$12 sps:$4 sm:$0xff]   ;;  %328 = vmatprep.subr.bf16.mxu0 %v3361_v2  ;;  %v3364_v6 = vld [vmem:[%s5253_s2 + $0x18] ss:$12 sps:$4 sm:$0xff]   ;;  %v3369_v16 = vld [vmem:[%s5252_s1 + $0x10] sm:$0xff]   ;;  %s3686_s11 = smov 16  }
  0x10   : > { %3337 = vmatprep.subr.bf16.mxu1 %v3724_v1  ;;  %s5585_s18 = smov (!%p163_p3, %s2877_s18), 31  ;;  %329 = vmatpush1.bf16.msra.mxu0 %v3359_v3  ;;  %v3367_v12 = vld [vmem:[%s5252_s1] sm:$0xff]   ;;  %v3368_v14 = vld [vmem:[%s5252_s1 + $0x8] sm:$0xff]   ;;  %v3370_v18 = vld [vmem:[%s5252_s1 + $0x18] sm:$0xff]   ;;  %s3687_s13 = smov 32   ;;  %vm2766_vm4 = vcmask 130048  }
  0x11   : > { %s2878_s25 = sshll.u32 %s5585_s18, 2  ;;  %330 = vmatprep.subr.bf16.mxu0 %v3366_v4  ;;  %v3371_v19 = vld [vmem:[%s5252_s1 + $0x20] sm:$0xff]   ;;  %v3372_v20 = vld [vmem:[%s5252_s1 + $0x28] sm:$0xff]   ;;  %v3373_v21 = vld [vmem:[%s5252_s1 + $0x30] sm:$0xff]   ;;  %s2880_s14 = sshll.u32 %s5585_s18, 3  ;;  %vm2799_vm5 = vcmask 392192  }
  0x12   : > { %s3746_s28 = scalar_lea.vmem %s5251_s0, %s2878_s25  ;;  %v3374_v22 = vld [vmem:[%s5252_s1 + $0x38] sm:$0xff]   ;;  %v3375_v23 = vld [vmem:[%s5252_s1 + $0x40] sm:$0xff]   ;;  %v3376_v24 = vld [vmem:[%s5252_s1 + $0x48] sm:$0xff]   ;;  %s5146_s17 = scalar_lea.vmem %s5254_s3, %s2880_s14 }
  0x13   : > { %3339 = vmatpush3.bf16.msra.mxu1 %v3724_v1  ;;  %v3357_v7 = vld [vmem:[%s3746_s28 + $0x20] sm:$0xff]   ;;  %v3358_v8 = vld [vmem:[%s3746_s28 + $0x28] sm:$0xff]   ;;  %v3362_v9 = vld [vmem:[%s3746_s28 + $0x30] sm:$0xff]  }
  0x14   : > { %690 = vmatprep.subr.bf16.mxu1 %v3361_v2  ;;  %331 = vmatpush1.bf16.msra.mxu0 %v3364_v6  ;;  %v3363_v10 = vld [vmem:[%s3746_s28 + $0x38] sm:$0xff]   ;;  %v3377_v11 = vld [vmem:[%s3746_s28] sm:$0xff]   ;;  %v3379_v13 = vld [vmem:[%s3746_s28 + $0x8] sm:$0xff]  }
  0x15   : > { %3292 = vmatprep.mubr.msk.bf16.mxu1 %vm303_vm0, %v3357_v7  ;;  %3280 = vmatprep.subr.bf16.mxu0 %v3719_v0  ;;  %v3381_v15 = vld [vmem:[%s3746_s28 + $0x10] sm:$0xff]   ;;  %v3383_v17 = vld [vmem:[%s3746_s28 + $0x18] sm:$0xff]   ;;  %v3382_v27 = vld [vmem:[%s5252_s1 + $0x60] sm:$0xff]  }
  0x16   : > { %3293 = vmatmul.mubr.msk.bf16.vlgmr.msra.gmra.mrb[0].mxu1 %vm303_vm0, %v3358_v8  ;;  %v3378_v25 = vld [vmem:[%s5252_s1 + $0x50] sm:$0xff]   ;;  %v3380_v26 = vld [vmem:[%s5252_s1 + $0x58] sm:$0xff]   ;;  %v3384_v28 = vld [vmem:[%s5252_s1 + $0x68] sm:$0xff]  }
  0x17   : > { %691 = vmatpush1.bf16.msra.mxu1 %v3359_v3  ;;  %3296 = vmatprep.mubr.msk.bf16.mxu1 %vm303_vm0, %v3362_v9  ;;  %v3385_v29 = vld [vmem:[%s5252_s1 + $0x70] sm:$0xff]   ;;  %v3386_v30 = vld [vmem:[%s5252_s1 + $0x78] sm:$0xff]  }
  0x18   : > { %692 = vmatprep.subr.bf16.mxu1 %v3366_v4  ;;  %2895 = vmatmul.mubr.msk.bf16.vlgmr.msra.gmra.mrb[0].mxu0 %vm303_vm0, %v3377_v11 }
  0x19   : > { %3281 = vmatpush3.bf16.msra.mxu0 %v3719_v0  ;;  %370 = vmatprep.mubr.bf16.mxu0 %v3683_v5 }
  0x1a   : > { %3282 = vmatprep.subr.bf16.mxu0 %v3724_v1 }
  0x1b   : > { %693 = vmatpush1.bf16.msra.mxu1 %v3364_v6 }
  0x1d   : > { %3283 = vmatpush3.bf16.msra.mxu0 %v3724_v1 }
  0x1e   : > { %3297 = vmatmul.mubr.msk.bf16.gmra.mrb[4].mxu1 %vm303_vm0, %v3363_v10  ;;  %3300 = vmatprep.subr.bf16.mxu0 %v3719_v0 }
  0x1f   : > { %722 = vmatprep.mubr.bf16.mxu1 %v3683_v5 }
  0x20   : > { %2896 = vmatmul.mubr.msk.bf16.gmra.mrb[4].mxu0 %vm303_vm0, %v3379_v13 }
  0x21   : > { %380 = vmatprep.mubr.bf16.mxu0 %v3683_v5 }
  0x26   : > { %2927 = vmatmul.mubr.msk.bf16.vlgmr.msra.gmra.mrb[8].mxu1 %vm303_vm0, %v3367_v12 }
  0x27   : > { %732 = vmatprep.mubr.bf16.mxu1 %v3683_v5 }
  0x28   : > { %2897 = vmatmul.mubr.msk.bf16.gmra.mrb[8].mxu0 %vm303_vm0, %v3381_v15 }
  0x29   : > { %390 = vmatprep.mubr.bf16.mxu0 %v3683_v5 }
  0x2e   : > { %2928 = vmatmul.mubr.msk.bf16.gmra.mrb[12].mxu1 %vm303_vm0, %v3368_v14 }
  0x2f   : > { %742 = vmatprep.mubr.bf16.mxu1 %v3683_v5 }
  0x30   : > { %2898 = vmatmul.mubr.msk.bf16.gmra.mrb[12].mxu0 %vm303_vm0, %v3383_v17 }
  0x31   : > { %400 = vmatprep.mubr.bf16.mxu0 %v3683_v5 }
  0x36   : > { %2929 = vmatmul.mubr.msk.bf16.gmra.mrb[16].mxu1 %vm303_vm0, %v3369_v16 }
  0x37   : > { %752 = vmatprep.mubr.bf16.mxu1 %v3683_v5 }
  0x38   : > { %2899 = vmatmul.mubr.msk.bf16.gmra.mrb[16].mxu0 %vm303_vm0, %v3357_v7 }
  0x39   : > { %410 = vmatprep.mubr.bf16.mxu0 %v3683_v5 }
  0x3e   : > { %2930 = vmatmul.mubr.msk.bf16.gmra.mrb[20].mxu1 %vm303_vm0, %v3370_v18 }
  0x3f   : > { %762 = vmatprep.mubr.bf16.mxu1 %v3683_v5 }
  0x40   : > { %2900 = vmatmul.mubr.msk.bf16.gmra.mrb[20].mxu0 %vm303_vm0, %v3358_v8 }
  0x41   : > { %420 = vmatprep.mubr.bf16.mxu0 %v3683_v5 }
  0x46   : > { %2931 = vmatmul.mubr.msk.bf16.gmra.mrb[24].mxu1 %vm303_vm0, %v3371_v19 }
  0x47   : > { %772 = vmatprep.mubr.bf16.mxu1 %v3683_v5 }
  0x48   : > { %2901 = vmatmul.mubr.msk.bf16.gmra.mrb[24].mxu0 %vm303_vm0, %v3362_v9 }
  0x49   : > { %430 = vmatprep.mubr.bf16.mxu0 %v3683_v5 }
  0x4e   : > { %2932 = vmatmul.mubr.msk.bf16.gmra.mrb[28].mxu1 %vm303_vm0, %v3372_v20 }
  0x4f   : > { %782 = vmatprep.mubr.bf16.mxu1 %v3683_v5 }
  0x50   : > { %2902 = vmatmul.mubr.msk.bf16.gmra.mrb[28].mxu0 %vm303_vm0, %v3363_v10 }
  0x51   : > { %3284 = vmatprep.mubr.msk.bf16.mxu0 %vm303_vm0, %v3377_v11 }
  0x56   : > { %2933 = vmatmul.mubr.msk.bf16.gmra.mrb[32].mxu1 %vm303_vm0, %v3373_v21 }
  0x57   : > { %792 = vmatprep.mubr.bf16.mxu1 %v3683_v5 }
  0x58   : > { %3285 = vmatmul.mubr.msk.bf16.vlgmr.msra.gmra.mrb[32].mxu0 %vm303_vm0, %v3379_v13 }
  0x59   : > { %3301 = vmatpush3.bf16.msra.mxu0 %v3719_v0  ;;  %3288 = vmatprep.mubr.msk.bf16.mxu0 %vm303_vm0, %v3381_v15 }
  0x5a   : > { %3302 = vmatprep.subr.bf16.mxu0 %v3724_v1 }
  0x5d   : > { %3303 = vmatpush3.bf16.msra.mxu0 %v3724_v1 }
  0x5e   : > { %2934 = vmatmul.mubr.msk.bf16.gmra.mrb[36].mxu1 %vm303_vm0, %v3374_v22 }
  0x5f   : > { %802 = vmatprep.mubr.bf16.mxu1 %v3683_v5 }
  0x60   : > { %3289 = vmatmul.mubr.msk.bf16.gmra.mrb[36].mxu0 %vm303_vm0, %v3383_v17 }
  0x61   : > { %3304 = vmatprep.mubr.msk.bf16.mxu0 %vm303_vm0, %v3367_v12 }
  0x66   : > { %2935 = vmatmul.mubr.msk.bf16.gmra.mrb[40].mxu1 %vm303_vm0, %v3375_v23 }
  0x67   : > { %812 = vmatprep.mubr.bf16.mxu1 %v3683_v5 }
  0x68   : > { %3305 = vmatmul.mubr.msk.bf16.vlgmr.msra.gmra.mrb[40].mxu0 %vm303_vm0, %v3368_v14 }
  0x69   : > { %3308 = vmatprep.mubr.msk.bf16.mxu0 %vm303_vm0, %v3369_v16 }
  0x6e   : > { %2936 = vmatmul.mubr.msk.bf16.gmra.mrb[44].mxu1 %vm303_vm0, %v3376_v24 }
  0x6f   : > { %822 = vmatprep.mubr.bf16.mxu1 %v3683_v5 }
  0x70   : > { %3309 = vmatmul.mubr.msk.bf16.gmra.mrb[44].mxu0 %vm303_vm0, %v3370_v18 }
  0x71   : > { %3312 = vmatprep.mubr.msk.bf16.mxu0 %vm303_vm0, %v3371_v19 }
  0x76   : > { %2937 = vmatmul.mubr.msk.bf16.gmra.mrb[48].mxu1 %vm303_vm0, %v3378_v25 }
  0x77   : > { %832 = vmatprep.mubr.bf16.mxu1 %v3683_v5 }
  0x78   : > { %3313 = vmatmul.mubr.msk.bf16.gmra.mrb[48].mxu0 %vm303_vm0, %v3372_v20 }
  0x79   : > { %3316 = vmatprep.mubr.msk.bf16.mxu0 %vm303_vm0, %v3373_v21 }
  0x7e   : > { %2938 = vmatmul.mubr.msk.bf16.gmra.mrb[52].mxu1 %vm303_vm0, %v3380_v26 }
  0x7f   : > { %842 = vmatprep.mubr.bf16.mxu1 %v3683_v5 }
  0x80   : > { %3317 = vmatmul.mubr.msk.bf16.gmra.mrb[52].mxu0 %vm303_vm0, %v3374_v22 }
  0x81   : > { %3320 = vmatprep.mubr.msk.bf16.mxu0 %vm303_vm0, %v3375_v23 }
  0x86   : > { %2939 = vmatmul.mubr.msk.bf16.gmra.mrb[56].mxu1 %vm303_vm0, %v3382_v27 }
  0x87   : > { %852 = vmatprep.mubr.bf16.mxu1 %v3683_v5 }
  0x88   : > { %3321 = vmatmul.mubr.msk.bf16.gmra.mrb[56].mxu0 %vm303_vm0, %v3376_v24 }
  0x89   : > { %3324 = vmatprep.mubr.msk.bf16.mxu0 %vm303_vm0, %v3378_v25 }
  0x8e   : > { %2940 = vmatmul.mubr.msk.bf16.gmra.mrb[60].mxu1 %vm303_vm0, %v3384_v28 }
  0x8f   : > { %862 = vmatprep.mubr.bf16.mxu1 %v3683_v5 }
  0x90   : > { %3325 = vmatmul.mubr.msk.bf16.gmra.mrb[60].mxu0 %vm303_vm0, %v3380_v26 }
  0x91   : > { %3328 = vmatprep.mubr.msk.bf16.mxu0 %vm303_vm0, %v3382_v27 }
  0x96   : > { %2941 = vmatmul.mubr.msk.bf16.gmra.mrb[64].mxu1 %vm303_vm0, %v3385_v29 }
  0x97   : > { %872 = vmatprep.mubr.bf16.mxu1 %v3683_v5 }
  0x98   : > { %3329 = vmatmul.mubr.msk.bf16.gmra.mrb[64].mxu0 %vm303_vm0, %v3384_v28 }
  0x99   : > { %3332 = vmatprep.mubr.msk.bf16.mxu0 %vm303_vm0, %v3385_v29 }
  0x9e   : > { %2942 = vmatmul.mubr.msk.bf16.gmra.mrb[68].mxu1 %vm303_vm0, %v3386_v30 }
  0xa0   : > { %3333 = vmatmul.mubr.msk.bf16.gmra.mrb[68].mxu0 %vm303_vm0, %v3386_v30 }
  0xe9   : > { %v3294_v31 = vpop.f32.mrb[0].mxu1 }
  0xea   : > { %v507_v32 = vpop.f32.mrb[1].mxu1 }
  0xeb   : > { %v3295_v33 = vpop.f32.mrb[2].mxu1  ;;  %v362_v39 = vpop.f32.mrb[0].mxu0 }
  0xec   : > { %v3886_v34 = vpack.c.bf16 %v3295_v33, %v3294_v31  ;;  %v510_v35 = vpop.f32.mrb[3].mxu1  ;;  %v364_v41 = vpop.f32.mrb[1].mxu0 }
  0xed   : > { %v3888_v36 = vpack.c.bf16 %v510_v35, %v507_v32  ;;  %v366_v44 = vpop.f32.mrb[2].mxu0 }
  0xee   : > { %5352 = vst [vmem:[#allocation2_spill] sm:$0xff] %v3886_v34  ;;  %v3894_v46 = vpack.c.bf16 %v366_v44, %v362_v39  ;;  %v368_v47 = vpop.f32.mrb[3].mxu0 }
  0xef   : > { %5353 = vst [vmem:[#allocation3_spill] sm:$0xff] %v3888_v36  ;;  %v3896_v48 = vpack.c.bf16 %v368_v47, %v364_v41 }
  0xf0   : > { %3008 = vmatprep.mubr.bf16.mxu0 %v3894_v46 }
  0xf1   : > { %v3298_v37 = vpop.f32.mrb[4].mxu1 }
  0xf2   : > { %v523_v38 = vpop.f32.mrb[5].mxu1 }
  0xf3   : > { %v3299_v40 = vpop.f32.mrb[6].mxu1  ;;  %v372_v51 = vpop.f32.mrb[4].mxu0 }
  0xf4   : > { %v3890_v42 = vpack.c.bf16 %v3299_v40, %v3298_v37  ;;  %v526_v43 = vpop.f32.mrb[7].mxu1  ;;  %v374_v53 = vpop.f32.mrb[5].mxu0 }
  0xf5   : > { %v3892_v45 = vpack.c.bf16 %v526_v43, %v523_v38  ;;  %v376_v56 = vpop.f32.mrb[6].mxu0 }
  0xf6   : > { %5354 = vst [vmem:[#allocation4_spill] sm:$0xff] %v3890_v42  ;;  %v3911_v58 = vpack.c.bf16 %v376_v56, %v372_v51  ;;  %v378_v59 = vpop.f32.mrb[7].mxu0  ;;  %v1092_v56 = vlaneseq  ;;  %v5365_v42 = vmov 0.0  }
  0xf7   : > { %5355 = vst [vmem:[#allocation5_spill] sm:$0xff] %v3892_v45  ;;  %v3913_v60 = vpack.c.bf16 %v378_v59, %v374_v53 }
  0xf9   : > { %v3899_v49 = vpop.f32.mrb[8].mxu1  ;;  %5356 = vst [vmem:[#allocation6_spill] sm:$0xff] %v3913_v60 }
  0xfa   : > { %v3901_v50 = vpop.f32.mrb[9].mxu1 }
  0xfb   : > { %v3903_v52 = vpop.f32.mrb[10].mxu1  ;;  %v382_v63 = vpop.f32.mrb[8].mxu0 }
  0xfc   : > { %v3907_v55 = vpop.f32.mrb[11].mxu1  ;;  %v384_v1 = vpop.f32.mrb[9].mxu0 }
  0xfd   : > { %v386_v4 = vpop.f32.mrb[10].mxu0 }
  0xfe   : > { %v3927_v6 = vpack.c.bf16 %v386_v4, %v382_v63  ;;  %v388_v7 = vpop.f32.mrb[11].mxu0  ;;  %v3983_v4 = vand.u32 127, %v1092_v56 }
  0xff   : > { %v3929_v8 = vpack.c.bf16 %v388_v7, %v384_v1 }
 0x100   : > { %vm1132_vm2 = vcmp.eq.s32.totalorder %v3983_v4, 16 }
 0x101   : > { %v3915_v61 = vpop.f32.mrb[12].mxu1  ;;  %5357 = vst [vmem:[#allocation7_spill] sm:$0xff] %v3929_v8  ;;  %v2959_v45 = vsel %vm1132_vm2, 1.0, %v5365_v42 }
 0x102   : > { %v3917_v62 = vpop.f32.mrb[13].mxu1 }
 0x103   : > { %v3919_v0 = vpop.f32.mrb[14].mxu1  ;;  %v392_v11 = vpop.f32.mrb[12].mxu0 }
 0x104   : > { %v3923_v3 = vpop.f32.mrb[15].mxu1  ;;  %v394_v13 = vpop.f32.mrb[13].mxu0 }
 0x105   : > { %v396_v16 = vpop.f32.mrb[14].mxu0 }
 0x106   : > { %v3943_v18 = vpack.c.bf16 %v396_v16, %v392_v11  ;;  %v398_v19 = vpop.f32.mrb[15].mxu0 }
 0x107   : > { %v3945_v20 = vpack.c.bf16 %v398_v19, %v394_v13 }
 0x109   : > { %v3931_v9 = vpop.f32.mrb[16].mxu1  ;;  %5358 = vst [vmem:[#allocation8_spill] sm:$0xff] %v3945_v20  ;;  %v1095_v20 = vadd.s32 256, %v3983_v4 }
 0x10a   : > { %v3933_v10 = vpop.f32.mrb[17].mxu1 }
 0x10b   : > { %v3935_v12 = vpop.f32.mrb[18].mxu1  ;;  %v402_v23 = vpop.f32.mrb[16].mxu0 }
 0x10c   : > { %v3939_v15 = vpop.f32.mrb[19].mxu1  ;;  %v404_v25 = vpop.f32.mrb[17].mxu0 }
 0x10d   : > { %v406_v28 = vpop.f32.mrb[18].mxu0 }
 0x10e   : > { %v3959_v30 = vpack.c.bf16 %v406_v28, %v402_v23  ;;  %v408_v31 = vpop.f32.mrb[19].mxu0 }
 0x10f   : > { %v3961_v32 = vpack.c.bf16 %v408_v31, %v404_v25 }
 0x111   : > { %v3947_v21 = vpop.f32.mrb[20].mxu1  ;;  %5359 = vst [vmem:[#allocation9_spill] sm:$0xff] %v3961_v32 }
 0x112   : > { %v3949_v22 = vpop.f32.mrb[21].mxu1 }
 0x113   : > { %v3951_v24 = vpop.f32.mrb[22].mxu1  ;;  %v412_v37 = vpop.f32.mrb[20].mxu0 }
 0x114   : > { %v3955_v27 = vpop.f32.mrb[23].mxu1  ;;  %v414_v39 = vpop.f32.mrb[21].mxu0 }
 0x115   : > { %v416_v43 = vpop.f32.mrb[22].mxu0 }
 0x116   : > { %v3975_v47 = vpack.c.bf16 %v416_v43, %v412_v37  ;;  %v418_v51 = vpop.f32.mrb[23].mxu0  ;;  %v1094_v37 = vadd.s32 128, %v3983_v4 }
 0x117   : > { %v3977_v53 = vpack.c.bf16 %v418_v51, %v414_v39 }
 0x118   : > { %v1107_v56 = vand.u32 127, %v1094_v37  ;;  %v5255_v37 = vmov 0.0  }
 0x119   : > { %v3963_v33 = vpop.f32.mrb[24].mxu1  ;;  %5360 = vst [vmem:[#allocation10_spill] sm:$0xff] %v3977_v53 }
 0x11a   : > { %v3965_v35 = vpop.f32.mrb[25].mxu1  ;;  %vm1133_vm1 = vcmp.eq.s32.totalorder %v1107_v56, 16 }
 0x11b   : > { %v3967_v38 = vpop.f32.mrb[26].mxu1  ;;  %v422_v1 = vpop.f32.mrb[24].mxu0  ;;  %v2960_v13 = vsel %vm1133_vm1, 1.0, %v5255_v37 }
 0x11c   : > { %v3971_v41 = vpop.f32.mrb[27].mxu1  ;;  %v424_v11 = vpop.f32.mrb[25].mxu0 }
 0x11d   : > { %v426_v19 = vpop.f32.mrb[26].mxu0 }
 0x11e   : > { %v3993_v25 = vpack.c.bf16 %v426_v19, %v422_v1  ;;  %v428_v28 = vpop.f32.mrb[27].mxu0 }
 0x11f   : > { %v3995_v31 = vpack.c.bf16 %v428_v28, %v424_v11 }
 0x121   : > { %v3979_v59 = vpop.f32.mrb[28].mxu1  ;;  %5361 = vst [vmem:[#allocation11_spill] sm:$0xff] %v3995_v31 }
 0x122   : > { %v3981_v63 = vpop.f32.mrb[29].mxu1 }
 0x123   : > { %v3985_v7 = vpop.f32.mrb[30].mxu1  ;;  %v432_v51 = vpop.f32.mrb[28].mxu0 }
 0x124   : > { %v3989_v16 = vpop.f32.mrb[31].mxu1  ;;  %v434_v29 = vpop.f32.mrb[29].mxu0 }
 0x125   : > { %v436_v1 = vpop.f32.mrb[30].mxu0 }
 0x126   : > { %v4010_v19 = vpack.c.bf16 %v436_v1, %v432_v51  ;;  %v438_v28 = vpop.f32.mrb[31].mxu0 }
 0x127   : > { %v4012_v5 = vpack.c.bf16 %v438_v28, %v434_v29  ;;  %v4022_v29 = vpack.c.bf16 %v2960_v13, %v2960_v13 }
 0x129   : > { %v3998_v39 = vpop.f32.mrb[32].mxu1  ;;  %5362 = vst [vmem:[#allocation12_spill] sm:$0xff] %v4012_v5  ;;  %v4034_v5 = vpack.c.bf16 %v2959_v45, %v2959_v45  ;;  %v5368_v45 = vpack.c.bf16 %v3903_v52, %v3899_v49 }
 0x12a   : > { %v4000_v43 = vpop.f32.mrb[33].mxu1 }
 0x12b   : > { %v4002_v44 = vpop.f32.mrb[34].mxu1  ;;  %v3286_v26 = vpop.f32.mrb[32].mxu0 }
 0x12c   : > { %v4006_v23 = vpop.f32.mrb[35].mxu1  ;;  %v475_v14 = vpop.f32.mrb[33].mxu0 }
 0x12d   : > { %v3287_v51 = vpop.f32.mrb[34].mxu0 }
 0x12e   : > { %v4024_v1 = vpack.c.bf16 %v3287_v51, %v3286_v26  ;;  %v478_v28 = vpop.f32.mrb[35].mxu0 }
 0x12f   : > { %v4026_v54 = vpack.c.bf16 %v478_v28, %v475_v14 }
 0x130   : > { %5363 = vst [vmem:[#allocation13_spill] sm:$0xff] %v4024_v1  ;;  %v1144_v1 = vadd.bf16 %v4034_v5, %v5368_v45 }
 0x131   : > { %v4014_v57 = vpop.f32.mrb[36].mxu1  ;;  %5364 = vst [vmem:[#allocation14_spill] sm:$0xff] %v4026_v54 }
 0x132   : > { %v796_v40 = vpop.f32.mrb[37].mxu1 }
 0x133   : > { %v4017_v17 = vpop.f32.mrb[38].mxu1  ;;  %v3290_v2 = vpop.f32.mrb[36].mxu0 }
 0x134   : > { %v800_v11 = vpop.f32.mrb[39].mxu1  ;;  %v491_v13 = vpop.f32.mrb[37].mxu0 }
 0x135   : > { %v1066_v56 = vpack.c.bf16 %v800_v11, %v796_v40  ;;  %v3291_v26 = vpop.f32.mrb[38].mxu0 }
 0x136   : > { %v4040_v11 = vpack.c.bf16 %v3291_v26, %v3290_v2  ;;  %v494_v51 = vpop.f32.mrb[39].mxu0 }
 0x137   : > { %v4029_v37 = vadd.bf16 %v4022_v29, %v1066_v56  ;;  %v4043_v28 = vpack.c.bf16 %v494_v51, %v491_v13 }
 0x138   : > { %5366 = vst [vmem:[#allocation15_spill] sm:$0xff] %v4040_v11 }
 0x139   : > { %v804_v34 = vpop.f32.mrb[40].mxu1  ;;  %5367 = vst [vmem:[#allocation16_spill] sm:$0xff] %v4043_v28 }
 0x13a   : > { %v4032_v36 = vpop.f32.mrb[41].mxu1 }
 0x13b   : > { %v808_v31 = vpop.f32.mrb[42].mxu1  ;;  %v4051_v14 = vpop.f32.mrb[40].mxu0 }
 0x13c   : > { %v1068_v53 = vpack.c.bf16 %v808_v31, %v804_v34  ;;  %v4036_v40 = vpop.f32.mrb[43].mxu1  ;;  %5369 = vst [vmem:[#allocation17_spill] sm:$0xff] %v4051_v14  ;;  %v4053_v26 = vpop.f32.mrb[41].mxu0 }
 0x13d   : > { %v4057_v51 = vpop.f32.mrb[42].mxu0 }
 0x13e   : > { %v1168_v56 = vadd.bf16 %v4034_v5, %v1068_v53  ;;  %5370 = vst [vmem:[#allocation18_spill] sm:$0xff] %v4057_v51 }
 0x140   : > { %2992 = vmatprep.subr.bf16.mxu0 %v1168_v56  ;;  %3024 = vmatprep.subr.bf16.mxu1 %v1168_v56  ;;  %v4063_v56 = vpop.f32.mrb[43].mxu0 }
 0x141   : > { %v814_v34 = vpop.f32.mrb[44].mxu1  ;;  %2993 = vmatpush3.bf16.xpose.msra.mxu0 %v1144_v1  ;;  %3025 = vmatpush3.bf16.msra.mxu1 %v1144_v1 }
 0x142   : > { %v4049_v31 = vpop.f32.mrb[45].mxu1 }
 0x143   : > { %v818_v2 = vpop.f32.mrb[46].mxu1  ;;  %v4074_v52 = vpop.f32.mrb[44].mxu0 }
 0x144   : > { %v1071_v53 = vpack.c.bf16 %v818_v2, %v814_v34  ;;  %v4055_v13 = vpop.f32.mrb[47].mxu1  ;;  %v5371_v34 = vpack.c.bf16 %v3919_v0, %v3915_v61  ;;  %5372 = vst [vmem:[#allocation19_spill] sm:$0xff] %v4074_v52  ;;  %v4076_v54 = vpop.f32.mrb[45].mxu0 }
 0x145   : > { %5373 = vst [vmem:[#allocation20_spill] sm:$0xff] %v4076_v54  ;;  %v4080_v45 = vpop.f32.mrb[46].mxu0 }
 0x146   : > { %v1171_v1 = vadd.bf16 %v4034_v5, %v1071_v53  ;;  %v1147_v2 = vadd.bf16 %v4034_v5, %v5371_v34  ;;  %5374 = vst [vmem:[#allocation21_spill] sm:$0xff] %v4080_v45  ;;  %v1114_v45 = vand.u32 127, %v1095_v20 }
 0x148   : > { %2994 = vmatprep.subr.bf16.mxu0 %v1171_v1  ;;  %3026 = vmatprep.subr.bf16.mxu1 %v1171_v1  ;;  %v4086_v1 = vpop.f32.mrb[47].mxu0  ;;  %vm1134_vm3 = vcmp.eq.s32.totalorder %v1114_v45, 16 }
 0x149   : > { %v824_v11 = vpop.f32.mrb[48].mxu1  ;;  %2995 = vmatpush3.bf16.xpose.msra.mxu0 %v1147_v2  ;;  %3027 = vmatpush3.bf16.msra.mxu1 %v1147_v2  ;;  %5375 = vst [vmem:[#allocation22_spill] sm:$0xff] %v4086_v1  ;;  %v2961_v4 = vsel %vm1134_vm3, 1.0, %v5365_v42 }
 0x14a   : > { %v4072_v49 = vpop.f32.mrb[49].mxu1  ;;  %v4128_v45 = vpack.c.bf16 %v2961_v4, %v2961_v4 }
 0x14b   : > { %v828_v28 = vpop.f32.mrb[50].mxu1  ;;  %v4098_v52 = vpop.f32.mrb[48].mxu0 }
 0x14c   : > { %v1074_v53 = vpack.c.bf16 %v828_v28, %v824_v11  ;;  %v4078_v32 = vpop.f32.mrb[51].mxu1  ;;  %v5376_v11 = vpack.c.bf16 %v3935_v12, %v3931_v9  ;;  %5377 = vst [vmem:[#allocation23_spill] sm:$0xff] %v4098_v52  ;;  %v4100_v8 = vpop.f32.mrb[49].mxu0 }
 0x14d   : > { %5378 = vst [vmem:[#allocation24_spill] sm:$0xff] %v4100_v8  ;;  %v4104_v9 = vpop.f32.mrb[50].mxu0 }
 0x14e   : > { %v1174_v34 = vadd.bf16 %v4034_v5, %v1074_v53  ;;  %v1150_v28 = vadd.bf16 %v4034_v5, %v5376_v11  ;;  %5379 = vst [vmem:[#allocation25_spill] sm:$0xff] %v4104_v9 }
 0x150   : > { %2996 = vmatprep.subr.bf16.mxu0 %v1174_v34  ;;  %3028 = vmatprep.subr.bf16.mxu1 %v1174_v34  ;;  %v4110_v34 = vpop.f32.mrb[51].mxu0 }
 0x151   : > { %v834_v61 = vpop.f32.mrb[52].mxu1  ;;  %2997 = vmatpush3.bf16.xpose.msra.mxu0 %v1150_v28  ;;  %3029 = vmatpush3.bf16.msra.mxu1 %v1150_v28  ;;  %5380 = vst [vmem:[#allocation26_spill] sm:$0xff] %v4110_v34  ;;  %v5384_v34 = vpack.c.bf16 %v3967_v38, %v3963_v33 }
 0x152   : > { %v4096_v0 = vpop.f32.mrb[53].mxu1 }
 0x153   : > { %v838_v53 = vpop.f32.mrb[54].mxu1  ;;  %v3318_v52 = vpop.f32.mrb[52].mxu0 }
 0x154   : > { %v1077_v2 = vpack.c.bf16 %v838_v53, %v834_v61  ;;  %v4102_v54 = vpop.f32.mrb[55].mxu1  ;;  %v5381_v61 = vpack.c.bf16 %v3951_v24, %v3947_v21  ;;  %v4122_v9 = vpop.f32.mrb[53].mxu0 }
 0x155   : > { %5382 = vst [vmem:[#allocation27_spill] sm:$0xff] %v4122_v9  ;;  %v3319_v21 = vpop.f32.mrb[54].mxu0 }
 0x156   : > { %v1177_v11 = vadd.bf16 %v4034_v5, %v1077_v2  ;;  %v1153_v28 = vadd.bf16 %v4034_v5, %v5381_v61  ;;  %v4130_v61 = vpop.f32.mrb[55].mxu0 }
 0x157   : > { %5383 = vst [vmem:[#allocation28_spill] sm:$0xff] %v4130_v61 }
 0x158   : > { %2998 = vmatprep.subr.bf16.mxu0 %v1177_v11  ;;  %3030 = vmatprep.subr.bf16.mxu1 %v1177_v11  ;;  %v1067_v11 = vpack.c.bf16 %v3319_v21, %v3318_v52 }
 0x159   : > { %v844_v53 = vpop.f32.mrb[56].mxu1  ;;  %2999 = vmatpush3.bf16.xpose.msra.mxu0 %v1153_v28  ;;  %3031 = vmatpush3.bf16.msra.mxu1 %v1153_v28 }
 0x15a   : > { %v4119_v12 = vpop.f32.mrb[57].mxu1 }
 0x15b   : > { %v848_v2 = vpop.f32.mrb[58].mxu1  ;;  %v4144_v21 = vpop.f32.mrb[56].mxu0 }
 0x15c   : > { %v1080_v20 = vpack.c.bf16 %v848_v2, %v844_v53  ;;  %v4124_v8 = vpop.f32.mrb[59].mxu1  ;;  %v1156_v53 = vadd.bf16 %v4034_v5, %v5384_v34  ;;  %v4140_v2 = vadd.bf16 %v4128_v45, %v1067_v11  ;;  %v4146_v24 = vpop.f32.mrb[57].mxu0 }
 0x15d   : > { %v4150_v33 = vpop.f32.mrb[58].mxu0 }
 0x15e   : > { %v1180_v28 = vadd.bf16 %v4034_v5, %v1080_v20  ;;  %5385 = vst [vmem:[#allocation29_spill] sm:$0xff] %v4140_v2  ;;  %v4156_v11 = vpop.f32.mrb[59].mxu0 }
 0x160   : > { %3000 = vmatprep.subr.bf16.mxu0 %v1180_v28  ;;  %3032 = vmatprep.subr.bf16.mxu1 %v1180_v28 }
 0x161   : > { %v854_v4 = vpop.f32.mrb[60].mxu1  ;;  %3001 = vmatpush3.bf16.xpose.msra.mxu0 %v1156_v53  ;;  %3033 = vmatpush3.bf16.msra.mxu1 %v1156_v53 }
 0x162   : > { %v4142_v52 = vpop.f32.mrb[61].mxu1 }
 0x163   : > { %v858_v20 = vpop.f32.mrb[62].mxu1  ;;  %v4167_v34 = vpop.f32.mrb[60].mxu0 }
 0x164   : > { %v1083_v42 = vpack.c.bf16 %v858_v20, %v854_v4  ;;  %v4148_v9 = vpop.f32.mrb[63].mxu1  ;;  %v5386_v4 = vpack.c.bf16 %v3985_v7, %v3979_v59  ;;  %5387 = vst [vmem:[#allocation30_spill] sm:$0xff] %v4167_v34  ;;  %v4169_v1 = vpop.f32.mrb[61].mxu0 }
 0x165   : > { %5388 = vst [vmem:[#allocation31_spill] sm:$0xff] %v4169_v1  ;;  %v4173_v53 = vpop.f32.mrb[62].mxu0  ;;  %v5391_v1 = vpack.c.bf16 %v4017_v17, %v4014_v57  ;;  %v5393_v17 = vpack.c.bf16 %v3907_v55, %v3901_v50  ;;  %v5395_v50 = vpack.c.bf16 %v3923_v3, %v3917_v62  ;;  %v5398_v3 = vpack.c.bf16 %v4102_v54, %v4096_v0 }
 0x166   : > { %v1183_v28 = vadd.bf16 %v4034_v5, %v1083_v42  ;;  %v1159_v20 = vadd.bf16 %v4034_v5, %v5386_v4  ;;  %5389 = vst [vmem:[#allocation32_spill] sm:$0xff] %v4173_v53  ;;  %v5400_v54 = vpack.c.bf16 %v4124_v8, %v4119_v12  ;;  %v5402_v8 = vpack.c.bf16 %v4148_v9, %v4142_v52  ;;  %v5415_v9 = vld [vmem:[#allocation18_spill] sm:$0xff]  ;;  %v5416_v12 = vld [vmem:[#allocation17_spill] sm:$0xff] }
 0x167   : > { %v4244_v55 = vadd.bf16 %v4022_v29, %v5395_v50  ;;  %v5431_v50 = vld [vmem:[#allocation19_spill] sm:$0xff] }
 0x168   : > { %3002 = vmatprep.subr.bf16.mxu0 %v1183_v28  ;;  %3034 = vmatprep.subr.bf16.mxu1 %v1183_v28  ;;  %v4179_v28 = vpop.f32.mrb[63].mxu0 }
 0x169   : > { %v864_v2 = vpop.f32.mrb[64].mxu1  ;;  %3003 = vmatpush3.bf16.xpose.msra.mxu0 %v1159_v20  ;;  %3035 = vmatpush3.bf16.msra.mxu1 %v1159_v20 }
 0x16a   : > { %v4165_v38 = vpop.f32.mrb[65].mxu1 }
 0x16b   : > { %v868_v61 = vpop.f32.mrb[66].mxu1  ;;  %v4190_v7 = vpop.f32.mrb[64].mxu0 }
 0x16c   : > { %v1086_v42 = vpack.c.bf16 %v868_v61, %v864_v2  ;;  %v4171_v14 = vpop.f32.mrb[67].mxu1  ;;  %v5390_v61 = vpack.c.bf16 %v4002_v44, %v3998_v39  ;;  %v4192_v53 = vpop.f32.mrb[65].mxu0  ;;  %v5412_v0 = vld [vmem:[#allocation31_spill] sm:$0xff] }
 0x16d   : > { %v4194_v20 = vpop.f32.mrb[66].mxu0 }
 0x16e   : > { %v1186_v4 = vadd.bf16 %v4034_v5, %v1086_v42  ;;  %v1162_v2 = vadd.bf16 %v4034_v5, %v5390_v61 }
 0x170   : > { %3004 = vmatprep.subr.bf16.mxu0 %v1186_v4  ;;  %3036 = vmatprep.subr.bf16.mxu1 %v1186_v4  ;;  %v4199_v4 = vpop.f32.mrb[67].mxu0 }
 0x171   : > { %v874_v51 = vpop.f32.mrb[68].mxu1  ;;  %3005 = vmatpush3.bf16.xpose.msra.mxu0 %v1162_v2  ;;  %3037 = vmatpush3.bf16.msra.mxu1 %v1162_v2  ;;  %v1082_v2 = vpack.c.bf16 %v4199_v4, %v4192_v53 }
 0x172   : > { %v4188_v59 = vpop.f32.mrb[69].mxu1 }
 0x173   : > { %v878_v34 = vpop.f32.mrb[70].mxu1 }
 0x174   : > { %v1089_v42 = vpack.c.bf16 %v878_v34, %v874_v51  ;;  %v880_v60 = vpop.f32.mrb[71].mxu1  ;;  %v1165_v51 = vadd.bf16 %v4034_v5, %v5391_v1  ;;  %v5392_v34 = vpack.c.bf16 %v4036_v40, %v4032_v36  ;;  %v4228_v40 = vadd.bf16 %v4022_v29, %v5393_v17 }
 0x175   : > { %v1090_v44 = vpack.c.bf16 %v880_v60, %v4188_v59  ;;  %v4212_v59 = vpop.f32.mrb[68].mxu0  ;;  %v5394_v1 = vpack.c.bf16 %v4055_v13, %v4049_v31  ;;  %v5396_v31 = vpack.c.bf16 %v4078_v32, %v4072_v49  ;;  %v4266_v32 = vadd.bf16 %v4022_v29, %v5398_v3  ;;  %v5434_v3 = vld [vmem:[#allocation9_spill] sm:$0xff] }
 0x176   : > { %v1189_v61 = vadd.bf16 %v4034_v5, %v1089_v42  ;;  %v1169_v60 = vadd.bf16 %v4022_v29, %v5392_v34  ;;  %v4214_v42 = vpop.f32.mrb[69].mxu0  ;;  %v4395_v17 = vadd.bf16 %v4128_v45, %v1082_v2  ;;  %v5439_v2 = vpack.c.bf16 %v4194_v20, %v4190_v7 }
 0x177   : > { %v4216_v39 = vpop.f32.mrb[70].mxu0  ;;  %v4250_v13 = vadd.bf16 %v4022_v29, %v5396_v31 }
 0x178   : > { %3006 = vmatprep.subr.bf16.mxu0 %v1189_v61  ;;  %3038 = vmatprep.subr.bf16.mxu1 %v1189_v61  ;;  %v1091_v57 = vpack.c.bf16 %v4216_v39, %v4212_v59  ;;  %v4220_v5 = vpop.f32.mrb[71].mxu0  ;;  %v4234_v61 = vadd.bf16 %v4022_v29, %v5394_v1  ;;  %v5430_v1 = vld [vmem:[#allocation21_spill] sm:$0xff]  ;;  %v5458_v59 = vld [vmem:[#allocation15_spill] sm:$0xff] }
 0x179   : > { %3007 = vmatpush3.bf16.xpose.msra.mxu0 %v1165_v51  ;;  %3039 = vmatpush3.bf16.msra.mxu1 %v1165_v51  ;;  %v1088_v36 = vpack.c.bf16 %v4220_v5, %v4214_v42  ;;  %v5432_v31 = vpack.c.bf16 %v5430_v1, %v5431_v50  ;;  %v5456_v39 = vld [vmem:[#allocation13_spill] sm:$0xff] }
 0x17a   : > { %3088 = vmatprep.subr.bf16.mxu0 %v1169_v60  ;;  %3120 = vmatprep.subr.bf16.mxu1 %v1169_v60  ;;  %v5428_v60 = vld [vmem:[#allocation8_spill] sm:$0xff] }
 0x180   : > { %3009 = vmatmul.mubr.bf16.vlgmr.msra.gmra.mrb[72].mxu0 %v3894_v46  ;;  %v5397_v46 = vpack.c.bf16 %v3939_v15, %v3933_v10  ;;  %v4282_v15 = vadd.bf16 %v4022_v29, %v5400_v54  ;;  %v5436_v54 = vld [vmem:[#allocation24_spill] sm:$0xff] }
 0x181   : > { %3010 = vmatprep.mubr.bf16.mxu0 %v3911_v58  ;;  %3089 = vmatpush3.bf16.xpose.msra.mxu0 %v4228_v40 }
 0x182   : > { %3090 = vmatprep.subr.bf16.mxu0 %v4234_v61  ;;  %v4260_v62 = vadd.bf16 %v4022_v29, %v5397_v46  ;;  %v4401_v46 = vadd.bf16 %v4128_v45, %v5432_v31 }
 0x188   : > { %3011 = vmatmul.mubr.bf16.gmra.mrb[76].mxu0 %v3911_v58  ;;  %v5399_v58 = vpack.c.bf16 %v3955_v27, %v3949_v22  ;;  %v4298_v27 = vadd.bf16 %v4022_v29, %v5402_v8  ;;  %v5441_v8 = vld [vmem:[#allocation10_spill] sm:$0xff] }
 0x189   : > { %3012 = vmatprep.mubr.bf16.mxu0 %v3927_v6  ;;  %3091 = vmatpush3.bf16.xpose.msra.mxu0 %v4244_v55 }
 0x18a   : > { %3092 = vmatprep.subr.bf16.mxu0 %v4250_v13  ;;  %v4276_v10 = vadd.bf16 %v4022_v29, %v5399_v58  ;;  %v5435_v58 = vld [vmem:[#allocation26_spill] sm:$0xff] }
 0x18b   : > { %v5437_v53 = vpack.c.bf16 %v5435_v58, %v5436_v54 }
 0x18d   : > { %v4411_v4 = vadd.bf16 %v4128_v45, %v5437_v53 }
 0x190   : > { %3013 = vmatmul.mubr.bf16.gmra.mrb[80].mxu0 %v3927_v6  ;;  %v5401_v6 = vpack.c.bf16 %v3971_v41, %v3965_v35  ;;  %v5404_v41 = vpack.c.bf16 %v4171_v14, %v4165_v38 }
 0x191   : > { %3014 = vmatprep.mubr.bf16.mxu0 %v3943_v18  ;;  %3093 = vmatpush3.bf16.xpose.msra.mxu0 %v4260_v62 }
 0x192   : > { %3094 = vmatprep.subr.bf16.mxu0 %v4266_v32  ;;  %v4292_v22 = vadd.bf16 %v4022_v29, %v5401_v6  ;;  %v4314_v49 = vadd.bf16 %v4022_v29, %v5404_v41  ;;  %v4417_v6 = vadd.bf16 %v4128_v45, %v5439_v2  ;;  %v5443_v41 = vld [vmem:[#allocation25_spill] sm:$0xff] }
 0x198   : > { %3015 = vmatmul.mubr.bf16.gmra.mrb[84].mxu0 %v3943_v18  ;;  %v5403_v18 = vpack.c.bf16 %v3989_v16, %v3981_v63  ;;  %v4327_v16 = vadd.bf16 %v4022_v29, %v1090_v44  ;;  %v5425_v44 = vld [vmem:[#allocation30_spill] sm:$0xff] }
 0x199   : > { %3016 = vmatprep.mubr.bf16.mxu0 %v3959_v30  ;;  %3095 = vmatpush3.bf16.xpose.msra.mxu0 %v4276_v10 }
 0x19a   : > { %3096 = vmatprep.subr.bf16.mxu0 %v4282_v15  ;;  %v4308_v35 = vadd.bf16 %v4022_v29, %v5403_v18  ;;  %v4427_v18 = vadd.bf16 %v4128_v45, %v1088_v36  ;;  %v4449_v36 = vadd.bf16 %v4128_v45, %v1091_v57  ;;  %v5459_v57 = vld [vmem:[#allocation3_spill] sm:$0xff] }
 0x19c   : > { %5442 = vst [vmem:[#allocation30_spill] sm:$0xff] %v4427_v18  ;;  %5452 = vst [vmem:[#allocation19_spill] sm:$0xff] %v4449_v36 }
 0x1a0   : > { %3017 = vmatmul.mubr.bf16.gmra.mrb[88].mxu0 %v3959_v30  ;;  %v5405_v30 = vpack.c.bf16 %v4006_v23, %v4000_v43  ;;  %v5407_v23 = vpack.c.bf16 %v4063_v56, %v4053_v26  ;;  %v5409_v43 = vpack.c.bf16 %v4150_v33, %v4144_v21  ;;  %v5413_v26 = vpack.c.bf16 %v4179_v28, %v5412_v0  ;;  %v5420_v21 = vld [vmem:[#allocation22_spill] sm:$0xff]  ;;  %v5421_v33 = vld [vmem:[#allocation20_spill] sm:$0xff]  ;;  %v5454_v0 = vld [vmem:[#allocation29_spill] sm:$0xff] }
 0x1a1   : > { %3018 = vmatprep.mubr.bf16.mxu0 %v3975_v47  ;;  %3097 = vmatpush3.bf16.xpose.msra.mxu0 %v4292_v22  ;;  %v5422_v38 = vpack.c.bf16 %v5420_v21, %v5421_v33  ;;  %v5424_v28 = vld [vmem:[#allocation32_spill] sm:$0xff]  ;;  %5433 = vst [vmem:[#allocation22_spill] sm:$0xff] %v4401_v46  ;;  %5438 = vst [vmem:[#allocation20_spill] sm:$0xff] %v4411_v4 }
 0x1a2   : > { %3098 = vmatprep.subr.bf16.mxu0 %v4298_v27  ;;  %v4324_v63 = vadd.bf16 %v4022_v29, %v5405_v30  ;;  %v4353_v29 = vadd.bf16 %v4128_v45, %v5409_v43  ;;  %v4363_v56 = vadd.bf16 %v4128_v45, %v5413_v26  ;;  %v5426_v51 = vpack.c.bf16 %v5424_v28, %v5425_v44  ;;  %v5444_v30 = vld [vmem:[#allocation23_spill] sm:$0xff]  ;;  %v5455_v26 = vld [vmem:[#allocation14_spill] sm:$0xff] }
 0x1a3   : > { %5440 = vst [vmem:[#allocation32_spill] sm:$0xff] %v4417_v6  ;;  %v5445_v7 = vpack.c.bf16 %v5443_v41, %v5444_v30  ;;  %v5449_v43 = vld [vmem:[#allocation27_spill] sm:$0xff] }
 0x1a4   : > { %5410 = vst [vmem:[#allocation34_spill] sm:$0xff] %v4353_v29  ;;  %v4385_v34 = vadd.bf16 %v4128_v45, %v5426_v51 }
 0x1a5   : > { %v4433_v20 = vadd.bf16 %v4128_v45, %v5445_v7 }
 0x1a6   : > { %5427 = vst [vmem:[#allocation17_spill] sm:$0xff] %v4385_v34 }
 0x1a7   : > { %5446 = vst [vmem:[#allocation8_spill] sm:$0xff] %v4433_v20 }
 0x1a8   : > { %3019 = vmatmul.mubr.bf16.gmra.mrb[92].mxu0 %v3975_v47  ;;  %v5406_v47 = vpack.c.bf16 %v4156_v11, %v4146_v24  ;;  %v5417_v24 = vpack.c.bf16 %v5415_v9, %v5416_v12  ;;  %v4379_v11 = vadd.bf16 %v4128_v45, %v5422_v38  ;;  %v5460_v9 = vld [vmem:[#allocation2_spill] sm:$0xff]  ;;  %v5461_v12 = vld [vmem:[#allocation5_spill] sm:$0xff] }
 0x1a9   : > { %3020 = vmatprep.mubr.bf16.mxu0 %v3993_v25  ;;  %3099 = vmatpush3.bf16.xpose.msra.mxu0 %v4308_v35 }
 0x1aa   : > { %3100 = vmatprep.subr.bf16.mxu0 %v4314_v49  ;;  %v4337_v14 = vadd.bf16 %v4128_v45, %v5406_v47  ;;  %v4369_v52 = vadd.bf16 %v4128_v45, %v5417_v24  ;;  %5423 = vst [vmem:[#allocation18_spill] sm:$0xff] %v4379_v11  ;;  %v5447_v47 = vld [vmem:[#allocation11_spill] sm:$0xff]  ;;  %v5462_v24 = vld [vmem:[#allocation4_spill] sm:$0xff] }
 0x1ac   : > { %5418 = vst [vmem:[#allocation31_spill] sm:$0xff] %v4369_v52 }
 0x1b0   : > { %3021 = vmatmul.mubr.bf16.gmra.mrb[96].mxu0 %v3993_v25  ;;  %v4347_v25 = vadd.bf16 %v4128_v45, %v5407_v23  ;;  %v5448_v23 = vld [vmem:[#allocation28_spill] sm:$0xff] }
 0x1b1   : > { %3022 = vmatprep.mubr.bf16.mxu0 %v4010_v19  ;;  %3101 = vmatpush3.bf16.xpose.msra.mxu0 %v4324_v63  ;;  %v5450_v42 = vpack.c.bf16 %v5448_v23, %v5449_v43 }
 0x1b2   : > { %3102 = vmatprep.subr.bf16.mxu0 %v4327_v16  ;;  %5408 = vst [vmem:[#allocation33_spill] sm:$0xff] %v4347_v25 }
 0x1b3   : > { %v4443_v5 = vadd.bf16 %v4128_v45, %v5450_v42  ;;  %v5457_v45 = vld [vmem:[#allocation16_spill] sm:$0xff] }
 0x1b5   : > { %5451 = vst [vmem:[#allocation21_spill] sm:$0xff] %v4443_v5 }
 0x1b8   : > { %3023 = vmatmul.mubr.bf16.gmra.mrb[100].mxu0 %v4010_v19  ;;  %v5411_v19 = vld [vmem:[#allocation6_spill] sm:$0xff] }
 0x1b9   : > { %3103 = vmatpush3.bf16.xpose.msra.mxu0 %v4029_v37  ;;  %3104 = vmatprep.mubr.bf16.mxu0 %v3896_v48  ;;  %5414 = vst [vmem:[#allocation6_spill] sm:$0xff] %v4363_v56 }
 0x1ba   : > { %3184 = vmatprep.subr.bf16.mxu0 %v4337_v14 }
 0x1c0   : > { %3105 = vmatmul.mubr.bf16.vlgmr.msra.gmra.mrb[104].mxu0 %v3896_v48  ;;  %v5419_v48 = vld [vmem:[#allocation7_spill] sm:$0xff] }
 0x1c1   : > { %3106 = vmatprep.mubr.bf16.mxu0 %v5411_v19  ;;  %3185 = vmatpush3.bf16.xpose.msra.mxu0 %v4347_v25  ;;  %5429 = vst [vmem:[#allocation7_spill] sm:$0xff] %v4395_v17 }
 0x1c2   : > { %3186 = vmatprep.subr.bf16.mxu0 %v4353_v29 }
 0x1c8   : > { %3107 = vmatmul.mubr.bf16.gmra.mrb[108].mxu0 %v5411_v19  ;;  %v5453_v19 = vld [vmem:[#allocation12_spill] sm:$0xff] }
 0x1c9   : > { %3108 = vmatprep.mubr.bf16.mxu0 %v5419_v48  ;;  %3187 = vmatpush3.bf16.xpose.msra.mxu0 %v4369_v52 }
 0x1ca   : > { %3188 = vmatprep.subr.bf16.mxu0 %v4363_v56 }
 0x1d0   : > { %3109 = vmatmul.mubr.bf16.gmra.mrb[112].mxu0 %v5419_v48 }
 0x1d1   : > { %3110 = vmatprep.mubr.bf16.mxu0 %v5428_v60  ;;  %3189 = vmatpush3.bf16.xpose.msra.mxu0 %v4379_v11 }
 0x1d2   : > { %3190 = vmatprep.subr.bf16.mxu0 %v4385_v34 }
 0x1d8   : > { %3111 = vmatmul.mubr.bf16.gmra.mrb[116].mxu0 %v5428_v60 }
 0x1d9   : > { %3112 = vmatprep.mubr.bf16.mxu0 %v5434_v3  ;;  %3191 = vmatpush3.bf16.xpose.msra.mxu0 %v4401_v46 }
 0x1da   : > { %3192 = vmatprep.subr.bf16.mxu0 %v4395_v17 }
 0x1e0   : > { %3113 = vmatmul.mubr.bf16.gmra.mrb[120].mxu0 %v5434_v3 }
 0x1e1   : > { %3114 = vmatprep.mubr.bf16.mxu0 %v5441_v8  ;;  %3193 = vmatpush3.bf16.xpose.msra.mxu0 %v4411_v4 }
 0x1e2   : > { %3194 = vmatprep.subr.bf16.mxu0 %v4417_v6 }
 0x1e8   : > { %3115 = vmatmul.mubr.bf16.gmra.mrb[124].mxu0 %v5441_v8 }
 0x1e9   : > { %3116 = vmatprep.mubr.bf16.mxu0 %v5447_v47  ;;  %3195 = vmatpush3.bf16.xpose.msra.mxu0 %v4433_v20 }
 0x1ea   : > { %3196 = vmatprep.subr.bf16.mxu0 %v4427_v18 }
 0x1f0   : > { %3117 = vmatmul.mubr.bf16.gmra.mrb[128].mxu0 %v5447_v47 }
 0x1f1   : > { %3118 = vmatprep.mubr.bf16.mxu0 %v5453_v19  ;;  %3197 = vmatpush3.bf16.xpose.msra.mxu0 %v4443_v5 }
 0x1f2   : > { %3198 = vmatprep.subr.bf16.mxu0 %v4449_v36 }
 0x1f8   : > { %3119 = vmatmul.mubr.bf16.gmra.mrb[132].mxu0 %v5453_v19 }
 0x1f9   : > { %3199 = vmatpush3.bf16.xpose.msra.mxu0 %v5454_v0  ;;  %3200 = vmatprep.mubr.bf16.mxu0 %v5455_v26 }
 0x200   : > { %3201 = vmatmul.mubr.bf16.vlgmr.msra.gmra.mrb[136].mxu0 %v5455_v26 }
 0x201   : > { %3202 = vmatprep.mubr.bf16.mxu0 %v5456_v39 }
 0x208   : > { %3203 = vmatmul.mubr.bf16.gmra.mrb[140].mxu0 %v5456_v39 }
 0x209   : > { %3204 = vmatprep.mubr.bf16.mxu0 %v5457_v45 }
 0x210   : > { %3205 = vmatmul.mubr.bf16.gmra.mrb[144].mxu0 %v5457_v45 }
 0x211   : > { %3206 = vmatprep.mubr.bf16.mxu0 %v5458_v59 }
 0x218   : > { %3207 = vmatmul.mubr.bf16.gmra.mrb[148].mxu0 %v5458_v59 }
 0x219   : > { %3208 = vmatprep.mubr.bf16.mxu0 %v5459_v57 }
 0x220   : > { %3209 = vmatmul.mubr.bf16.gmra.mrb[152].mxu0 %v5459_v57 }
 0x221   : > { %3210 = vmatprep.mubr.bf16.mxu0 %v5460_v9 }
 0x228   : > { %3211 = vmatmul.mubr.bf16.gmra.mrb[156].mxu0 %v5460_v9 }
 0x229   : > { %3212 = vmatprep.mubr.bf16.mxu0 %v5461_v12 }
 0x230   : > { %3213 = vmatmul.mubr.bf16.gmra.mrb[160].mxu0 %v5461_v12 }
 0x231   : > { %3214 = vmatprep.mubr.bf16.mxu0 %v5462_v24 }
 0x238   : > { %3215 = vmatmul.mubr.bf16.gmra.mrb[164].mxu0 %v5462_v24 }
 0x253   : > { %v4473_v48 = vpop.f32.mrb[72].mxu0 }
 0x254   : > { %v4475_v21 = vpop.f32.mrb[73].mxu0 }
 0x255   : > { %v4477_v33 = vpop.f32.mrb[74].mxu0  ;;  %v1305_v38 = vmax.f32 %v4473_v48, %v4475_v21 }
 0x256   : > { %v4481_v28 = vpop.f32.mrb[75].mxu0 }
 0x257   : > { %1306 = vmax.xlane.f32.xlu0 %v1305_v38  ;;  %v1308_v44 = vmax.f32 %v4477_v33, %v4481_v28 }
 0x25b   : > { %1309 = vmax.xlane.f32.xlu0 %v1308_v44  ;;  %v4485_v51 = vpop.f32.mrb[76].mxu0 }
 0x25c   : > { %v4487_v60 = vpop.f32.mrb[77].mxu0 }
 0x25d   : > { %v4489_v1 = vpop.f32.mrb[78].mxu0  ;;  %v1311_v50 = vmax.f32 %v4485_v51, %v4487_v60 }
 0x25e   : > { %v4493_v31 = vpop.f32.mrb[79].mxu0 }
 0x25f   : > { %1312 = vmax.xlane.f32.xlu1 %v1311_v50  ;;  %v1314_v3 = vmax.f32 %v4489_v1, %v4493_v31 }
 0x263   : > { %1315 = vmax.xlane.f32.xlu1 %v1314_v3  ;;  %v4497_v58 = vpop.f32.mrb[80].mxu0 }
 0x264   : > { %v4499_v54 = vpop.f32.mrb[81].mxu0 }
 0x265   : > { %v4501_v53 = vpop.f32.mrb[82].mxu0  ;;  %v1317_v2 = vmax.f32 %v4497_v58, %v4499_v54 }
 0x266   : > { %v4505_v8 = vpop.f32.mrb[83].mxu0 }
 0x267   : > { %1318 = vmax.xlane.f32.xlu0 %v1317_v2  ;;  %v1320_v41 = vmax.f32 %v4501_v53, %v4505_v8 }
 0x269   : > { %1321 = vmax.xlane.f32.xlu1 %v1320_v41 }
 0x26b   : > { %v4509_v30 = vpop.f32.mrb[84].mxu0 }
 0x26c   : > { %v4511_v7 = vpop.f32.mrb[85].mxu0 }
 0x26d   : > { %v4513_v47 = vpop.f32.mrb[86].mxu0  ;;  %v1323_v23 = vmax.f32 %v4509_v30, %v4511_v7 }
 0x26e   : > { %v4517_v43 = vpop.f32.mrb[87].mxu0 }
 0x26f   : > { %1324 = vmax.xlane.f32.xlu0 %v1323_v23  ;;  %v1326_v42 = vmax.f32 %v4513_v47, %v4517_v43 }
 0x271   : > { %1327 = vmax.xlane.f32.xlu1 %v1326_v42 }
 0x273   : > { %v4521_v19 = vpop.f32.mrb[88].mxu0 }
 0x274   : > { %v4523_v26 = vpop.f32.mrb[89].mxu0 }
 0x275   : > { %v4525_v39 = vpop.f32.mrb[90].mxu0  ;;  %v1329_v45 = vmax.f32 %v4521_v19, %v4523_v26 }
 0x276   : > { %v4529_v59 = vpop.f32.mrb[91].mxu0 }
 0x277   : > { %1330 = vmax.xlane.f32.xlu0 %v1329_v45  ;;  %v1332_v57 = vmax.f32 %v4525_v39, %v4529_v59 }
 0x279   : > { %1333 = vmax.xlane.f32.xlu1 %v1332_v57 }
 0x27b   : > { %v4533_v9 = vpop.f32.mrb[92].mxu0 }
 0x27c   : > { %v4535_v12 = vpop.f32.mrb[93].mxu0 }
 0x27d   : > { %v4537_v24 = vpop.f32.mrb[94].mxu0  ;;  %v1335_v38 = vmax.f32 %v4533_v9, %v4535_v12 }
 0x27e   : > { %v4541_v44 = vpop.f32.mrb[95].mxu0 }
 0x27f   : > { %1336 = vmax.xlane.f32.xlu0 %v1335_v38  ;;  %v1338_v50 = vmax.f32 %v4537_v24, %v4541_v44 }
 0x281   : > { %1339 = vmax.xlane.f32.xlu1 %v1338_v50 }
 0x283   : > { %v4545_v3 = vpop.f32.mrb[96].mxu0 }
 0x284   : > { %v4547_v2 = vpop.f32.mrb[97].mxu0 }
 0x285   : > { %v4549_v41 = vpop.f32.mrb[98].mxu0  ;;  %v1341_v23 = vmax.f32 %v4545_v3, %v4547_v2 }
 0x286   : > { %v4553_v42 = vpop.f32.mrb[99].mxu0 }
 0x287   : > { %1342 = vmax.xlane.f32.xlu0 %v1341_v23  ;;  %v1344_v45 = vmax.f32 %v4549_v41, %v4553_v42 }
 0x289   : > { %1345 = vmax.xlane.f32.xlu1 %v1344_v45 }
 0x28b   : > { %v4557_v57 = vpop.f32.mrb[100].mxu0 }
 0x28c   : > { %v4559_v38 = vpop.f32.mrb[101].mxu0 }
 0x28d   : > { %v4561_v50 = vpop.f32.mrb[102].mxu0  ;;  %v1347_v0 = vmax.f32 %v4557_v57, %v4559_v38 }
 0x28e   : > { %v4565_v36 = vpop.f32.mrb[103].mxu0 }
 0x28f   : > { %1348 = vmax.xlane.f32.xlu0 %v1347_v0  ;;  %v1350_v5 = vmax.f32 %v4561_v50, %v4565_v36 }
 0x291   : > { %1351 = vmax.xlane.f32.xlu1 %v1350_v5 }
 0x293   : > { %v4569_v23 = vpop.f32.mrb[104].mxu0 }
 0x294   : > { %v4571_v18 = vpop.f32.mrb[105].mxu0 }
 0x295   : > { %v4573_v45 = vpop.f32.mrb[106].mxu0  ;;  %v1787_v20 = vmax.f32 %v4569_v23, %v4571_v18 }
 0x296   : > { %5463 = vst [vmem:[#allocation9_spill] sm:$0xff] %v4573_v45  ;;  %v4577_v6 = vpop.f32.mrb[107].mxu0 }
 0x297   : > { %5464 = vst [vmem:[#allocation26_spill] sm:$0xff] %v4577_v6  ;;  %1788 = vmax.xlane.f32.xlu0 %v1787_v20  ;;  %v1790_v4 = vmax.f32 %v4573_v45, %v4577_v6 }
 0x299   : > { %1791 = vmax.xlane.f32.xlu1 %v1790_v4 }
 0x29b   : > { %v4581_v0 = vpop.f32.mrb[108].mxu0 }
 0x29c   : > { %5465 = vst [vmem:[#allocation24_spill] sm:$0xff] %v4581_v0  ;;  %v4583_v17 = vpop.f32.mrb[109].mxu0 }
 0x29d   : > { %5466 = vst [vmem:[#allocation10_spill] sm:$0xff] %v4583_v17  ;;  %v4585_v5 = vpop.f32.mrb[110].mxu0  ;;  %v1793_v46 = vmax.f32 %v4581_v0, %v4583_v17 }
 0x29e   : > { %5467 = vst [vmem:[#allocation25_spill] sm:$0xff] %v4585_v5  ;;  %v4589_v34 = vpop.f32.mrb[111].mxu0 }
 0x29f   : > { %5468 = vst [vmem:[#allocation23_spill] sm:$0xff] %v4589_v34  ;;  %1794 = vmax.xlane.f32.xlu0 %v1793_v46  ;;  %v1796_v11 = vmax.f32 %v4585_v5, %v4589_v34 }
 0x2a1   : > { %1797 = vmax.xlane.f32.xlu1 %v1796_v11 }
 0x2a3   : > { %v4593_v20 = vpop.f32.mrb[112].mxu0 }
 0x2a4   : > { %5469 = vst [vmem:[#allocation11_spill] sm:$0xff] %v4593_v20  ;;  %v4595_v56 = vpop.f32.mrb[113].mxu0 }
 0x2a5   : > { %5470 = vst [vmem:[#allocation28_spill] sm:$0xff] %v4595_v56  ;;  %v4597_v4 = vpop.f32.mrb[114].mxu0  ;;  %v1799_v52 = vmax.f32 %v4593_v20, %v4595_v56 }
 0x2a6   : > { %5471 = vst [vmem:[#allocation27_spill] sm:$0xff] %v4597_v4  ;;  %v4601_v29 = vpop.f32.mrb[115].mxu0 }
 0x2a7   : > { %5472 = vst [vmem:[#allocation12_spill] sm:$0xff] %v4601_v29  ;;  %1800 = vmax.xlane.f32.xlu0 %v1799_v52  ;;  %v1802_v25 = vmax.f32 %v4597_v4, %v4601_v29 }
 0x2a9   : > { %1803 = vmax.xlane.f32.xlu1 %v1802_v25 }
 0x2ab   : > { %v4605_v46 = vpop.f32.mrb[116].mxu0 }
 0x2ac   : > { %5473 = vst [vmem:[#allocation14_spill] sm:$0xff] %v4605_v46  ;;  %v4607_v34 = vpop.f32.mrb[117].mxu0 }
 0x2ad   : > { %5474 = vst [vmem:[#allocation13_spill] sm:$0xff] %v4607_v34  ;;  %v4609_v11 = vpop.f32.mrb[118].mxu0  ;;  %v1805_v5 = vmax.f32 %v4605_v46, %v4607_v34 }
 0x2ae   : > { %5475 = vst [vmem:[#allocation16_spill] sm:$0xff] %v4609_v11  ;;  %v4613_v17 = vpop.f32.mrb[119].mxu0 }
 0x2af   : > { %5476 = vst [vmem:[#allocation15_spill] sm:$0xff] %v4613_v17  ;;  %1806 = vmax.xlane.f32.xlu0 %v1805_v5  ;;  %v1808_v56 = vmax.f32 %v4609_v11, %v4613_v17 }
 0x2b1   : > { %1809 = vmax.xlane.f32.xlu1 %v1808_v56 }
 0x2b3   : > { %v4617_v52 = vpop.f32.mrb[120].mxu0 }
 0x2b4   : > { %5477 = vst [vmem:[#allocation3_spill] sm:$0xff] %v4617_v52  ;;  %v4619_v29 = vpop.f32.mrb[121].mxu0 }
 0x2b5   : > { %5478 = vst [vmem:[#allocation2_spill] sm:$0xff] %v4619_v29  ;;  %v4621_v25 = vpop.f32.mrb[122].mxu0  ;;  %v1811_v4 = vmax.f32 %v4617_v52, %v4619_v29 }
 0x2b6   : > { %5479 = vst [vmem:[#allocation5_spill] sm:$0xff] %v4621_v25  ;;  %v4625_v20 = vpop.f32.mrb[123].mxu0 }
 0x2b7   : > { %5480 = vst [vmem:[#allocation4_spill] sm:$0xff] %v4625_v20  ;;  %1812 = vmax.xlane.f32.xlu0 %v1811_v4  ;;  %v1814_v34 = vmax.f32 %v4621_v25, %v4625_v20 }
 0x2b9   : > { %1815 = vmax.xlane.f32.xlu1 %v1814_v34 }
 0x2bb   : > { %v4629_v5 = vpop.f32.mrb[124].mxu0 }
 0x2bc   : > { %5481 = vst [vmem:[#allocation35_spill] sm:$0xff] %v4629_v5  ;;  %v4631_v17 = vpop.f32.mrb[125].mxu0 }
 0x2bd   : > { %5482 = vst [vmem:[#allocation36_spill] sm:$0xff] %v4631_v17  ;;  %v4633_v56 = vpop.f32.mrb[126].mxu0  ;;  %v1817_v11 = vmax.f32 %v4629_v5, %v4631_v17 }
 0x2be   : > { %5483 = vst [vmem:[#allocation37_spill] sm:$0xff] %v4633_v56  ;;  %v4637_v46 = vpop.f32.mrb[127].mxu0 }
 0x2bf   : > { %5484 = vst [vmem:[#allocation38_spill] sm:$0xff] %v4637_v46  ;;  %1818 = vmax.xlane.f32.xlu0 %v1817_v11  ;;  %v1820_v29 = vmax.f32 %v4633_v56, %v4637_v46 }
 0x2c1   : > { %1821 = vmax.xlane.f32.xlu1 %v1820_v29 }
 0x2c3   : > { %v4641_v4 = vpop.f32.mrb[128].mxu0 }
 0x2c4   : > { %5485 = vst [vmem:[#allocation39_spill] sm:$0xff] %v4641_v4  ;;  %v4643_v20 = vpop.f32.mrb[129].mxu0 }
 0x2c5   : > { %5486 = vst [vmem:[#allocation40_spill] sm:$0xff] %v4643_v20  ;;  %v4645_v34 = vpop.f32.mrb[130].mxu0  ;;  %v1823_v25 = vmax.f32 %v4641_v4, %v4643_v20 }
 0x2c6   : > { %5487 = vst [vmem:[#allocation41_spill] sm:$0xff] %v4645_v34  ;;  %v4649_v52 = vpop.f32.mrb[131].mxu0 }
 0x2c7   : > { %5488 = vst [vmem:[#allocation42_spill] sm:$0xff] %v4649_v52  ;;  %1824 = vmax.xlane.f32.xlu0 %v1823_v25  ;;  %v1826_v17 = vmax.f32 %v4645_v34, %v4649_v52 }
 0x2c9   : > { %1827 = vmax.xlane.f32.xlu1 %v1826_v17 }
 0x2cb   : > { %v4653_v11 = vpop.f32.mrb[132].mxu0 }
 0x2cc   : > { %5489 = vst [vmem:[#allocation43_spill] sm:$0xff] %v4653_v11  ;;  %v4655_v46 = vpop.f32.mrb[133].mxu0 }
 0x2cd   : > { %5490 = vst [vmem:[#allocation44_spill] sm:$0xff] %v4655_v46  ;;  %v4657_v29 = vpop.f32.mrb[134].mxu0  ;;  %v1829_v56 = vmax.f32 %v4653_v11, %v4655_v46 }
 0x2ce   : > { %5491 = vst [vmem:[#allocation45_spill] sm:$0xff] %v4657_v29  ;;  %v4661_v5 = vpop.f32.mrb[135].mxu0 }
 0x2cf   : > { %5492 = vst [vmem:[#allocation46_spill] sm:$0xff] %v4661_v5  ;;  %1830 = vmax.xlane.f32.xlu0 %v1829_v56  ;;  %v1832_v20 = vmax.f32 %v4657_v29, %v4661_v5 }
 0x2d1   : > { %1833 = vmax.xlane.f32.xlu1 %v1832_v20 }
 0x2d3   : > { %v4665_v25 = vpop.f32.mrb[136].mxu0 }
 0x2d4   : > { %5493 = vst [vmem:[#allocation47_spill] sm:$0xff] %v4665_v25  ;;  %v4667_v52 = vpop.f32.mrb[137].mxu0 }
 0x2d5   : > { %5494 = vst [vmem:[#allocation48_spill] sm:$0xff] %v4667_v52  ;;  %v4669_v17 = vpop.f32.mrb[138].mxu0  ;;  %v2269_v34 = vmax.f32 %v4665_v25, %v4667_v52 }
 0x2d6   : > { %5495 = vst [vmem:[#allocation49_spill] sm:$0xff] %v4669_v17  ;;  %v4673_v4 = vpop.f32.mrb[139].mxu0 }
 0x2d7   : > { %5496 = vst [vmem:[#allocation50_spill] sm:$0xff] %v4673_v4  ;;  %2270 = vmax.xlane.f32.xlu0 %v2269_v34  ;;  %v2272_v46 = vmax.f32 %v4669_v17, %v4673_v4 }
 0x2d9   : > { %2273 = vmax.xlane.f32.xlu1 %v2272_v46 }
 0x2db   : > { %v4677_v56 = vpop.f32.mrb[140].mxu0 }
 0x2dc   : > { %5497 = vst [vmem:[#allocation51_spill] sm:$0xff] %v4677_v56  ;;  %v4679_v5 = vpop.f32.mrb[141].mxu0 }
 0x2dd   : > { %5498 = vst [vmem:[#allocation52_spill] sm:$0xff] %v4679_v5  ;;  %v4681_v20 = vpop.f32.mrb[142].mxu0  ;;  %v2275_v29 = vmax.f32 %v4677_v56, %v4679_v5 }
 0x2de   : > { %5499 = vst [vmem:[#allocation53_spill] sm:$0xff] %v4681_v20  ;;  %v4685_v11 = vpop.f32.mrb[143].mxu0 }
 0x2df   : > { %5500 = vst [vmem:[#allocation54_spill] sm:$0xff] %v4685_v11  ;;  %2276 = vmax.xlane.f32.xlu0 %v2275_v29  ;;  %v2278_v52 = vmax.f32 %v4681_v20, %v4685_v11 }
 0x2e1   : > { %2279 = vmax.xlane.f32.xlu1 %v2278_v52 }
 0x2e3   : > { %v4689_v34 = vpop.f32.mrb[144].mxu0 }
 0x2e4   : > { %5501 = vst [vmem:[#allocation55_spill] sm:$0xff] %v4689_v34  ;;  %v1307_v4 = vpop.xlane.xlu0 %1306  ;;  %v4691_v46 = vpop.f32.mrb[145].mxu0 }
 0x2e5   : > { %5502 = vst [vmem:[#allocation56_spill] sm:$0xff] %v4691_v46  ;;  %v1353_v17 = vsub.f32 %v4473_v48, %v1307_v4  ;;  %v1354_v25 = vsub.f32 %v4475_v21, %v1307_v4  ;;  %v4695_v0 = vpop.f32.mrb[146].mxu0  ;;  %v2281_v5 = vmax.f32 %v4689_v34, %v4691_v46 }
 0x2e6   : > { %v4699_v56 = vpop.f32.mrb[147].mxu0 }
 0x2e7   : > { %v1385_v29 = vmul.f32 1.442695, %v1353_v17  ;;  %2282 = vmax.xlane.f32.xlu0 %v2281_v5  ;;  %v2284_v52 = vmax.f32 %v4695_v0, %v4699_v56  ;;  %v1387_v11 = vmul.f32 1.442695, %v1354_v25 }
 0x2e8   : > { %v1310_v20 = vpop.xlane.xlu0 %1309 }
 0x2e9   : > { %v1355_v6 = vsub.f32 %v4477_v33, %v1310_v20  ;;  %v1356_v48 = vsub.f32 %v4481_v28, %v1310_v20  ;;  %2285 = vmax.xlane.f32.xlu1 %v2284_v52  ;;  %3387 = vpow2.f32 %v1385_v29 }
 0x2ea   : > { %3389 = vpow2.f32 %v1387_v11 }
 0x2eb   : > { %v1389_v21 = vmul.f32 1.442695, %v1355_v6  ;;  %v1391_v4 = vmul.f32 1.442695, %v1356_v48  ;;  %v4705_v45 = vpop.f32.mrb[148].mxu0 }
 0x2ec   : > { %v1313_v46 = vpop.xlane.xlu1 %1312  ;;  %v4707_v34 = vpop.f32.mrb[149].mxu0 }
 0x2ed   : > { %3391 = vpow2.f32 %v1389_v21  ;;  %v1357_v5 = vsub.f32 %v4485_v51, %v1313_v46  ;;  %v1358_v25 = vsub.f32 %v4487_v60, %v1313_v46  ;;  %v4711_v17 = vpop.f32.mrb[150].mxu0  ;;  %v2287_v33 = vmax.f32 %v4705_v45, %v4707_v34 }
 0x2ee   : > { %5503 = vst [vmem:[#allocation57_spill] sm:$0xff] %v4711_v17  ;;  %3393 = vpow2.f32 %v1391_v4  ;;  %v4715_v28 = vpop.f32.mrb[151].mxu0 }
 0x2ef   : > { %5504 = vst [vmem:[#allocation58_spill] sm:$0xff] %v4715_v28  ;;  %v1393_v6 = vmul.f32 1.442695, %v1357_v5  ;;  %2288 = vmax.xlane.f32.xlu0 %v2287_v33  ;;  %v2290_v11 = vmax.f32 %v4711_v17, %v4715_v28  ;;  %v1395_v20 = vmul.f32 1.442695, %v1358_v25 }
 0x2f0   : > { %v1316_v29 = vpop.xlane.xlu1 %1315 }
 0x2f1   : > { %v1359_v52 = vsub.f32 %v4489_v1, %v1316_v29  ;;  %v1360_v51 = vsub.f32 %v4493_v31, %v1316_v29  ;;  %2291 = vmax.xlane.f32.xlu1 %v2290_v11  ;;  %3395 = vpow2.f32 %v1393_v6 }
 0x2f2   : > { %3397 = vpow2.f32 %v1395_v20 }
 0x2f3   : > { %v1397_v60 = vmul.f32 1.442695, %v1359_v52  ;;  %v1399_v46 = vmul.f32 1.442695, %v1360_v51  ;;  %v4721_v48 = vpop.f32.mrb[152].mxu0  ;;  %v3388_v5 = vpop.eup %3387 }
 0x2f4   : > { %5505 = vst [vmem:[#allocation59_spill] sm:$0xff] %v4721_v48  ;;  %v1319_v21 = vpop.xlane.xlu0 %1318  ;;  %v4723_v4 = vpop.f32.mrb[153].mxu0 }
 0x2f5   : > { %5506 = vst [vmem:[#allocation60_spill] sm:$0xff] %v4723_v4  ;;  %3399 = vpow2.f32 %v1397_v60  ;;  %v1361_v33 = vsub.f32 %v4497_v58, %v1319_v21  ;;  %v1362_v25 = vsub.f32 %v4499_v54, %v1319_v21  ;;  %v4727_v28 = vpop.f32.mrb[154].mxu0  ;;  %v2293_v1 = vmax.f32 %v4721_v48, %v4723_v4  ;;  %v3390_v31 = vpop.eup %3389 }
 0x2f6   : > { %3401 = vpow2.f32 %v1399_v46  ;;  %v1322_v6 = vpop.xlane.xlu1 %1321  ;;  %v4731_v11 = vpop.f32.mrb[155].mxu0 }
 0x2f7   : > { %v3392_v20 = vpop.eup %3391  ;;  %v1401_v29 = vmul.f32 1.442695, %v1361_v33  ;;  %v1363_v52 = vsub.f32 %v4501_v53, %v1322_v6  ;;  %v1364_v51 = vsub.f32 %v4505_v8, %v1322_v6  ;;  %2294 = vmax.xlane.f32.xlu0 %v2293_v1  ;;  %v2296_v54 = vmax.f32 %v4727_v28, %v4731_v11 }
 0x2f8   : > { %v3394_v58 = vpop.eup %3393  ;;  %v1449_v60 = vpack.c.bf16 %v3392_v20, %v3388_v5  ;;  %v1403_v21 = vmul.f32 1.442695, %v1362_v25 }
 0x2f9   : > { %v1405_v17 = vmul.f32 1.442695, %v1363_v52  ;;  %v1407_v4 = vmul.f32 1.442695, %v1364_v51  ;;  %v1450_v48 = vpack.c.bf16 %v3394_v58, %v3390_v31  ;;  %3403 = vpow2.f32 %v1401_v29  ;;  %2297 = vmax.xlane.f32.xlu1 %v2296_v54 }
 0x2fb   : > { %3405 = vpow2.f32 %v1405_v17  ;;  %1497 = vmatprep.mubr.bf16.mxu1 %v1450_v48  ;;  %v4737_v46 = vpop.f32.mrb[156].mxu0  ;;  %v3396_v33 = vpop.eup %3395 }
 0x2fc   : > { %3407 = vpow2.f32 %v1407_v4  ;;  %1498 = vmatmul.mubr.bf16.vlgmr.msra.gmra.mrb[72].mxu1 %v1449_v60  ;;  %v1325_v53 = vpop.xlane.xlu0 %1324  ;;  %v4739_v8 = vpop.f32.mrb[157].mxu0 }
 0x2fd   : > { %3409 = vpow2.f32 %v1403_v21  ;;  %3121 = vmatpush3.bf16.msra.mxu1 %v4228_v40  ;;  %v1365_v5 = vsub.f32 %v4509_v30, %v1325_v53  ;;  %v1366_v25 = vsub.f32 %v4511_v7, %v1325_v53  ;;  %v4744_v1 = vpop.f32.mrb[158].mxu0  ;;  %v2299_v17 = vmax.f32 %v4737_v46, %v4739_v8  ;;  %v3398_v48 = vpop.eup %3397 }
 0x2fe   : > { %3122 = vmatprep.subr.bf16.mxu1 %v4234_v61  ;;  %v1328_v4 = vpop.xlane.xlu1 %1327  ;;  %v4749_v31 = vpop.f32.mrb[159].mxu0 }
 0x2ff   : > { %v3400_v6 = vpop.eup %3399  ;;  %v1409_v20 = vmul.f32 1.442695, %v1365_v5  ;;  %v1367_v29 = vsub.f32 %v4513_v47, %v1328_v4  ;;  %v1368_v40 = vsub.f32 %v4517_v43, %v1328_v4  ;;  %2300 = vmax.xlane.f32.xlu0 %v2299_v17  ;;  %v2302_v7 = vmax.f32 %v4744_v1, %v4749_v31 }
 0x300   : > { %v3402_v30 = vpop.eup %3401  ;;  %v1451_v52 = vpack.c.bf16 %v3400_v6, %v3396_v33  ;;  %v1411_v51 = vmul.f32 1.442695, %v1366_v25 }
 0x301   : > { %v1413_v58 = vmul.f32 1.442695, %v1367_v29  ;;  %v1415_v54 = vmul.f32 1.442695, %v1368_v40  ;;  %3123 = vmatpush3.bf16.msra.mxu1 %v4244_v55  ;;  %v1452_v61 = vpack.c.bf16 %v3402_v30, %v3398_v48  ;;  %3411 = vpow2.f32 %v1409_v20  ;;  %2303 = vmax.xlane.f32.xlu1 %v2302_v7 }
 0x302   : > { %3124 = vmatprep.subr.bf16.mxu1 %v4250_v13 }
 0x303   : > { %3413 = vpow2.f32 %v1413_v58  ;;  %1505 = vmatprep.mubr.bf16.mxu1 %v1452_v61  ;;  %v4757_v47 = vpop.f32.mrb[160].mxu0  ;;  %v3404_v43 = vpop.eup %3403 }
 0x304   : > { %3415 = vpow2.f32 %v1415_v54  ;;  %1506 = vmatmul.mubr.bf16.gmra.mrb[76].mxu1 %v1451_v52  ;;  %v1331_v60 = vpop.xlane.xlu0 %1330  ;;  %v4759_v21 = vpop.f32.mrb[161].mxu0 }
 0x305   : > { %v3406_v53 = vpop.eup %3405  ;;  %3417 = vpow2.f32 %v1411_v51  ;;  %3125 = vmatpush3.bf16.msra.mxu1 %v4260_v62  ;;  %v1369_v55 = vsub.f32 %v4521_v19, %v1331_v60  ;;  %v1370_v33 = vsub.f32 %v4523_v26, %v1331_v60  ;;  %v4764_v13 = vpop.f32.mrb[162].mxu0  ;;  %v2305_v5 = vmax.f32 %v4757_v47, %v4759_v21 }
 0x306   : > { %v3408_v25 = vpop.eup %3407  ;;  %3126 = vmatprep.subr.bf16.mxu1 %v4266_v32  ;;  %v1334_v17 = vpop.xlane.xlu1 %1333  ;;  %v1453_v4 = vpack.c.bf16 %v3406_v53, %v3404_v43 }
 0x307   : > { %v4769_v48 = vpop.f32.mrb[163].mxu0  ;;  %v3410_v6 = vpop.eup %3409  ;;  %v1417_v20 = vmul.f32 1.442695, %v1369_v55  ;;  %v1371_v62 = vsub.f32 %v4525_v39, %v1334_v17  ;;  %v1372_v19 = vsub.f32 %v4529_v59, %v1334_v17  ;;  %2306 = vmax.xlane.f32.xlu0 %v2305_v5  ;;  %v1419_v40 = vmul.f32 1.442695, %v1370_v33 }
 0x308   : > { %v1454_v26 = vpack.c.bf16 %v3408_v25, %v3410_v6  ;;  %v2308_v29 = vmax.f32 %v4764_v13, %v4769_v48 }
 0x309   : > { %v1421_v30 = vmul.f32 1.442695, %v1371_v62  ;;  %v1423_v7 = vmul.f32 1.442695, %v1372_v19  ;;  %3127 = vmatpush3.bf16.msra.mxu1 %v4276_v10  ;;  %3419 = vpow2.f32 %v1417_v20 }
 0x30a   : > { %1513 = vmatprep.mubr.bf16.mxu1 %v1454_v26  ;;  %3128 = vmatprep.subr.bf16.mxu1 %v4282_v15 }
 0x30b   : > { %3421 = vpow2.f32 %v1421_v30  ;;  %2309 = vmax.xlane.f32.xlu1 %v2308_v29  ;;  %v4777_v32 = vpop.f32.mrb[164].mxu0  ;;  %v3412_v39 = vpop.eup %3411 }
 0x30c   : > { %3423 = vpow2.f32 %v1423_v7  ;;  %1514 = vmatmul.mubr.bf16.gmra.mrb[80].mxu1 %v1453_v4  ;;  %v1337_v59 = vpop.xlane.xlu0 %1336  ;;  %v4779_v52 = vpop.f32.mrb[165].mxu0 }
 0x30d   : > { %v3414_v51 = vpop.eup %3413  ;;  %3425 = vpow2.f32 %v1419_v40  ;;  %3129 = vmatpush3.bf16.msra.mxu1 %v4292_v22  ;;  %v1373_v10 = vsub.f32 %v4533_v9, %v1337_v59  ;;  %v1374_v58 = vsub.f32 %v4535_v12, %v1337_v59  ;;  %v4784_v54 = vpop.f32.mrb[166].mxu0  ;;  %v2311_v15 = vmax.f32 %v4777_v32, %v4779_v52 }
 0x30e   : > { %v3416_v61 = vpop.eup %3415  ;;  %3130 = vmatprep.subr.bf16.mxu1 %v4298_v27  ;;  %v1340_v43 = vpop.xlane.xlu1 %1339  ;;  %v1455_v53 = vpack.c.bf16 %v3414_v51, %v3412_v39 }
 0x30f   : > { %v4789_v60 = vpop.f32.mrb[167].mxu0  ;;  %v3418_v55 = vpop.eup %3417  ;;  %v1425_v33 = vmul.f32 1.442695, %v1373_v10  ;;  %v1375_v22 = vsub.f32 %v4537_v24, %v1340_v43  ;;  %v1376_v9 = vsub.f32 %v4541_v44, %v1340_v43  ;;  %2312 = vmax.xlane.f32.xlu0 %v2311_v15  ;;  %v1427_v25 = vmul.f32 1.442695, %v1374_v58 }
 0x310   : > { %v2314_v12 = vmax.f32 %v4784_v54, %v4789_v60  ;;  %v1456_v5 = vpack.c.bf16 %v3416_v61, %v3418_v55 }
 0x311   : > { %v1429_v17 = vmul.f32 1.442695, %v1375_v22  ;;  %v1431_v4 = vmul.f32 1.442695, %v1376_v9  ;;  %3131 = vmatpush3.bf16.msra.mxu1 %v4308_v35  ;;  %3427 = vpow2.f32 %v1425_v33 }
 0x312   : > { %1521 = vmatprep.mubr.bf16.mxu1 %v1456_v5  ;;  %3132 = vmatprep.subr.bf16.mxu1 %v4314_v49 }
 0x313   : > { %3429 = vpow2.f32 %v1429_v17  ;;  %2315 = vmax.xlane.f32.xlu1 %v2314_v12  ;;  %v3420_v27 = vpop.eup %3419  ;;  %v5507_v17 = vld [vmem:[#allocation9_spill] sm:$0xff] }
 0x314   : > { %3431 = vpow2.f32 %v1431_v4  ;;  %1522 = vmatmul.mubr.bf16.gmra.mrb[84].mxu1 %v1455_v53  ;;  %v1343_v24 = vpop.xlane.xlu0 %1342 }
 0x315   : > { %v3422_v44 = vpop.eup %3421  ;;  %3433 = vpow2.f32 %v1427_v25  ;;  %3133 = vmatpush3.bf16.msra.mxu1 %v4324_v63  ;;  %v1377_v6 = vsub.f32 %v4545_v3, %v1343_v24  ;;  %v1378_v20 = vsub.f32 %v4547_v2, %v1343_v24 }
 0x316   : > { %v3424_v62 = vpop.eup %3423  ;;  %3134 = vmatprep.subr.bf16.mxu1 %v4327_v16  ;;  %v1346_v35 = vpop.xlane.xlu1 %1345  ;;  %v1457_v19 = vpack.c.bf16 %v3422_v44, %v3420_v27  ;;  %v5508_v27 = vld [vmem:[#allocation26_spill] sm:$0xff] }
 0x317   : > { %v3426_v49 = vpop.eup %3425  ;;  %v1433_v26 = vmul.f32 1.442695, %v1377_v6  ;;  %v1379_v29 = vsub.f32 %v4549_v41, %v1346_v35  ;;  %v1380_v40 = vsub.f32 %v4553_v42, %v1346_v35  ;;  %v1435_v7 = vmul.f32 1.442695, %v1378_v20 }
 0x318   : > { %v1458_v30 = vpack.c.bf16 %v3424_v62, %v3426_v49 }
 0x319   : > { %v1437_v39 = vmul.f32 1.442695, %v1379_v29  ;;  %v1439_v59 = vmul.f32 1.442695, %v1380_v40  ;;  %3135 = vmatpush3.bf16.msra.mxu1 %v4029_v37  ;;  %3435 = vpow2.f32 %v1433_v26  ;;  %v5510_v26 = vld [vmem:[#allocation10_spill] sm:$0xff] }
 0x31a   : > { %1529 = vmatprep.mubr.bf16.mxu1 %v1458_v30  ;;  %3216 = vmatprep.subr.bf16.mxu1 %v4337_v14 }
 0x31b   : > { %3437 = vpow2.f32 %v1437_v39  ;;  %v3428_v63 = vpop.eup %3427 }
 0x31c   : > { %3439 = vpow2.f32 %v1439_v59  ;;  %1530 = vmatmul.mubr.bf16.gmra.mrb[88].mxu1 %v1457_v19  ;;  %v1349_v16 = vpop.xlane.xlu0 %1348  ;;  %v5509_v19 = vld [vmem:[#allocation24_spill] sm:$0xff] }
 0x31d   : > { %v3430_v3 = vpop.eup %3429  ;;  %3441 = vpow2.f32 %v1435_v7  ;;  %v1381_v2 = vsub.f32 %v4557_v57, %v1349_v16  ;;  %v1382_v41 = vsub.f32 %v4559_v38, %v1349_v16 }
 0x31e   : > { %v3432_v42 = vpop.eup %3431  ;;  %v1352_v51 = vpop.xlane.xlu1 %1351  ;;  %v1459_v10 = vpack.c.bf16 %v3430_v3, %v3428_v63  ;;  %v5511_v63 = vld [vmem:[#allocation25_spill] sm:$0xff]  ;;  %v5512_v3 = vld [vmem:[#allocation23_spill] sm:$0xff] }
 0x31f   : > { %v3434_v58 = vpop.eup %3433  ;;  %v1441_v37 = vmul.f32 1.442695, %v1381_v2  ;;  %v1383_v15 = vsub.f32 %v4561_v50, %v1352_v51  ;;  %v1384_v14 = vsub.f32 %v4565_v36, %v1352_v51  ;;  %v1443_v43 = vmul.f32 1.442695, %v1382_v41 }
 0x320   : > { %v1460_v61 = vpack.c.bf16 %v3432_v42, %v3434_v58 }
 0x321   : > { %v1445_v53 = vmul.f32 1.442695, %v1383_v15  ;;  %v1447_v55 = vmul.f32 1.442695, %v1384_v14  ;;  %3443 = vpow2.f32 %v1441_v37  ;;  %v5513_v14 = vld [vmem:[#allocation11_spill] sm:$0xff] }
 0x322   : > { %1537 = vmatprep.mubr.bf16.mxu1 %v1460_v61 }
 0x323   : > { %3445 = vpow2.f32 %v1445_v53  ;;  %v3436_v33 = vpop.eup %3435 }
 0x324   : > { %3447 = vpow2.f32 %v1447_v55  ;;  %1538 = vmatmul.mubr.bf16.gmra.mrb[92].mxu1 %v1459_v10  ;;  %v1789_v57 = vpop.xlane.xlu0 %1788 }
 0x325   : > { %v3438_v38 = vpop.eup %3437  ;;  %3449 = vpow2.f32 %v1443_v43  ;;  %v1835_v22 = vsub.f32 %v4569_v23, %v1789_v57  ;;  %v1836_v9 = vsub.f32 %v4571_v18, %v1789_v57  ;;  %v5514_v43 = vld [vmem:[#allocation28_spill] sm:$0xff] }
 0x326   : > { %v3440_v50 = vpop.eup %3439  ;;  %v1792_v12 = vpop.xlane.xlu1 %1791  ;;  %v1461_v36 = vpack.c.bf16 %v3438_v38, %v3436_v33 }
 0x327   : > { %v3442_v5 = vpop.eup %3441  ;;  %v1867_v25 = vmul.f32 1.442695, %v1835_v22  ;;  %v1837_v4 = vsub.f32 %v5507_v17, %v1792_v12  ;;  %v1838_v24 = vsub.f32 %v5508_v27, %v1792_v12  ;;  %v1869_v6 = vmul.f32 1.442695, %v1836_v9  ;;  %v5515_v9 = vld [vmem:[#allocation27_spill] sm:$0xff]  ;;  %v5516_v12 = vld [vmem:[#allocation12_spill] sm:$0xff] }
 0x328   : > { %v1462_v44 = vpack.c.bf16 %v3440_v50, %v3442_v5 }
 0x329   : > { %v1871_v20 = vmul.f32 1.442695, %v1837_v4  ;;  %v1873_v62 = vmul.f32 1.442695, %v1838_v24  ;;  %3451 = vpow2.f32 %v1867_v25 }
 0x32a   : > { %1545 = vmatprep.mubr.bf16.mxu1 %v1462_v44 }
 0x32b   : > { %3453 = vpow2.f32 %v1871_v20  ;;  %v3444_v35 = vpop.eup %3443  ;;  %v5518_v20 = vld [vmem:[#allocation14_spill] sm:$0xff] }
 0x32c   : > { %3455 = vpow2.f32 %v1873_v62  ;;  %1546 = vmatmul.mubr.bf16.gmra.mrb[96].mxu1 %v1461_v36  ;;  %v1795_v18 = vpop.xlane.xlu0 %1794 }
 0x32d   : > { %v3446_v23 = vpop.eup %3445  ;;  %3457 = vpow2.f32 %v1869_v6  ;;  %v1839_v49 = vsub.f32 %v5509_v19, %v1795_v18  ;;  %v1840_v29 = vsub.f32 %v5510_v26, %v1795_v18  ;;  %v5517_v6 = vld [vmem:[#allocation33_spill] sm:$0xff]  ;;  %v5520_v19 = vld [vmem:[#allocation34_spill] sm:$0xff] }
 0x32e   : > { %v3448_v40 = vpop.eup %3447  ;;  %v1798_v30 = vpop.xlane.xlu1 %1797  ;;  %v1463_v7 = vpack.c.bf16 %v3446_v23, %v3444_v35  ;;  %v5519_v35 = vld [vmem:[#allocation13_spill] sm:$0xff] }
 0x32f   : > { %v3450_v39 = vpop.eup %3449  ;;  %v1875_v59 = vmul.f32 1.442695, %v1839_v49  ;;  %v1841_v16 = vsub.f32 %v5511_v63, %v1798_v30  ;;  %v1842_v2 = vsub.f32 %v5512_v3, %v1798_v30  ;;  %v1877_v42 = vmul.f32 1.442695, %v1840_v29  ;;  %v5521_v30 = vld [vmem:[#allocation16_spill] sm:$0xff] }
 0x330   : > { %v1464_v41 = vpack.c.bf16 %v3448_v40, %v3450_v39  ;;  %v5522_v39 = vld [vmem:[#allocation15_spill] sm:$0xff] }
 0x331   : > { %v1879_v51 = vmul.f32 1.442695, %v1841_v16  ;;  %v1881_v10 = vmul.f32 1.442695, %v1842_v2  ;;  %3459 = vpow2.f32 %v1875_v59 }
 0x332   : > { %1553 = vmatprep.mubr.bf16.mxu1 %v1464_v41  ;;  %v5523_v41 = vld [vmem:[#allocation31_spill] sm:$0xff] }
 0x333   : > { %3461 = vpow2.f32 %v1879_v51  ;;  %v3452_v58 = vpop.eup %3451 }
 0x334   : > { %3463 = vpow2.f32 %v1881_v10  ;;  %1554 = vmatmul.mubr.bf16.gmra.mrb[100].mxu1 %v1463_v7  ;;  %v1801_v37 = vpop.xlane.xlu0 %1800 }
 0x335   : > { %v3454_v15 = vpop.eup %3453  ;;  %3465 = vpow2.f32 %v1877_v42  ;;  %v1843_v61 = vsub.f32 %v5513_v14, %v1801_v37  ;;  %v1844_v53 = vsub.f32 %v5514_v43, %v1801_v37  ;;  %v5524_v42 = vld [vmem:[#allocation6_spill] sm:$0xff] }
 0x336   : > { %v3456_v55 = vpop.eup %3455  ;;  %v1804_v33 = vpop.xlane.xlu1 %1803  ;;  %v1931_v57 = vpack.c.bf16 %v3454_v15, %v3452_v58  ;;  %v5525_v37 = vld [vmem:[#allocation18_spill] sm:$0xff]  ;;  %v5526_v15 = vld [vmem:[#allocation3_spill] sm:$0xff] }
 0x337   : > { %v3458_v38 = vpop.eup %3457  ;;  %v1883_v22 = vmul.f32 1.442695, %v1843_v61  ;;  %v1845_v50 = vsub.f32 %v5515_v9, %v1804_v33  ;;  %v1846_v36 = vsub.f32 %v5516_v12, %v1804_v33  ;;  %v1885_v25 = vmul.f32 1.442695, %v1844_v53  ;;  %v5527_v61 = vld [vmem:[#allocation2_spill] sm:$0xff]  ;;  %v5529_v9 = vld [vmem:[#allocation5_spill] sm:$0xff] }
 0x338   : > { %v1932_v5 = vpack.c.bf16 %v3456_v55, %v3458_v38  ;;  %v5528_v55 = vld [vmem:[#allocation17_spill] sm:$0xff]  ;;  %v5530_v12 = vld [vmem:[#allocation4_spill] sm:$0xff] }
 0x339   : > { %v1887_v17 = vmul.f32 1.442695, %v1845_v50  ;;  %v1889_v4 = vmul.f32 1.442695, %v1846_v36  ;;  %3467 = vpow2.f32 %v1883_v22 }
 0x33a   : > { %1979 = vmatprep.mubr.bf16.mxu1 %v1932_v5 }
 0x33b   : > { %3469 = vpow2.f32 %v1887_v17  ;;  %v3460_v27 = vpop.eup %3459 }
 0x33c   : > { %3471 = vpow2.f32 %v1889_v4  ;;  %1980 = vmatmul.mubr.bf16.vlgmr.msra.gmra.mrb[104].mxu1 %v1931_v57  ;;  %v1807_v24 = vpop.xlane.xlu0 %1806 }
 0x33d   : > { %v3462_v44 = vpop.eup %3461  ;;  %3473 = vpow2.f32 %v1885_v25  ;;  %3217 = vmatpush3.bf16.msra.mxu1 %v5517_v6  ;;  %v1847_v62 = vsub.f32 %v5518_v20, %v1807_v24  ;;  %v1848_v18 = vsub.f32 %v5519_v35, %v1807_v24  ;;  %v5532_v24 = vld [vmem:[#allocation7_spill] sm:$0xff] }
 0x33e   : > { %v3464_v23 = vpop.eup %3463  ;;  %3218 = vmatprep.subr.bf16.mxu1 %v5520_v19  ;;  %v1810_v49 = vpop.xlane.xlu1 %1809  ;;  %v1933_v26 = vpack.c.bf16 %v3462_v44, %v3460_v27  ;;  %v5531_v27 = vld [vmem:[#allocation22_spill] sm:$0xff]  ;;  %v5534_v35 = vld [vmem:[#allocation35_spill] sm:$0xff] }
 0x33f   : > { %v3466_v29 = vpop.eup %3465  ;;  %v1891_v40 = vmul.f32 1.442695, %v1847_v62  ;;  %v1849_v7 = vsub.f32 %v5521_v30, %v1810_v49  ;;  %v1850_v59 = vsub.f32 %v5522_v39, %v1810_v49  ;;  %v1893_v16 = vmul.f32 1.442695, %v1848_v18  ;;  %v5533_v62 = vld [vmem:[#allocation20_spill] sm:$0xff]  ;;  %v5537_v39 = vld [vmem:[#allocation37_spill] sm:$0xff] }
 0x340   : > { %v1934_v63 = vpack.c.bf16 %v3464_v23, %v3466_v29  ;;  %v5535_v23 = vld [vmem:[#allocation36_spill] sm:$0xff] }
 0x341   : > { %v1895_v3 = vmul.f32 1.442695, %v1849_v7  ;;  %v1897_v2 = vmul.f32 1.442695, %v1850_v59  ;;  %3219 = vmatpush3.bf16.msra.mxu1 %v5523_v41  ;;  %3475 = vpow2.f32 %v1891_v40 }
 0x342   : > { %1987 = vmatprep.mubr.bf16.mxu1 %v1934_v63  ;;  %3220 = vmatprep.subr.bf16.mxu1 %v5524_v42  ;;  %v5538_v63 = vld [vmem:[#allocation38_spill] sm:$0xff] }
 0x343   : > { %3477 = vpow2.f32 %v1895_v3  ;;  %v3468_v51 = vpop.eup %3467 }
 0x344   : > { %3479 = vpow2.f32 %v1897_v2  ;;  %1988 = vmatmul.mubr.bf16.gmra.mrb[108].mxu1 %v1933_v26  ;;  %v1813_v10 = vpop.xlane.xlu0 %1812  ;;  %v5536_v26 = vld [vmem:[#allocation32_spill] sm:$0xff] }
 0x345   : > { %v3470_v58 = vpop.eup %3469  ;;  %3481 = vpow2.f32 %v1893_v16  ;;  %3221 = vmatpush3.bf16.msra.mxu1 %v5525_v37  ;;  %v1851_v14 = vsub.f32 %v5526_v15, %v1813_v10  ;;  %v1852_v43 = vsub.f32 %v5527_v61, %v1813_v10  ;;  %v5540_v10 = vld [vmem:[#allocation30_spill] sm:$0xff]  ;;  %v5542_v61 = vld [vmem:[#allocation39_spill] sm:$0xff] }
 0x346   : > { %v3472_v53 = vpop.eup %3471  ;;  %3222 = vmatprep.subr.bf16.mxu1 %v5528_v55  ;;  %v1816_v33 = vpop.xlane.xlu1 %1815  ;;  %v1935_v57 = vpack.c.bf16 %v3470_v58, %v3468_v51  ;;  %v5539_v51 = vld [vmem:[#allocation8_spill] sm:$0xff] }
 0x347   : > { %v3474_v38 = vpop.eup %3473  ;;  %v1899_v22 = vmul.f32 1.442695, %v1851_v14  ;;  %v1853_v50 = vsub.f32 %v5529_v9, %v1816_v33  ;;  %v1854_v36 = vsub.f32 %v5530_v12, %v1816_v33  ;;  %v1901_v25 = vmul.f32 1.442695, %v1852_v43  ;;  %v5541_v14 = vld [vmem:[#allocation21_spill] sm:$0xff] }
 0x348   : > { %v1936_v5 = vpack.c.bf16 %v3472_v53, %v3474_v38  ;;  %v5543_v53 = vld [vmem:[#allocation40_spill] sm:$0xff]  ;;  %v5545_v12 = vld [vmem:[#allocation41_spill] sm:$0xff] }
 0x349   : > { %v1903_v17 = vmul.f32 1.442695, %v1853_v50  ;;  %v1905_v4 = vmul.f32 1.442695, %v1854_v36  ;;  %3223 = vmatpush3.bf16.msra.mxu1 %v5531_v27  ;;  %3483 = vpow2.f32 %v1899_v22 }
 0x34a   : > { %1995 = vmatprep.mubr.bf16.mxu1 %v1936_v5  ;;  %3224 = vmatprep.subr.bf16.mxu1 %v5532_v24  ;;  %v5546_v5 = vld [vmem:[#allocation42_spill] sm:$0xff] }
 0x34b   : > { %3485 = vpow2.f32 %v1903_v17  ;;  %v3476_v44 = vpop.eup %3475 }
 0x34c   : > { %3487 = vpow2.f32 %v1905_v4  ;;  %1996 = vmatmul.mubr.bf16.gmra.mrb[112].mxu1 %v1935_v57  ;;  %v1819_v6 = vpop.xlane.xlu0 %1818  ;;  %v5544_v57 = vld [vmem:[#allocation19_spill] sm:$0xff] }
 0x34d   : > { %v3478_v20 = vpop.eup %3477  ;;  %3489 = vpow2.f32 %v1901_v25  ;;  %3225 = vmatpush3.bf16.msra.mxu1 %v5533_v62  ;;  %v1855_v18 = vsub.f32 %v5534_v35, %v1819_v6  ;;  %v1856_v19 = vsub.f32 %v5535_v23, %v1819_v6  ;;  %v5548_v35 = vld [vmem:[#allocation43_spill] sm:$0xff]  ;;  %v5549_v23 = vld [vmem:[#allocation44_spill] sm:$0xff] }
 0x34e   : > { %v3480_v49 = vpop.eup %3479  ;;  %3226 = vmatprep.subr.bf16.mxu1 %v5536_v26  ;;  %v1822_v29 = vpop.xlane.xlu1 %1821  ;;  %v1937_v40 = vpack.c.bf16 %v3478_v20, %v3476_v44  ;;  %v5547_v44 = vld [vmem:[#allocation29_spill] sm:$0xff] }
 0x34f   : > { %v3482_v30 = vpop.eup %3481  ;;  %v1907_v7 = vmul.f32 1.442695, %v1855_v18  ;;  %v1857_v59 = vsub.f32 %v5537_v39, %v1822_v29  ;;  %v1858_v16 = vsub.f32 %v5538_v63, %v1822_v29  ;;  %v1909_v2 = vmul.f32 1.442695, %v1856_v19  ;;  %v5550_v39 = vld [vmem:[#allocation45_spill] sm:$0xff]  ;;  %v5551_v63 = vld [vmem:[#allocation46_spill] sm:$0xff] }
 0x350   : > { %v1938_v3 = vpack.c.bf16 %v3480_v49, %v3482_v30 }
 0x351   : > { %v1911_v41 = vmul.f32 1.442695, %v1857_v59  ;;  %v1913_v42 = vmul.f32 1.442695, %v1858_v16  ;;  %3227 = vmatpush3.bf16.msra.mxu1 %v5539_v51  ;;  %3491 = vpow2.f32 %v1907_v7 }
 0x352   : > { %2003 = vmatprep.mubr.bf16.mxu1 %v1938_v3  ;;  %3228 = vmatprep.subr.bf16.mxu1 %v5540_v10 }
 0x353   : > { %3493 = vpow2.f32 %v1911_v41  ;;  %v3484_v58 = vpop.eup %3483 }
 0x354   : > { %3495 = vpow2.f32 %v1913_v42  ;;  %2004 = vmatmul.mubr.bf16.gmra.mrb[116].mxu1 %v1937_v40  ;;  %v1825_v37 = vpop.xlane.xlu0 %1824  ;;  %v3685_v40 = vmov 16  }
 0x355   : > { %v3486_v15 = vpop.eup %3485  ;;  %3497 = vpow2.f32 %v1909_v2  ;;  %3229 = vmatpush3.bf16.msra.mxu1 %v5541_v14  ;;  %v1859_v43 = vsub.f32 %v5542_v61, %v1825_v37  ;;  %v1860_v55 = vsub.f32 %v5543_v53, %v1825_v37  ;;  %3353 = vset.pattern.permute.xlu0 %v3685_v40  ;;  %v5552_v37 = vld [vmem:[#allocation47_spill] sm:$0xff]  ;;  %v5553_v14 = vld [vmem:[#allocation48_spill] sm:$0xff] }
 0x356   : > { %v3488_v33 = vpop.eup %3487  ;;  %3230 = vmatprep.subr.bf16.mxu1 %v5544_v57  ;;  %v1828_v38 = vpop.xlane.xlu1 %1827  ;;  %v1939_v22 = vpack.c.bf16 %v3486_v15, %v3484_v58  ;;  %3354 = vset.pattern.permute.xlu1 %v3685_v40 }
 0x357   : > { %v3490_v9 = vpop.eup %3489  ;;  %v1915_v50 = vmul.f32 1.442695, %v1859_v43  ;;  %v1861_v36 = vsub.f32 %v5545_v12, %v1828_v38  ;;  %v1862_v25 = vsub.f32 %v5546_v5, %v1828_v38  ;;  %v1917_v4 = vmul.f32 1.442695, %v1860_v55  ;;  %v5554_v38 = vld [vmem:[#allocation49_spill] sm:$0xff] }
 0x358   : > { %v1940_v17 = vpack.c.bf16 %v3488_v33, %v3490_v9  ;;  %v5555_v9 = vld [vmem:[#allocation50_spill] sm:$0xff] }
 0x359   : > { %v1919_v27 = vmul.f32 1.442695, %v1861_v36  ;;  %v1921_v24 = vmul.f32 1.442695, %v1862_v25  ;;  %3231 = vmatpush3.bf16.msra.mxu1 %v5547_v44  ;;  %3499 = vpow2.f32 %v1915_v50 }
 0x35a   : > { %2011 = vmatprep.mubr.bf16.mxu1 %v1940_v17 }
 0x35b   : > { %3501 = vpow2.f32 %v1919_v27  ;;  %v3492_v6 = vpop.eup %3491 }
 0x35c   : > { %3503 = vpow2.f32 %v1921_v24  ;;  %2012 = vmatmul.mubr.bf16.gmra.mrb[120].mxu1 %v1939_v22  ;;  %v1831_v20 = vpop.xlane.xlu0 %1830  ;;  %v5556_v24 = vld [vmem:[#allocation51_spill] sm:$0xff] }
 0x35d   : > { %v3494_v62 = vpop.eup %3493  ;;  %3505 = vpow2.f32 %v1917_v4  ;;  %v1863_v18 = vsub.f32 %v5548_v35, %v1831_v20  ;;  %v1864_v19 = vsub.f32 %v5549_v23, %v1831_v20 }
 0x35e   : > { %v3496_v49 = vpop.eup %3495  ;;  %v1834_v26 = vpop.xlane.xlu1 %1833  ;;  %v1941_v29 = vpack.c.bf16 %v3494_v62, %v3492_v6  ;;  %v5557_v6 = vld [vmem:[#allocation52_spill] sm:$0xff] }
 0x35f   : > { %v3498_v30 = vpop.eup %3497  ;;  %v1923_v7 = vmul.f32 1.442695, %v1863_v18  ;;  %v1865_v59 = vsub.f32 %v5550_v39, %v1834_v26  ;;  %v1866_v16 = vsub.f32 %v5551_v63, %v1834_v26  ;;  %v1925_v2 = vmul.f32 1.442695, %v1864_v19 }
 0x360   : > { %v1942_v3 = vpack.c.bf16 %v3496_v49, %v3498_v30  ;;  %v5558_v49 = vld [vmem:[#allocation53_spill] sm:$0xff] }
 0x361   : > { %v1927_v41 = vmul.f32 1.442695, %v1865_v59  ;;  %v1929_v42 = vmul.f32 1.442695, %v1866_v16  ;;  %3507 = vpow2.f32 %v1923_v7 }
 0x362   : > { %2019 = vmatprep.mubr.bf16.mxu1 %v1942_v3 }
 0x363   : > { %3509 = vpow2.f32 %v1927_v41  ;;  %v3500_v51 = vpop.eup %3499 }
 0x364   : > { %3511 = vpow2.f32 %v1929_v42  ;;  %2020 = vmatmul.mubr.bf16.gmra.mrb[124].mxu1 %v1941_v29  ;;  %v2271_v10 = vpop.xlane.xlu0 %2270  ;;  %v5559_v29 = vld [vmem:[#allocation54_spill] sm:$0xff]  ;;  %v5561_v42 = vld [vmem:[#allocation56_spill] sm:$0xff] }
 0x365   : > { %v3502_v58 = vpop.eup %3501  ;;  %3513 = vpow2.f32 %v1925_v2  ;;  %v2317_v15 = vsub.f32 %v5552_v37, %v2271_v10  ;;  %v2318_v61 = vsub.f32 %v5553_v14, %v2271_v10  ;;  %v5560_v2 = vld [vmem:[#allocation55_spill] sm:$0xff] }
 0x366   : > { %v3504_v43 = vpop.eup %3503  ;;  %v2274_v53 = vpop.xlane.xlu1 %2273  ;;  %v1943_v55 = vpack.c.bf16 %v3502_v58, %v3500_v51 }
 0x367   : > { %v3506_v33 = vpop.eup %3505  ;;  %v2349_v57 = vmul.f32 1.442695, %v2317_v15  ;;  %v2319_v22 = vsub.f32 %v5554_v38, %v2274_v53  ;;  %v2320_v50 = vsub.f32 %v5555_v9, %v2274_v53  ;;  %v2351_v36 = vmul.f32 1.442695, %v2318_v61 }
 0x368   : > { %v1944_v12 = vpack.c.bf16 %v3504_v43, %v3506_v33 }
 0x369   : > { %v2353_v5 = vmul.f32 1.442695, %v2319_v22  ;;  %v2355_v25 = vmul.f32 1.442695, %v2320_v50  ;;  %3515 = vpow2.f32 %v2349_v57 }
 0x36a   : > { %2027 = vmatprep.mubr.bf16.mxu1 %v1944_v12 }
 0x36b   : > { %3517 = vpow2.f32 %v2353_v5  ;;  %v3508_v17 = vpop.eup %3507 }
 0x36c   : > { %3519 = vpow2.f32 %v2355_v25  ;;  %2028 = vmatmul.mubr.bf16.gmra.mrb[128].mxu1 %v1943_v55  ;;  %v2277_v4 = vpop.xlane.xlu0 %2276 }
 0x36d   : > { %v3510_v27 = vpop.eup %3509  ;;  %3521 = vpow2.f32 %v2351_v36  ;;  %v2321_v44 = vsub.f32 %v5556_v24, %v2277_v4  ;;  %v2322_v20 = vsub.f32 %v5557_v6, %v2277_v4  ;;  %v5562_v4 = vld [vmem:[#allocation57_spill] sm:$0xff]  ;;  %v5563_v24 = vld [vmem:[#allocation58_spill] sm:$0xff] }
 0x36e   : > { %v3512_v62 = vpop.eup %3511  ;;  %v2280_v35 = vpop.xlane.xlu1 %2279  ;;  %v1945_v18 = vpack.c.bf16 %v3510_v27, %v3508_v17 }
 0x36f   : > { %v3514_v23 = vpop.eup %3513  ;;  %v2357_v19 = vmul.f32 1.442695, %v2321_v44  ;;  %v2323_v26 = vsub.f32 %v5558_v49, %v2280_v35  ;;  %v2324_v40 = vsub.f32 %v5559_v29, %v2280_v35  ;;  %v2359_v7 = vmul.f32 1.442695, %v2322_v20  ;;  %v5565_v49 = vld [vmem:[#allocation60_spill] sm:$0xff] }
 0x370   : > { %v1946_v30 = vpack.c.bf16 %v3512_v62, %v3514_v23  ;;  %v5564_v23 = vld [vmem:[#allocation59_spill] sm:$0xff] }
 0x371   : > { %v2361_v39 = vmul.f32 1.442695, %v2323_v26  ;;  %v2363_v59 = vmul.f32 1.442695, %v2324_v40  ;;  %3523 = vpow2.f32 %v2357_v19 }
 0x372   : > { %2035 = vmatprep.mubr.bf16.mxu1 %v1946_v30 }
 0x373   : > { %3525 = vpow2.f32 %v2361_v39  ;;  %v3516_v63 = vpop.eup %3515 }
 0x374   : > { %3527 = vpow2.f32 %v2363_v59  ;;  %2036 = vmatmul.mubr.bf16.gmra.mrb[132].mxu1 %v1945_v18  ;;  %v2283_v16 = vpop.xlane.xlu0 %2282 }
 0x375   : > { %v3518_v3 = vpop.eup %3517  ;;  %3529 = vpow2.f32 %v2359_v7  ;;  %v2325_v41 = vsub.f32 %v5560_v2, %v2283_v16  ;;  %v2326_v51 = vsub.f32 %v5561_v42, %v2283_v16 }
 0x376   : > { %v3520_v10 = vpop.eup %3519  ;;  %v2286_v58 = vpop.xlane.xlu1 %2285  ;;  %v2413_v37 = vpack.c.bf16 %v3518_v3, %v3516_v63 }
 0x377   : > { %v3522_v15 = vpop.eup %3521  ;;  %v2365_v14 = vmul.f32 1.442695, %v2325_v41  ;;  %v2367_v61 = vmul.f32 1.442695, %v2326_v51  ;;  %v2327_v43 = vsub.f32 %v4695_v0, %v2286_v58  ;;  %v2328_v53 = vsub.f32 %v4699_v56, %v2286_v58 }
 0x378   : > { %v2414_v55 = vpack.c.bf16 %v3520_v10, %v3522_v15 }
 0x379   : > { %3531 = vpow2.f32 %v2365_v14  ;;  %v2369_v33 = vmul.f32 1.442695, %v2327_v43  ;;  %v2371_v57 = vmul.f32 1.442695, %v2328_v53 }
 0x37a   : > { %3533 = vpow2.f32 %v2367_v61  ;;  %2461 = vmatprep.mubr.bf16.mxu1 %v2414_v55 }
 0x37b   : > { %3535 = vpow2.f32 %v2369_v33  ;;  %v3524_v38 = vpop.eup %3523 }
 0x37c   : > { %3537 = vpow2.f32 %v2371_v57  ;;  %2462 = vmatmul.mubr.bf16.vlgmr.msra.gmra.mrb[136].mxu1 %v2413_v37  ;;  %v2289_v22 = vpop.xlane.xlu0 %2288 }
 0x37d   : > { %v3526_v9 = vpop.eup %3525  ;;  %v2329_v50 = vsub.f32 %v4705_v45, %v2289_v22  ;;  %v2330_v12 = vsub.f32 %v4707_v34, %v2289_v22 }
 0x37e   : > { %v3528_v36 = vpop.eup %3527  ;;  %v2292_v0 = vpop.xlane.xlu1 %2291  ;;  %v2415_v5 = vpack.c.bf16 %v3526_v9, %v3524_v38 }
 0x37f   : > { %v3530_v56 = vpop.eup %3529  ;;  %v2373_v25 = vmul.f32 1.442695, %v2329_v50  ;;  %v2375_v17 = vmul.f32 1.442695, %v2330_v12  ;;  %v2331_v27 = vsub.f32 %v5562_v4, %v2292_v0  ;;  %v2332_v44 = vsub.f32 %v5563_v24, %v2292_v0 }
 0x380   : > { %v2416_v6 = vpack.c.bf16 %v3528_v36, %v3530_v56 }
 0x381   : > { %3539 = vpow2.f32 %v2373_v25  ;;  %v2377_v20 = vmul.f32 1.442695, %v2331_v27  ;;  %v2379_v62 = vmul.f32 1.442695, %v2332_v44 }
 0x382   : > { %3541 = vpow2.f32 %v2375_v17  ;;  %2469 = vmatprep.mubr.bf16.mxu1 %v2416_v6 }
 0x383   : > { %v3532_v35 = vpop.eup %3531  ;;  %3543 = vpow2.f32 %v2377_v20 }
 0x384   : > { %v3534_v45 = vpop.eup %3533  ;;  %3545 = vpow2.f32 %v2379_v62  ;;  %2470 = vmatmul.mubr.bf16.gmra.mrb[140].mxu1 %v2415_v5  ;;  %v2295_v34 = vpop.xlane.xlu0 %2294 }
 0x385   : > { %v3536_v18 = vpop.eup %3535  ;;  %v2333_v19 = vsub.f32 %v5564_v23, %v2295_v34  ;;  %v2334_v26 = vsub.f32 %v5565_v49, %v2295_v34 }
 0x386   : > { %v3538_v29 = vpop.eup %3537  ;;  %v2417_v40 = vpack.c.bf16 %v3536_v18, %v3532_v35  ;;  %v2298_v39 = vpop.xlane.xlu1 %2297 }
 0x387   : > { %v2381_v30 = vmul.f32 1.442695, %v2333_v19  ;;  %v2383_v7 = vmul.f32 1.442695, %v2334_v26  ;;  %v2418_v59 = vpack.c.bf16 %v3538_v29, %v3534_v45  ;;  %v2335_v63 = vsub.f32 %v4727_v28, %v2298_v39 }
 0x388   : > { %v2336_v16 = vsub.f32 %v4731_v11, %v2298_v39 }
 0x389   : > { %2477 = vmatprep.mubr.bf16.mxu1 %v2418_v59  ;;  %3547 = vpow2.f32 %v2381_v30  ;;  %v2385_v3 = vmul.f32 1.442695, %v2335_v63 }
 0x38a   : > { %v2387_v2 = vmul.f32 1.442695, %v2336_v16  ;;  %3549 = vpow2.f32 %v2383_v7 }
 0x38b   : > { %v3540_v41 = vpop.eup %3539  ;;  %3551 = vpow2.f32 %v2385_v3 }
 0x38c   : > { %v3542_v42 = vpop.eup %3541  ;;  %2478 = vmatmul.mubr.bf16.gmra.mrb[144].mxu1 %v2417_v40  ;;  %v2301_v51 = vpop.xlane.xlu0 %2300  ;;  %3553 = vpow2.f32 %v2387_v2 }
 0x38d   : > { %v3544_v10 = vpop.eup %3543  ;;  %v2337_v58 = vsub.f32 %v4737_v46, %v2301_v51  ;;  %v2338_v37 = vsub.f32 %v4739_v8, %v2301_v51 }
 0x38e   : > { %v3546_v15 = vpop.eup %3545  ;;  %v2419_v28 = vpack.c.bf16 %v3544_v10, %v3540_v41  ;;  %v2304_v61 = vpop.xlane.xlu1 %2303 }
 0x38f   : > { %v2389_v14 = vmul.f32 1.442695, %v2337_v58  ;;  %v2391_v11 = vmul.f32 1.442695, %v2338_v37  ;;  %v2420_v43 = vpack.c.bf16 %v3546_v15, %v3542_v42  ;;  %v2339_v53 = vsub.f32 %v4744_v1, %v2304_v61 }
 0x390   : > { %v2340_v55 = vsub.f32 %v4749_v31, %v2304_v61 }
 0x391   : > { %2485 = vmatprep.mubr.bf16.mxu1 %v2420_v43  ;;  %3555 = vpow2.f32 %v2389_v14  ;;  %v2393_v33 = vmul.f32 1.442695, %v2339_v53 }
 0x392   : > { %v2395_v57 = vmul.f32 1.442695, %v2340_v55  ;;  %3557 = vpow2.f32 %v2391_v11 }
 0x393   : > { %v3548_v38 = vpop.eup %3547  ;;  %3559 = vpow2.f32 %v2393_v33 }
 0x394   : > { %2486 = vmatmul.mubr.bf16.gmra.mrb[148].mxu1 %v2419_v28  ;;  %v2307_v46 = vpop.xlane.xlu0 %2306  ;;  %v3550_v8 = vpop.eup %3549  ;;  %3561 = vpow2.f32 %v2395_v57 }
 0x395   : > { %v2341_v22 = vsub.f32 %v4757_v47, %v2307_v46  ;;  %v2342_v9 = vsub.f32 %v4759_v21, %v2307_v46  ;;  %v3552_v50 = vpop.eup %3551 }
 0x396   : > { %v3554_v12 = vpop.eup %3553  ;;  %v2421_v36 = vpack.c.bf16 %v3552_v50, %v3548_v38 }
 0x397   : > { %v2397_v1 = vmul.f32 1.442695, %v2341_v22  ;;  %v2399_v31 = vmul.f32 1.442695, %v2342_v9  ;;  %v2422_v5 = vpack.c.bf16 %v3554_v12, %v3550_v8 }
 0x398   : > { %v2310_v0 = vpop.xlane.xlu1 %2309 }
 0x399   : > { %v2343_v56 = vsub.f32 %v4764_v13, %v2310_v0  ;;  %v2344_v25 = vsub.f32 %v4769_v48, %v2310_v0  ;;  %2493 = vmatprep.mubr.bf16.mxu1 %v2422_v5  ;;  %3563 = vpow2.f32 %v2397_v1 }
 0x39a   : > { %3565 = vpow2.f32 %v2399_v31 }
 0x39b   : > { %v2401_v17 = vmul.f32 1.442695, %v2343_v56  ;;  %v2403_v4 = vmul.f32 1.442695, %v2344_v25  ;;  %v3556_v27 = vpop.eup %3555 }
 0x39c   : > { %2494 = vmatmul.mubr.bf16.gmra.mrb[152].mxu1 %v2421_v36  ;;  %v2313_v47 = vpop.xlane.xlu0 %2312  ;;  %v3558_v21 = vpop.eup %3557 }
 0x39d   : > { %3567 = vpow2.f32 %v2401_v17  ;;  %v2345_v24 = vsub.f32 %v4777_v32, %v2313_v47  ;;  %v2346_v44 = vsub.f32 %v4779_v52, %v2313_v47  ;;  %v3560_v6 = vpop.eup %3559 }
 0x39e   : > { %3569 = vpow2.f32 %v2403_v4  ;;  %v3562_v20 = vpop.eup %3561  ;;  %v2423_v62 = vpack.c.bf16 %v3560_v6, %v3556_v27 }
 0x39f   : > { %v2405_v13 = vmul.f32 1.442695, %v2345_v24  ;;  %v2407_v48 = vmul.f32 1.442695, %v2346_v44  ;;  %v2424_v45 = vpack.c.bf16 %v3562_v20, %v3558_v21 }
 0x3a0   : > { %v2316_v35 = vpop.xlane.xlu1 %2315 }
 0x3a1   : > { %v2347_v34 = vsub.f32 %v4784_v54, %v2316_v35  ;;  %v2348_v18 = vsub.f32 %v4789_v60, %v2316_v35  ;;  %2501 = vmatprep.mubr.bf16.mxu1 %v2424_v45  ;;  %3571 = vpow2.f32 %v2405_v13 }
 0x3a2   : > { %3573 = vpow2.f32 %v2407_v48 }
 0x3a3   : > { %v2409_v23 = vmul.f32 1.442695, %v2347_v34  ;;  %v2411_v19 = vmul.f32 1.442695, %v2348_v18  ;;  %v3564_v32 = vpop.eup %3563 }
 0x3a4   : > { %2502 = vmatmul.mubr.bf16.gmra.mrb[156].mxu1 %v2423_v62  ;;  %v3566_v52 = vpop.eup %3565 }
 0x3a5   : > { %3575 = vpow2.f32 %v2409_v23 }
 0x3a6   : > { %3577 = vpow2.f32 %v2411_v19 }
 0x3a7   : > { %v3568_v49 = vpop.eup %3567 }
 0x3a8   : > { %v3570_v26 = vpop.eup %3569  ;;  %v2425_v29 = vpack.c.bf16 %v3568_v49, %v3564_v32 }
 0x3a9   : > { %v2426_v40 = vpack.c.bf16 %v3570_v26, %v3566_v52 }
 0x3ab   : > { %2509 = vmatprep.mubr.bf16.mxu1 %v2426_v40  ;;  %v3572_v30 = vpop.eup %3571 }
 0x3ac   : > { %2510 = vmatmul.mubr.bf16.gmra.mrb[160].mxu1 %v2425_v29  ;;  %v3574_v54 = vpop.eup %3573 }
 0x3af   : > { %v3576_v7 = vpop.eup %3575 }
 0x3b0   : > { %v3578_v60 = vpop.eup %3577  ;;  %v2427_v39 = vpack.c.bf16 %v3576_v7, %v3572_v30 }
 0x3b1   : > { %v2428_v59 = vpack.c.bf16 %v3578_v60, %v3574_v54 }
 0x3b3   : > { %2517 = vmatprep.mubr.bf16.mxu1 %v2428_v59 }
 0x3b4   : > { %2518 = vmatmul.mubr.bf16.gmra.mrb[164].mxu1 %v2427_v39 }
 0x3cf   : > { %v3040_v63 = vpop.f32.mrb[72].mxu1 }
 0x3d0   : > { %v3041_v16 = vpop.f32.mrb[73].mxu1 }
 0x3d1   : > { %v4888_v3 = vadd.f32 %v3041_v16, %v3040_v63  ;;  %v3043_v2 = vpop.f32.mrb[74].mxu1 }
 0x3d2   : > { %v3044_v41 = vpop.f32.mrb[75].mxu1 }
 0x3d3   : > { %3579 = vrcp.f32 %v4888_v3  ;;  %v4891_v42 = vadd.f32 %v3044_v41, %v3043_v2 }
 0x3d5   : > { %3581 = vrcp.f32 %v4891_v42 }
 0x3d7   : > { %v3046_v51 = vpop.f32.mrb[76].mxu1 }
 0x3d8   : > { %v3047_v10 = vpop.f32.mrb[77].mxu1 }
 0x3d9   : > { %v4894_v58 = vadd.f32 %v3047_v10, %v3046_v51  ;;  %v3049_v37 = vpop.f32.mrb[78].mxu1 }
 0x3da   : > { %v3050_v15 = vpop.f32.mrb[79].mxu1 }
 0x3db   : > { %3583 = vrcp.f32 %v4894_v58  ;;  %v4897_v28 = vadd.f32 %v3050_v15, %v3049_v37 }
 0x3dd   : > { %v3580_v14 = vpop.eup %3579  ;;  %3585 = vrcp.f32 %v4897_v28 }
 0x3de   : > { %1580 = vperm.xlu0 %3353, %v3580_v14  }
 0x3df   : > { %v3582_v11 = vpop.eup %3581  ;;  %v3052_v61 = vpop.f32.mrb[80].mxu1 }
 0x3e0   : > { %v3053_v43 = vpop.f32.mrb[81].mxu1  ;;  %1585 = vperm.xlu1 %3354, %v3582_v11  }
 0x3e1   : > { %v4900_v53 = vadd.f32 %v3053_v43, %v3052_v61  ;;  %v3055_v55 = vpop.f32.mrb[82].mxu1 }
 0x3e2   : > { %v3056_v33 = vpop.f32.mrb[83].mxu1 }
 0x3e3   : > { %3587 = vrcp.f32 %v4900_v53  ;;  %v4903_v57 = vadd.f32 %v3056_v33, %v3055_v55 }
 0x3e5   : > { %v3584_v38 = vpop.eup %3583  ;;  %3589 = vrcp.f32 %v4903_v57 }
 0x3e6   : > { %1590 = vperm.xlu1 %3354, %v3584_v38  }
 0x3e7   : > { %v3058_v46 = vpop.f32.mrb[84].mxu1  ;;  %v3586_v22 = vpop.eup %3585 }
 0x3e8   : > { %v3059_v8 = vpop.f32.mrb[85].mxu1 }
 0x3e9   : > { %v4906_v9 = vadd.f32 %v3059_v8, %v3058_v46  ;;  %v3061_v50 = vpop.f32.mrb[86].mxu1 }
 0x3ea   : > { %v3062_v12 = vpop.f32.mrb[87].mxu1  ;;  %1595 = vperm.xlu1 %3354, %v3586_v22  }
 0x3eb   : > { %3591 = vrcp.f32 %v4906_v9  ;;  %v4909_v1 = vadd.f32 %v3062_v12, %v3061_v50 }
 0x3ed   : > { %v3588_v36 = vpop.eup %3587  ;;  %3593 = vrcp.f32 %v4909_v1 }
 0x3ee   : > { %1600 = vperm.xlu1 %3354, %v3588_v36  }
 0x3ef   : > { %v3064_v31 = vpop.f32.mrb[88].mxu1  ;;  %v3590_v5 = vpop.eup %3589 }
 0x3f0   : > { %v3065_v0 = vpop.f32.mrb[89].mxu1 }
 0x3f1   : > { %v4912_v56 = vadd.f32 %v3065_v0, %v3064_v31  ;;  %v3067_v25 = vpop.f32.mrb[90].mxu1 }
 0x3f2   : > { %v3068_v17 = vpop.f32.mrb[91].mxu1  ;;  %1605 = vperm.xlu1 %3354, %v3590_v5  }
 0x3f3   : > { %3595 = vrcp.f32 %v4912_v56  ;;  %v4915_v4 = vadd.f32 %v3068_v17, %v3067_v25 }
 0x3f5   : > { %v3592_v27 = vpop.eup %3591  ;;  %3597 = vrcp.f32 %v4915_v4 }
 0x3f6   : > { %1610 = vperm.xlu1 %3354, %v3592_v27  }
 0x3f7   : > { %v3070_v47 = vpop.f32.mrb[92].mxu1  ;;  %v3594_v24 = vpop.eup %3593 }
 0x3f8   : > { %v3071_v21 = vpop.f32.mrb[93].mxu1 }
 0x3f9   : > { %v4918_v44 = vadd.f32 %v3071_v21, %v3070_v47  ;;  %v3073_v6 = vpop.f32.mrb[94].mxu1 }
 0x3fa   : > { %v3074_v20 = vpop.f32.mrb[95].mxu1  ;;  %1615 = vperm.xlu1 %3354, %v3594_v24  }
 0x3fb   : > { %5566 = vst [vmem:[#allocation9_spill] sm:$0xff] %v4918_v44  ;;  %3599 = vrcp.f32 %v4918_v44  ;;  %v4921_v13 = vadd.f32 %v3074_v20, %v3073_v6 }
 0x3fd   : > { %5567 = vst [vmem:[#allocation26_spill] sm:$0xff] %v4921_v13  ;;  %v3596_v62 = vpop.eup %3595  ;;  %3601 = vrcp.f32 %v4921_v13 }
 0x3fe   : > { %1620 = vperm.xlu1 %3354, %v3596_v62  }
 0x3ff   : > { %v3598_v48 = vpop.eup %3597  ;;  %v3076_v35 = vpop.f32.mrb[96].mxu1 }
 0x400   : > { %v3077_v45 = vpop.f32.mrb[97].mxu1  ;;  %1625 = vperm.xlu0 %3353, %v3598_v48  }
 0x401   : > { %v4924_v34 = vadd.f32 %v3077_v45, %v3076_v35  ;;  %v3079_v18 = vpop.f32.mrb[98].mxu1 }
 0x402   : > { %v3080_v23 = vpop.f32.mrb[99].mxu1 }
 0x403   : > { %5568 = vst [vmem:[#allocation24_spill] sm:$0xff] %v4924_v34  ;;  %3603 = vrcp.f32 %v4924_v34  ;;  %v4927_v19 = vadd.f32 %v3080_v23, %v3079_v18 }
 0x405   : > { %5569 = vst [vmem:[#allocation10_spill] sm:$0xff] %v4927_v19  ;;  %v3600_v32 = vpop.eup %3599  ;;  %3605 = vrcp.f32 %v4927_v19 }
 0x406   : > { %1630 = vperm.xlu1 %3354, %v3600_v32  }
 0x407   : > { %v3602_v52 = vpop.eup %3601  ;;  %v3082_v49 = vpop.f32.mrb[100].mxu1 }
 0x408   : > { %v3083_v26 = vpop.f32.mrb[101].mxu1  ;;  %1635 = vperm.xlu0 %3353, %v3602_v52  }
 0x409   : > { %v4930_v29 = vadd.f32 %v3083_v26, %v3082_v49  ;;  %v3085_v40 = vpop.f32.mrb[102].mxu1 }
 0x40a   : > { %v3086_v30 = vpop.f32.mrb[103].mxu1 }
 0x40b   : > { %5570 = vst [vmem:[#allocation25_spill] sm:$0xff] %v4930_v29  ;;  %3607 = vrcp.f32 %v4930_v29  ;;  %v4933_v54 = vadd.f32 %v3086_v30, %v3085_v40 }
 0x40d   : > { %5571 = vst [vmem:[#allocation23_spill] sm:$0xff] %v4933_v54  ;;  %v3604_v7 = vpop.eup %3603  ;;  %3609 = vrcp.f32 %v4933_v54 }
 0x40e   : > { %1640 = vperm.xlu1 %3354, %v3604_v7  }
 0x40f   : > { %v3606_v60 = vpop.eup %3605  ;;  %v3136_v39 = vpop.f32.mrb[104].mxu1 }
 0x410   : > { %v3137_v59 = vpop.f32.mrb[105].mxu1  ;;  %1645 = vperm.xlu0 %3353, %v3606_v60  }
 0x411   : > { %v4936_v63 = vadd.f32 %v3137_v59, %v3136_v39  ;;  %v3139_v16 = vpop.f32.mrb[106].mxu1 }
 0x412   : > { %v3140_v2 = vpop.f32.mrb[107].mxu1 }
 0x413   : > { %3611 = vrcp.f32 %v4936_v63  ;;  %v4939_v41 = vadd.f32 %v3140_v2, %v3139_v16 }
 0x415   : > { %v3608_v51 = vpop.eup %3607  ;;  %3613 = vrcp.f32 %v4939_v41 }
 0x416   : > { %1650 = vperm.xlu1 %3354, %v3608_v51  }
 0x417   : > { %v3610_v10 = vpop.eup %3609  ;;  %v3142_v37 = vpop.f32.mrb[108].mxu1 }
 0x418   : > { %v3143_v15 = vpop.f32.mrb[109].mxu1  ;;  %1655 = vperm.xlu0 %3353, %v3610_v10  }
 0x419   : > { %v4942_v14 = vadd.f32 %v3143_v15, %v3142_v37  ;;  %v3145_v11 = vpop.f32.mrb[110].mxu1 }
 0x41a   : > { %v3146_v61 = vpop.f32.mrb[111].mxu1 }
 0x41b   : > { %3615 = vrcp.f32 %v4942_v14  ;;  %v4945_v43 = vadd.f32 %v3146_v61, %v3145_v11 }
 0x41d   : > { %v3612_v55 = vpop.eup %3611  ;;  %3617 = vrcp.f32 %v4945_v43 }
 0x41e   : > { %2062 = vperm.xlu1 %3354, %v3612_v55  }
 0x41f   : > { %v3614_v33 = vpop.eup %3613  ;;  %v3148_v38 = vpop.f32.mrb[112].mxu1 }
 0x420   : > { %v3149_v46 = vpop.f32.mrb[113].mxu1  ;;  %2067 = vperm.xlu0 %3353, %v3614_v33  }
 0x421   : > { %v4948_v8 = vadd.f32 %v3149_v46, %v3148_v38  ;;  %v3151_v22 = vpop.f32.mrb[114].mxu1 }
 0x422   : > { %v3152_v50 = vpop.f32.mrb[115].mxu1 }
 0x423   : > { %3619 = vrcp.f32 %v4948_v8  ;;  %v4951_v12 = vadd.f32 %v3152_v50, %v3151_v22 }
 0x425   : > { %v3616_v36 = vpop.eup %3615  ;;  %3621 = vrcp.f32 %v4951_v12 }
 0x426   : > { %2072 = vperm.xlu1 %3354, %v3616_v36  }
 0x427   : > { %v3618_v31 = vpop.eup %3617  ;;  %v3154_v0 = vpop.f32.mrb[116].mxu1 }
 0x428   : > { %v3155_v5 = vpop.f32.mrb[117].mxu1  ;;  %2077 = vperm.xlu0 %3353, %v3618_v31  }
 0x429   : > { %v4954_v25 = vadd.f32 %v3155_v5, %v3154_v0  ;;  %v3157_v17 = vpop.f32.mrb[118].mxu1 }
 0x42a   : > { %v3158_v27 = vpop.f32.mrb[119].mxu1 }
 0x42b   : > { %3623 = vrcp.f32 %v4954_v25  ;;  %v4957_v47 = vadd.f32 %v3158_v27, %v3157_v17 }
 0x42d   : > { %v3620_v21 = vpop.eup %3619  ;;  %3625 = vrcp.f32 %v4957_v47 }
 0x42e   : > { %2082 = vperm.xlu1 %3354, %v3620_v21  }
 0x42f   : > { %v3622_v24 = vpop.eup %3621  ;;  %v3160_v6 = vpop.f32.mrb[120].mxu1 }
 0x430   : > { %v3161_v20 = vpop.f32.mrb[121].mxu1  ;;  %2087 = vperm.xlu0 %3353, %v3622_v24  }
 0x431   : > { %v4960_v62 = vadd.f32 %v3161_v20, %v3160_v6  ;;  %v3163_v48 = vpop.f32.mrb[122].mxu1 }
 0x432   : > { %v3164_v35 = vpop.f32.mrb[123].mxu1 }
 0x433   : > { %3627 = vrcp.f32 %v4960_v62  ;;  %v4963_v45 = vadd.f32 %v3164_v35, %v3163_v48 }
 0x435   : > { %v3624_v18 = vpop.eup %3623  ;;  %3629 = vrcp.f32 %v4963_v45 }
 0x436   : > { %2092 = vperm.xlu1 %3354, %v3624_v18  }
 0x437   : > { %v3626_v23 = vpop.eup %3625  ;;  %v3166_v32 = vpop.f32.mrb[124].mxu1 }
 0x438   : > { %v3167_v52 = vpop.f32.mrb[125].mxu1  ;;  %2097 = vperm.xlu0 %3353, %v3626_v23  }
 0x439   : > { %v4966_v49 = vadd.f32 %v3167_v52, %v3166_v32  ;;  %v3169_v26 = vpop.f32.mrb[126].mxu1 }
 0x43a   : > { %v3170_v40 = vpop.f32.mrb[127].mxu1 }
 0x43b   : > { %3631 = vrcp.f32 %v4966_v49  ;;  %v4969_v30 = vadd.f32 %v3170_v40, %v3169_v26 }
 0x43d   : > { %v3628_v7 = vpop.eup %3627  ;;  %3633 = vrcp.f32 %v4969_v30 }
 0x43e   : > { %2102 = vperm.xlu1 %3354, %v3628_v7  }
 0x43f   : > { %v3630_v60 = vpop.eup %3629  ;;  %v3172_v39 = vpop.f32.mrb[128].mxu1 }
 0x440   : > { %v3173_v59 = vpop.f32.mrb[129].mxu1  ;;  %2107 = vperm.xlu0 %3353, %v3630_v60  }
 0x441   : > { %v4972_v16 = vadd.f32 %v3173_v59, %v3172_v39  ;;  %v3175_v2 = vpop.f32.mrb[130].mxu1 }
 0x442   : > { %v3176_v51 = vpop.f32.mrb[131].mxu1 }
 0x443   : > { %3635 = vrcp.f32 %v4972_v16  ;;  %v4975_v10 = vadd.f32 %v3176_v51, %v3175_v2 }
 0x445   : > { %v3632_v37 = vpop.eup %3631  ;;  %3637 = vrcp.f32 %v4975_v10 }
 0x446   : > { %2112 = vperm.xlu1 %3354, %v3632_v37  }
 0x447   : > { %v3634_v15 = vpop.eup %3633  ;;  %v3178_v11 = vpop.f32.mrb[132].mxu1 }
 0x448   : > { %v3179_v61 = vpop.f32.mrb[133].mxu1  ;;  %2117 = vperm.xlu0 %3353, %v3634_v15  }
 0x449   : > { %v4978_v55 = vadd.f32 %v3179_v61, %v3178_v11  ;;  %v3181_v33 = vpop.f32.mrb[134].mxu1 }
 0x44a   : > { %v3182_v38 = vpop.f32.mrb[135].mxu1 }
 0x44b   : > { %3639 = vrcp.f32 %v4978_v55  ;;  %v4981_v46 = vadd.f32 %v3182_v38, %v3181_v33 }
 0x44d   : > { %v3636_v22 = vpop.eup %3635  ;;  %3641 = vrcp.f32 %v4981_v46 }
 0x44e   : > { %2122 = vperm.xlu1 %3354, %v3636_v22  }
 0x44f   : > { %v3638_v50 = vpop.eup %3637  ;;  %v3232_v36 = vpop.f32.mrb[136].mxu1 }
 0x450   : > { %v3233_v31 = vpop.f32.mrb[137].mxu1  ;;  %2127 = vperm.xlu0 %3353, %v3638_v50  }
 0x451   : > { %v4984_v0 = vadd.f32 %v3233_v31, %v3232_v36  ;;  %v3235_v5 = vpop.f32.mrb[138].mxu1 }
 0x452   : > { %v3236_v17 = vpop.f32.mrb[139].mxu1 }
 0x453   : > { %3643 = vrcp.f32 %v4984_v0  ;;  %v4987_v27 = vadd.f32 %v3236_v17, %v3235_v5 }
 0x455   : > { %v3640_v21 = vpop.eup %3639  ;;  %3645 = vrcp.f32 %v4987_v27 }
 0x456   : > { %2132 = vperm.xlu1 %3354, %v3640_v21  }
 0x457   : > { %v3642_v24 = vpop.eup %3641  ;;  %v3238_v6 = vpop.f32.mrb[140].mxu1 }
 0x458   : > { %v3239_v20 = vpop.f32.mrb[141].mxu1  ;;  %2137 = vperm.xlu0 %3353, %v3642_v24  }
 0x459   : > { %v4990_v48 = vadd.f32 %v3239_v20, %v3238_v6  ;;  %v3241_v35 = vpop.f32.mrb[142].mxu1 }
 0x45a   : > { %v3242_v18 = vpop.f32.mrb[143].mxu1 }
 0x45b   : > { %3647 = vrcp.f32 %v4990_v48  ;;  %v4993_v23 = vadd.f32 %v3242_v18, %v3241_v35 }
 0x45d   : > { %v3644_v32 = vpop.eup %3643  ;;  %3649 = vrcp.f32 %v4993_v23 }
 0x45e   : > { %2544 = vperm.xlu1 %3354, %v3644_v32  }
 0x45f   : > { %v3646_v52 = vpop.eup %3645  ;;  %v3244_v26 = vpop.f32.mrb[144].mxu1 }
 0x460   : > { %v3245_v40 = vpop.f32.mrb[145].mxu1  ;;  %2549 = vperm.xlu0 %3353, %v3646_v52   ;;  %v5001_v51 = vpop.permute.xlu1 %1585 }
 0x461   : > { %v4996_v7 = vadd.f32 %v3245_v40, %v3244_v26  ;;  %v3247_v60 = vpop.f32.mrb[146].mxu1 }
 0x462   : > { %v3248_v39 = vpop.f32.mrb[147].mxu1 }
 0x463   : > { %3651 = vrcp.f32 %v4996_v7  ;;  %v4999_v59 = vadd.f32 %v3248_v39, %v3247_v60 }
 0x465   : > { %v3648_v2 = vpop.eup %3647  ;;  %3653 = vrcp.f32 %v4999_v59  ;;  %v5004_v61 = vpop.permute.xlu1 %1590 }
 0x466   : > { %2554 = vperm.xlu1 %3354, %v3648_v2  }
 0x467   : > { %v3650_v37 = vpop.eup %3649  ;;  %v3250_v15 = vpop.f32.mrb[148].mxu1 }
 0x468   : > { %v3251_v11 = vpop.f32.mrb[149].mxu1  ;;  %2559 = vperm.xlu0 %3353, %v3650_v37  }
 0x469   : > { %v5006_v33 = vadd.f32 %v3251_v11, %v3250_v15  ;;  %v3253_v38 = vpop.f32.mrb[150].mxu1  ;;  %v5012_v5 = vpop.permute.xlu1 %1595 }
 0x46a   : > { %v3254_v22 = vpop.f32.mrb[151].mxu1 }
 0x46b   : > { %3655 = vrcp.f32 %v5006_v33  ;;  %v5009_v50 = vadd.f32 %v3254_v22, %v3253_v38 }
 0x46d   : > { %v3652_v36 = vpop.eup %3651  ;;  %3657 = vrcp.f32 %v5009_v50  ;;  %v5019_v32 = vpop.permute.xlu1 %1600 }
 0x46e   : > { %2564 = vperm.xlu1 %3354, %v3652_v36  }
 0x46f   : > { %v3654_v31 = vpop.eup %3653  ;;  %v3256_v17 = vpop.f32.mrb[152].mxu1 }
 0x470   : > { %v3257_v21 = vpop.f32.mrb[153].mxu1  ;;  %2569 = vperm.xlu0 %3353, %v3654_v31  }
 0x471   : > { %v5014_v24 = vadd.f32 %v3257_v21, %v3256_v17  ;;  %v3259_v6 = vpop.f32.mrb[154].mxu1  ;;  %v5024_v37 = vpop.permute.xlu1 %1605 }
 0x472   : > { %v3260_v20 = vpop.f32.mrb[155].mxu1 }
 0x473   : > { %3659 = vrcp.f32 %v5014_v24  ;;  %v5017_v35 = vadd.f32 %v3260_v20, %v3259_v6 }
 0x475   : > { %v3656_v18 = vpop.eup %3655  ;;  %3661 = vrcp.f32 %v5017_v35  ;;  %v5030_v31 = vpop.permute.xlu1 %1610 }
 0x476   : > { %2574 = vperm.xlu1 %3354, %v3656_v18  }
 0x477   : > { %v3658_v52 = vpop.eup %3657  ;;  %v3262_v26 = vpop.f32.mrb[156].mxu1 }
 0x478   : > { %v3263_v40 = vpop.f32.mrb[157].mxu1  ;;  %2579 = vperm.xlu0 %3353, %v3658_v52  }
 0x479   : > { %v5022_v60 = vadd.f32 %v3263_v40, %v3262_v26  ;;  %v3265_v39 = vpop.f32.mrb[158].mxu1  ;;  %v5038_v26 = vpop.permute.xlu1 %1615 }
 0x47a   : > { %v3266_v2 = vpop.f32.mrb[159].mxu1 }
 0x47b   : > { %3663 = vrcp.f32 %v5022_v60  ;;  %v5027_v15 = vadd.f32 %v3266_v2, %v3265_v39 }
 0x47d   : > { %v3660_v11 = vpop.eup %3659  ;;  %3665 = vrcp.f32 %v5027_v15 }
 0x47e   : > { %2584 = vperm.xlu1 %3354, %v3660_v11  }
 0x47f   : > { %v3662_v38 = vpop.eup %3661  ;;  %v3268_v22 = vpop.f32.mrb[160].mxu1 }
 0x480   : > { %v3269_v36 = vpop.f32.mrb[161].mxu1  ;;  %2589 = vperm.xlu0 %3353, %v3662_v38  }
 0x481   : > { %v5032_v17 = vadd.f32 %v3269_v36, %v3268_v22  ;;  %v3271_v21 = vpop.f32.mrb[162].mxu1  ;;  %v5042_v22 = vpop.permute.xlu0 %1580 }
 0x482   : > { %v3272_v6 = vpop.f32.mrb[163].mxu1 }
 0x483   : > { %3667 = vrcp.f32 %v5032_v17  ;;  %v5035_v20 = vadd.f32 %v3272_v6, %v3271_v21  ;;  %v5047_v6 = vpop.permute.xlu1 %1620 }
 0x485   : > { %v3664_v18 = vpop.eup %3663  ;;  %3669 = vrcp.f32 %v5035_v20  ;;  %v5050_v54 = vpop.permute.xlu0 %1625 }
 0x486   : > { %2594 = vperm.xlu1 %3354, %v3664_v18  }
 0x487   : > { %v3666_v52 = vpop.eup %3665  ;;  %v3274_v40 = vpop.f32.mrb[164].mxu1 }
 0x488   : > { %2599 = vperm.xlu0 %3353, %v3666_v52   ;;  %v3275_v39 = vpop.f32.mrb[165].mxu1  ;;  %v5052_v52 = vpop.permute.xlu1 %1630 }
 0x489   : > { %v5040_v2 = vadd.f32 %v3275_v39, %v3274_v40  ;;  %v3277_v11 = vpop.f32.mrb[166].mxu1  ;;  %v5054_v40 = vpop.permute.xlu0 %1635 }
 0x48a   : > { %v3278_v38 = vpop.f32.mrb[167].mxu1 }
 0x48b   : > { %3671 = vrcp.f32 %v5040_v2  ;;  %v5045_v36 = vadd.f32 %v3278_v38, %v3277_v11 }
 0x48d   : > { %v3668_v21 = vpop.eup %3667  ;;  %3673 = vrcp.f32 %v5045_v36  ;;  %v5056_v29 = vpop.permute.xlu1 %1640 }
 0x48e   : > { %2604 = vperm.xlu1 %3354, %v3668_v21   ;;  %5572 = vst [vmem:[#allocation11_spill] sm:$0xff] %v5056_v29 }
 0x48f   : > { %v3670_v18 = vpop.eup %3669  ;;  %v5058_v38 = vpop.permute.xlu0 %1645 }
 0x490   : > { %2609 = vperm.xlu0 %3353, %v3670_v18   ;;  %5573 = vst [vmem:[#allocation28_spill] sm:$0xff] %v5058_v38 }
 0x495   : > { %v3672_v39 = vpop.eup %3671  ;;  %v5060_v19 = vpop.permute.xlu1 %1650 }
 0x496   : > { %2614 = vperm.xlu1 %3354, %v3672_v39  }
 0x497   : > { %v3674_v11 = vpop.eup %3673  ;;  %v5062_v34 = vpop.permute.xlu0 %1655 }
 0x498   : > { %2619 = vperm.xlu0 %3353, %v3674_v11   ;;  %5574 = vst [vmem:[#allocation27_spill] sm:$0xff] %v5062_v34 }
 0x49d   : > { %v2063_v21 = vpop.permute.xlu1 %2062 }
 0x49e   : > { %v2140_v13 = vmul.f32 %v4936_v63, %v2063_v21 }
 0x49f   : > { %v2068_v18 = vpop.permute.xlu0 %2067 }
 0x4a0   : > { %v2141_v44 = vmul.f32 %v4939_v41, %v2068_v18  ;;  %2654 = vrot.lane.b32.xlu1 %v2140_v13, %s3686_s11 }
 0x4a2   : > { %2656 = vrot.lane.b32.xlu0 %v2141_v44, %s3686_s11 }
 0x4a5   : > { %v2073_v39 = vpop.permute.xlu1 %2072 }
 0x4a6   : > { %v2142_v29 = vmul.f32 %v4942_v14, %v2073_v39 }
 0x4a7   : > { %v2078_v38 = vpop.permute.xlu0 %2077 }
 0x4a8   : > { %v2143_v11 = vmul.f32 %v4945_v43, %v2078_v38  ;;  %2658 = vrot.lane.b32.xlu1 %v2142_v29, %s3686_s11 }
 0x4aa   : > { %2660 = vrot.lane.b32.xlu0 %v2143_v11, %s3686_s11 }
 0x4ad   : > { %v2083_v34 = vpop.permute.xlu1 %2082 }
 0x4ae   : > { %v2144_v63 = vmul.f32 %v4948_v8, %v2083_v34 }
 0x4af   : > { %v2088_v21 = vpop.permute.xlu0 %2087 }
 0x4b0   : > { %v2145_v41 = vmul.f32 %v4951_v12, %v2088_v21  ;;  %2662 = vrot.lane.b32.xlu1 %v2144_v63, %s3686_s11 }
 0x4b2   : > { %2664 = vrot.lane.b32.xlu0 %v2145_v41, %s3686_s11 }
 0x4b5   : > { %v2093_v44 = vpop.permute.xlu1 %2092 }
 0x4b6   : > { %v2146_v13 = vmul.f32 %v4954_v25, %v2093_v44 }
 0x4b7   : > { %v2098_v14 = vpop.permute.xlu0 %2097 }
 0x4b8   : > { %v2147_v43 = vmul.f32 %v4957_v47, %v2098_v14  ;;  %2666 = vrot.lane.b32.xlu1 %v2146_v13, %s3686_s11 }
 0x4ba   : > { %2668 = vrot.lane.b32.xlu0 %v2147_v43, %s3686_s11 }
 0x4bd   : > { %v2103_v29 = vpop.permute.xlu1 %2102 }
 0x4be   : > { %v2148_v34 = vmul.f32 %v4960_v62, %v2103_v29 }
 0x4bf   : > { %v2108_v8 = vpop.permute.xlu0 %2107 }
 0x4c0   : > { %v2149_v12 = vmul.f32 %v4963_v45, %v2108_v8  ;;  %2670 = vrot.lane.b32.xlu1 %v2148_v34, %s3686_s11 }
 0x4c2   : > { %2672 = vrot.lane.b32.xlu0 %v2149_v12, %s3686_s11 }
 0x4c5   : > { %v2113_v38 = vpop.permute.xlu1 %2112 }
 0x4c6   : > { %v2150_v25 = vmul.f32 %v4966_v49, %v2113_v38 }
 0x4c7   : > { %v2118_v18 = vpop.permute.xlu0 %2117 }
 0x4c8   : > { %v2151_v47 = vmul.f32 %v4969_v30, %v2118_v18  ;;  %2674 = vrot.lane.b32.xlu1 %v2150_v25, %s3686_s11 }
 0x4ca   : > { %2676 = vrot.lane.b32.xlu0 %v2151_v47, %s3686_s11 }
 0x4cd   : > { %v2123_v39 = vpop.permute.xlu1 %2122 }
 0x4ce   : > { %v2152_v62 = vmul.f32 %v4972_v16, %v2123_v39 }
 0x4cf   : > { %v2128_v11 = vpop.permute.xlu0 %2127 }
 0x4d0   : > { %v2153_v45 = vmul.f32 %v4975_v10, %v2128_v11  ;;  %2678 = vrot.lane.b32.xlu1 %v2152_v62, %s3686_s11 }
 0x4d2   : > { %2680 = vrot.lane.b32.xlu0 %v2153_v45, %s3686_s11 }
 0x4d5   : > { %v2133_v63 = vpop.permute.xlu1 %2132 }
 0x4d6   : > { %v2154_v49 = vmul.f32 %v4978_v55, %v2133_v63 }
 0x4d7   : > { %v2138_v21 = vpop.permute.xlu0 %2137 }
 0x4d8   : > { %v2155_v30 = vmul.f32 %v4981_v46, %v2138_v21  ;;  %2682 = vrot.lane.b32.xlu1 %v2154_v49, %s3686_s11 }
 0x4da   : > { %2684 = vrot.lane.b32.xlu0 %v2155_v30, %s3686_s11 }
 0x4dd   : > { %v2545_v41 = vpop.permute.xlu1 %2544 }
 0x4de   : > { %v2622_v16 = vmul.f32 %v4984_v0, %v2545_v41 }
 0x4df   : > { %v2550_v44 = vpop.permute.xlu0 %2549 }
 0x4e0   : > { %v2623_v10 = vmul.f32 %v4987_v27, %v2550_v44  ;;  %2718 = vrot.lane.b32.xlu1 %v2622_v16, %s3687_s13 }
 0x4e2   : > { %2720 = vrot.lane.b32.xlu0 %v2623_v10, %s3687_s13 }
 0x4e5   : > { %v2555_v13 = vpop.permute.xlu1 %2554 }
 0x4e6   : > { %v2624_v55 = vmul.f32 %v4990_v48, %v2555_v13 }
 0x4e7   : > { %v2560_v14 = vpop.permute.xlu0 %2559 }
 0x4e8   : > { %v2625_v46 = vmul.f32 %v4993_v23, %v2560_v14  ;;  %2722 = vrot.lane.b32.xlu1 %v2624_v55, %s3687_s13  ;;  %v1658_v14 = vmul.f32 %v4888_v3, %v5042_v22 }
 0x4ea   : > { %2724 = vrot.lane.b32.xlu0 %v2625_v46, %s3687_s13 }
 0x4ed   : > { %v2565_v43 = vpop.permute.xlu1 %2564 }
 0x4ee   : > { %v2626_v0 = vmul.f32 %v4996_v7, %v2565_v43  ;;  %v1659_v43 = vmul.f32 %v4891_v42, %v5001_v51  ;;  %v1661_v42 = vmul.f32 %v4897_v28, %v5012_v5  ;;  %v1663_v28 = vmul.f32 %v4903_v57, %v5024_v37 }
 0x4ef   : > { %v2570_v29 = vpop.permute.xlu0 %2569  ;;  %v1665_v57 = vmul.f32 %v4909_v1, %v5038_v26  ;;  %v1667_v1 = vmul.f32 %v4915_v4, %v5050_v54  ;;  %v5576_v4 = vld [vmem:[#allocation26_spill] sm:$0xff] }
 0x4f0   : > { %v2627_v27 = vmul.f32 %v4999_v59, %v2570_v29  ;;  %2726 = vrot.lane.b32.xlu1 %v2626_v0, %s3687_s13  ;;  %v1669_v54 = vmul.f32 %v5576_v4, %v5054_v40 }
 0x4f2   : > { %2728 = vrot.lane.b32.xlu0 %v2627_v27, %s3687_s13 }
 0x4f5   : > { %v2575_v34 = vpop.permute.xlu1 %2574 }
 0x4f6   : > { %v2628_v48 = vmul.f32 %v5006_v33, %v2575_v34 }
 0x4f7   : > { %v2580_v8 = vpop.permute.xlu0 %2579 }
 0x4f8   : > { %v2629_v23 = vmul.f32 %v5009_v50, %v2580_v8  ;;  %2730 = vrot.lane.b32.xlu1 %v2628_v48, %s3687_s13  ;;  %v1660_v48 = vmul.f32 %v4894_v58, %v5004_v61  ;;  %v1662_v58 = vmul.f32 %v4900_v53, %v5019_v32  ;;  %v1664_v53 = vmul.f32 %v4906_v9, %v5030_v31 }
 0x4f9   : > { %v1666_v9 = vmul.f32 %v4912_v56, %v5047_v6  ;;  %v5575_v56 = vld [vmem:[#allocation9_spill] sm:$0xff] }
 0x4fa   : > { %2732 = vrot.lane.b32.xlu0 %v2629_v23, %s3687_s13  ;;  %v1668_v6 = vmul.f32 %v5575_v56, %v5052_v52  ;;  %v5577_v52 = vld [vmem:[#allocation11_spill] sm:$0xff] }
 0x4fd   : > { %v2585_v12 = vpop.permute.xlu1 %2584 }
 0x4fe   : > { %v2630_v7 = vmul.f32 %v5014_v24, %v2585_v12 }
 0x4ff   : > { %v2590_v38 = vpop.permute.xlu0 %2589 }
 0x500   : > { %v2631_v59 = vmul.f32 %v5017_v35, %v2590_v38  ;;  %2734 = vrot.lane.b32.xlu1 %v2630_v7, %s3687_s13 }
 0x502   : > { %2736 = vrot.lane.b32.xlu0 %v2631_v59, %s3687_s13 }
 0x505   : > { %v2595_v25 = vpop.permute.xlu1 %2594 }
 0x506   : > { %v2632_v33 = vmul.f32 %v5022_v60, %v2595_v25 }
 0x507   : > { %v2600_v18 = vpop.permute.xlu0 %2599 }
 0x508   : > { %v2633_v50 = vmul.f32 %v5027_v15, %v2600_v18  ;;  %2738 = vrot.lane.b32.xlu1 %v2632_v33, %s3687_s13 }
 0x50a   : > { %2740 = vrot.lane.b32.xlu0 %v2633_v50, %s3687_s13 }
 0x50d   : > { %v2605_v47 = vpop.permute.xlu1 %2604 }
 0x50e   : > { %v2634_v24 = vmul.f32 %v5032_v17, %v2605_v47 }
 0x50f   : > { %v2610_v39 = vpop.permute.xlu0 %2609 }
 0x510   : > { %v2635_v35 = vmul.f32 %v5035_v20, %v2610_v39  ;;  %2742 = vrot.lane.b32.xlu1 %v2634_v24, %s3687_s13 }
 0x512   : > { %2744 = vrot.lane.b32.xlu0 %v2635_v35, %s3687_s13 }
 0x515   : > { %v2615_v62 = vpop.permute.xlu1 %2614 }
 0x516   : > { %v2636_v60 = vmul.f32 %v5040_v2, %v2615_v62 }
 0x517   : > { %v2620_v11 = vpop.permute.xlu0 %2619 }
 0x518   : > { %v2637_v15 = vmul.f32 %v5045_v36, %v2620_v11  ;;  %2746 = vrot.lane.b32.xlu1 %v2636_v60, %s3687_s13 }
 0x519   : > { %v2655_v45 = vpop.permute.xlu1 %2654 }
 0x51a   : > { %2748 = vrot.lane.b32.xlu0 %v2637_v15, %s3687_s13  ;;  %v2767_v0 = vsel %vm2766_vm4, %v1658_v14, %v2655_v45 }
 0x51b   : > { %v2657_v17 = vpop.permute.xlu0 %2656 }
 0x51c   : > { %v2768_v22 = vsel %vm2766_vm4, %v1659_v43, %v2657_v17 }
 0x51d   : > { %v2659_v63 = vpop.permute.xlu1 %2658 }
 0x51e   : > { %v2769_v51 = vsel %vm2766_vm4, %v1660_v48, %v2659_v63 }
 0x51f   : > { %v2661_v49 = vpop.permute.xlu0 %2660 }
 0x520   : > { %v2770_v12 = vsel %vm2766_vm4, %v1661_v42, %v2661_v49 }
 0x522   : > { %v2663_v20 = vpop.permute.xlu1 %2662 }
 0x523   : > { %v2771_v61 = vsel %vm2766_vm4, %v1662_v58, %v2663_v20 }
 0x524   : > { %v2665_v21 = vpop.permute.xlu0 %2664 }
 0x525   : > { %v2772_v25 = vsel %vm2766_vm4, %v1663_v28, %v2665_v21  ;;  %v5578_v21 = vld [vmem:[#allocation24_spill] sm:$0xff] }
 0x526   : > { %v1670_v40 = vmul.f32 %v5578_v21, %v5577_v52 }
 0x52a   : > { %v2667_v30 = vpop.permute.xlu1 %2666 }
 0x52b   : > { %v2773_v32 = vsel %vm2766_vm4, %v1664_v53, %v2667_v30  ;;  %v5579_v30 = vld [vmem:[#allocation28_spill] sm:$0xff] }
 0x52c   : > { %v2669_v41 = vpop.permute.xlu0 %2668 }
 0x52d   : > { %v2774_v47 = vsel %vm2766_vm4, %v1665_v57, %v2669_v41  ;;  %v5580_v41 = vld [vmem:[#allocation10_spill] sm:$0xff] }
 0x532   : > { %v2671_v16 = vpop.permute.xlu1 %2670 }
 0x533   : > { %v2775_v31 = vsel %vm2766_vm4, %v1666_v9, %v2671_v16  ;;  %v1671_v16 = vmul.f32 %v5580_v41, %v5579_v30 }
 0x534   : > { %v2673_v44 = vpop.permute.xlu0 %2672 }
 0x535   : > { %v2776_v62 = vsel %vm2766_vm4, %v1667_v1, %v2673_v44 }
 0x53a   : > { %v5128_v10 = vpop.permute.xlu1 %2674 }
 0x53b   : > { %v2777_v15 = vsel %vm2766_vm4, %v1668_v6, %v5128_v10 }
 0x53c   : > { %v5130_v2 = vpop.permute.xlu0 %2676 }
 0x53d   : > { %v2778_v63 = vsel %vm2766_vm4, %v1669_v54, %v5130_v2 }
 0x542   : > { %v5132_v36 = vpop.permute.xlu1 %2678 }
 0x543   : > { %v2779_v44 = vsel %vm2766_vm4, %v1670_v40, %v5132_v36 }
 0x544   : > { %v5134_v13 = vpop.permute.xlu0 %2680 }
 0x545   : > { %v2780_v14 = vsel %vm2766_vm4, %v1671_v16, %v5134_v13 }
 0x54a   : > { %v5136_v55 = vpop.permute.xlu1 %2682 }
 0x54c   : > { %v5141_v46 = vpop.permute.xlu0 %2684 }
 0x552   : > { %v2719_v29 = vpop.permute.xlu1 %2718 }
 0x553   : > { %v2783_v3 = vsel %vm303_vm0, %v2767_v0, %v2719_v29  ;;  %v5581_v29 = vld [vmem:[#allocation25_spill] sm:$0xff] }
 0x554   : > { %2800 = vst.msk [vmem:[%s5146_s17] sm:$0xff] %vm2799_vm5, %v2783_v3  ;;  %v2721_v27 = vpop.permute.xlu0 %2720  ;;  %v1672_v3 = vmul.f32 %v5581_v29, %v5060_v19 }
 0x555   : > { %v2784_v34 = vsel %vm303_vm0, %v2768_v22, %v2721_v27  ;;  %v5582_v22 = vld [vmem:[#allocation27_spill] sm:$0xff] }
 0x556   : > { %2801 = vst.msk [vmem:[%s5146_s17 + $0x8] sm:$0xff] %vm2799_vm5, %v2784_v34  ;;  %v5583_v27 = vld [vmem:[#allocation23_spill] sm:$0xff]  ;;  %v2781_v34 = vsel %vm2766_vm4, %v1672_v3, %v5136_v55 }
 0x557   : > { %v1673_v36 = vmul.f32 %v5583_v27, %v5582_v22 }
 0x559   : > { %v2782_v13 = vsel %vm2766_vm4, %v1673_v36, %v5141_v46 }
 0x55a   : > { %v2723_v8 = vpop.permute.xlu1 %2722 }
 0x55b   : > { %v2785_v23 = vsel %vm303_vm0, %v2769_v51, %v2723_v8 }
 0x55c   : > { %2802 = vst.msk [vmem:[%s5146_s17 + $0x10] sm:$0xff] %vm2799_vm5, %v2785_v23  ;;  %v2725_v7 = vpop.permute.xlu0 %2724 }
 0x55d   : > { %v2786_v38 = vsel %vm303_vm0, %v2770_v12, %v2725_v7 }
 0x55e   : > { %2803 = vst.msk [vmem:[%s5146_s17 + $0x18] sm:$0xff] %vm2799_vm5, %v2786_v38 }
 0x562   : > { %v2727_v5 = vpop.permute.xlu1 %2726 }
 0x563   : > { %v2787_v59 = vsel %vm303_vm0, %v2771_v61, %v2727_v5 }
 0x564   : > { %2804 = vst.msk [vmem:[%s5146_s17 + $0x20] sm:$0xff] %vm2799_vm5, %v2787_v59  ;;  %v2729_v33 = vpop.permute.xlu0 %2728 }
 0x565   : > { %v2788_v18 = vsel %vm303_vm0, %v2772_v25, %v2729_v33 }
 0x566   : > { %2805 = vst.msk [vmem:[%s5146_s17 + $0x28] sm:$0xff] %vm2799_vm5, %v2788_v18 }
 0x56a   : > { %v2731_v37 = vpop.permute.xlu1 %2730 }
 0x56b   : > { %v2789_v50 = vsel %vm303_vm0, %v2773_v32, %v2731_v37 }
 0x56c   : > { %2806 = vst.msk [vmem:[%s5146_s17 + $0x30] sm:$0xff] %vm2799_vm5, %v2789_v50  ;;  %v2733_v24 = vpop.permute.xlu0 %2732 }
 0x56d   : > { %v2790_v39 = vsel %vm303_vm0, %v2774_v47, %v2733_v24 }
 0x56e   : > { %2807 = vst.msk [vmem:[%s5146_s17 + $0x38] sm:$0xff] %vm2799_vm5, %v2790_v39 }
 0x572   : > { %v2735_v26 = vpop.permute.xlu1 %2734 }
 0x573   : > { %v2791_v35 = vsel %vm303_vm0, %v2775_v31, %v2735_v26 }
 0x574   : > { %2808 = vst.msk [vmem:[%s5146_s17 + $0x40] sm:$0xff] %vm2799_vm5, %v2791_v35  ;;  %v2737_v60 = vpop.permute.xlu0 %2736 }
 0x575   : > { %v2792_v11 = vsel %vm303_vm0, %v2776_v62, %v2737_v60 }
 0x576   : > { %2809 = vst.msk [vmem:[%s5146_s17 + $0x48] sm:$0xff] %vm2799_vm5, %v2792_v11 }
 0x57a   : > { %v2739_v45 = vpop.permute.xlu1 %2738 }
 0x57b   : > { %v2793_v17 = vsel %vm303_vm0, %v2777_v15, %v2739_v45 }
 0x57c   : > { %2810 = vst.msk [vmem:[%s5146_s17 + $0x50] sm:$0xff] %vm2799_vm5, %v2793_v17  ;;  %v2741_v49 = vpop.permute.xlu0 %2740 }
 0x57d   : > { %v2794_v20 = vsel %vm303_vm0, %v2778_v63, %v2741_v49 }
 0x57e   : > { %2811 = vst.msk [vmem:[%s5146_s17 + $0x58] sm:$0xff] %vm2799_vm5, %v2794_v20 }
 0x582   : > { %v2743_v10 = vpop.permute.xlu1 %2742 }
 0x583   : > { %v2795_v2 = vsel %vm303_vm0, %v2779_v44, %v2743_v10 }
 0x584   : > { %2812 = vst.msk [vmem:[%s5146_s17 + $0x60] sm:$0xff] %vm2799_vm5, %v2795_v2  ;;  %v2745_v43 = vpop.permute.xlu0 %2744 }
 0x585   : > { %v2796_v0 = vsel %vm303_vm0, %v2780_v14, %v2745_v43 }
 0x586   : > { %2813 = vst.msk [vmem:[%s5146_s17 + $0x68] sm:$0xff] %vm2799_vm5, %v2796_v0 }
 0x58a   : > { %v2747_v48 = vpop.permute.xlu1 %2746 }
 0x58b   : > { %v2797_v42 = vsel %vm303_vm0, %v2781_v34, %v2747_v48 }
 0x58c   : > { %2814 = vst.msk [vmem:[%s5146_s17 + $0x70] sm:$0xff] %vm2799_vm5, %v2797_v42  ;;  %v2749_v51 = vpop.permute.xlu0 %2748 }
 0x58d   : > { %v2798_v8 = vsel %vm303_vm0, %v2782_v13, %v2749_v51 }
 0x58e   : > { %2815 = vst.msk [vmem:[%s5146_s17 + $0x78] sm:$0xff] %vm2799_vm5, %v2798_v8 }
 0x58f PF: > { %s13_s12 = sadd.s32 1, %s3681_s12  }
 0x590   : > { %p10_p4 = scmp.ge.s32.totalorder %s13_s12, 4  }
 0x592   :  { %12 = sbr.rel (!%p10_p4) target bundleno = 1 (0x1), region = 62 }

</bundles_post_ra>
